<compile_context>
chip_gen: v7x
topology: tpu7x:2x2x1
jax: 0.10.0
libtpu: 0.0.40
codegen_flags: <defaults>
</compile_context>

<pallas_src>
import numpy as np
import jax
import jax.numpy as jnp
from jax.experimental import pallas as pl
from jax.experimental.pallas import tpu as pltpu

# ---- constants implied by SocialNavHumanInteraction.__init__ ----
ROBOT_DIM = 4
HUMAN_DIM = 4
N_HUMANS = 10
LIDAR_RAYS = 40
LIDAR_HIST = 1
LIDAR_DIM = LIDAR_HIST * LIDAR_RAYS                  # 40
K1, K2, STRIDE = 5, 3, 2
C1 = C2 = 32
L1 = (LIDAR_RAYS - (K1 - 1) - 1) // STRIDE + 1       # 18
L2 = (L1 - (K2 - 1) - 1) // STRIDE + 1               # 8
LIDAR_OUT = 128
MLP1_DIMS = [150, 100]
MLP2_DIMS = [100, 50]
ATTN_DIMS = [100, 100, 1]
MLP3_DIMS = [150, 100, 100]
HUMAN_OUT = MLP3_DIMS[-1]                            # 100
FC1 = FC2 = 256
ACT_DIM = 2
ACT_PAD = 128                      # lane-dense output; sliced to ACT_DIM outside
OBS_DIM = ROBOT_DIM + LIDAR_DIM + N_HUMANS * HUMAN_DIM               # 84
JOINT_IN = ROBOT_DIM + MLP2_DIMS[1]                  # 54
JOINT_PAD = 64                                       # zero-padded K for mlp3[0]
HEAD_IN = ROBOT_DIM + LIDAR_OUT + HUMAN_OUT          # 232
HEAD_PAD = 256                                       # zero-padded K for linear1
LN_EPS = 1e-5

# Weight blobs, grouped by lane width; each entry's rows are padded to a
# multiple of 16 (bf16 sublane tile) so static in-kernel slices stay aligned.
_W_GROUPS = (
    ("W576", ("wc1",)),
    ("W256", ("wc2", "wl1", "wl2", "w_m1f")),
    ("W150", ("w1a", "w3a")),
    ("W128", ("wl", "wm")),
    ("W100", ("w1b", "wa1_g", "wa2", "w3b", "w3c")),
    ("W050", ("w2b",)),
)
_BLOB_NAMES = tuple(g[0] for g in _W_GROUPS)


# --------------------------------------------------------------------------
# shared math (kernel body on tile refs/values == pure-JAX reference)
# --------------------------------------------------------------------------
def _forward_math(robot, lidar, hum_blocks, w, b):
    """Shared forward math.

    robot:      (T, 4)  f32
    lidar:      (T, 40) f32
    hum_blocks: (10, T, 4) human-major (block h holds human h of every env).
                May be a Pallas Ref (indexed per block) or a plain array.
    Human-branch activations are (10*T, F) with row order h*T + e, so per-env
    reductions are 10 aligned static row slices (no selection matmuls).
    """
    f32 = jnp.float32
    T = robot.shape[0]
    lrelu = lambda x: jnp.where(x >= 0, x, 0.01 * x)
    relu = lambda x: jnp.maximum(x, 0.0)

    def wdot(a, m):          # MXU matmul: bf16 operands, f32 accumulation
        return jnp.dot(a.astype(m.dtype), m, preferred_element_type=f32)

    def seg_sum(x):          # (10T, F) -> (T, F): per-env sum over humans
        acc = x[0:T]
        for h in range(1, N_HUMANS):
            acc = acc + x[h * T:(h + 1) * T]
        return acc

    def seg_max(x):          # (10T, F) -> (T, F): per-env max over humans
        acc = x[0:T]
        for h in range(1, N_HUMANS):
            acc = jnp.maximum(acc, x[h * T:(h + 1) * T])
        return acc

    def expand(x):           # (T, F) -> (10T, F): replicate per-env rows
        return jnp.concatenate([x] * N_HUMANS, axis=0)

    # ---- lidar path: Conv1d layers expressed as dense matmuls (NCW flatten) ----
    h1 = lrelu(wdot(lidar, w["wc1"]) + b["bc1"])              # (T, 32*18)
    h2 = lrelu(wdot(h1, w["wc2"]) + b["bc2"])                 # (T, 32*8)
    lidar_feat = wdot(h2, w["wl"]) + b["bl"]                  # (T, 128)

    # ---- human interaction branch (get_human_output_vec, with_om=False) ----
    hs_blocks, mask_blocks = [], []
    for h in range(N_HUMANS):
        hb = hum_blocks[h]                                    # (T, 4)
        hs_blocks.append(jnp.concatenate([robot, hb], axis=-1))
        mask_blocks.append(
            (jnp.max(jnp.abs(hb), axis=-1, keepdims=True) > 0).astype(f32))
    hstate = jnp.concatenate(hs_blocks, axis=0)               # (10T, 8)
    mask = jnp.concatenate(mask_blocks, axis=0)               # (10T, 1)
    cnt = seg_sum(mask)                                       # (T, 1) valid humans
    count = jnp.maximum(cnt, 1.0)

    m1 = relu(wdot(hstate, w["w1a"]) + b["b1a"])              # (10T, 150)
    m1 = relu(wdot(m1, w["w1b"]) + b["b1b"])                  # (10T, 100)

    # Fused same-LHS pair: one MXU pass gives both mlp2-layer-1 and attn wa1_m.
    fo = wdot(m1, w["w_m1f"])                                 # (10T, 256)
    m2 = wdot(relu(fo[:, :MLP2_DIMS[0]] + b["b2a"]), w["w2b"]) + b["b2b"]   # (10T, 50)
    a1m = fo[:, 128:128 + ATTN_DIMS[0]]                       # (10T, 100) = m1 @ wa1_m

    gmean = seg_sum(m1 * mask) / count                        # (T, 100) masked mean
    gterm = wdot(gmean, w["wa1_g"])                           # (T, 100), env-level matmul
    a1 = relu(a1m + expand(gterm) + b["ba1"])                 # (10T, 100)
    a2 = relu(wdot(a1, w["wa2"]) + b["ba2"])                  # (10T, 100)
    # N=1 attention head off the MXU: VPU multiply + lane reduce.
    scores = jnp.sum(a2 * b["wa3"], axis=-1, keepdims=True) + b["ba3"]      # (10T, 1)

    # Masked softmax with a *per-env* max (matches torch.softmax over the valid
    # humans of each env; all-masked / padded envs give weights == 0 and are
    # overwritten by the learned no-human embedding below, matching torch).
    scores = jnp.where(mask > 0, scores, -1e30)
    wnum = jnp.exp(scores - expand(seg_max(scores))) * mask   # (10T, 1)
    den = seg_sum(wnum)                                       # (T, 1)
    num = seg_sum(m2 * wnum)                                  # (T, 50)
    wfeat = num / jnp.where(den > 0, den, 1.0)                # (T, 50); 0 if no humans

    joint = jnp.concatenate(
        [robot, wfeat, jnp.zeros((T, JOINT_PAD - JOINT_IN), f32)], axis=-1)  # (T, 64)
    j = relu(wdot(joint, w["w3a"]) + b["b3a"])
    j = relu(wdot(j, w["w3b"]) + b["b3b"])
    hout = wdot(j, w["w3c"]) + b["b3c"]                       # (T, 100)
    hout = jnp.where(cnt < 0.5, b["emb"] + jnp.zeros_like(hout), hout)

    # ---- head: linear1 -> LayerNorm -> leaky -> linear2 -> leaky -> tanh ----
    head_in = jnp.concatenate(
        [robot, lidar_feat, hout, jnp.zeros((T, HEAD_PAD - HEAD_IN), f32)], axis=-1)
    x = wdot(head_in, w["wl1"]) + b["bl1"]                    # (T, 256)
    mu = jnp.mean(x, axis=-1, keepdims=True)
    var = jnp.mean((x - mu) ** 2, axis=-1, keepdims=True)
    x = (x - mu) * jax.lax.rsqrt(var + LN_EPS) * b["ln_g"] + b["ln_b"]
    x = lrelu(x)
    x = lrelu(wdot(x, w["wl2"]) + b["bl2"])
    return jnp.tanh(wdot(x, w["wm"]) + b["bm"])               # (T, 128); lanes >= 2 zero


def _make_kernel(layout_w, layout_b):
    n_blob = len(_BLOB_NAMES)

    def kernel(robot_ref, lidar_ref, hum_ref, bias_ref, *rest):
        wref = dict(zip(_BLOB_NAMES, rest[:n_blob]))
        out_ref = rest[n_blob]
        # Static slices of the resident packed blobs (no runtime index math).
        w = {name: wref[blob][off:off + rows, :]
             for name, (blob, off, rows) in layout_w.items()}
        b = {name: bias_ref[row:row + 1, 0:width]
             for name, (row, width) in layout_b.items()}
        act = _forward_math(robot_ref[...], lidar_ref[...], hum_ref, w, b)
        out_ref[...] = act.astype(out_ref.dtype)

    return kernel


# --------------------------------------------------------------------------
# glue: parameter preparation / packing, specs
# --------------------------------------------------------------------------
def _prepare_mats(params):
    """Final matrices used by both kernel and reference: bf16 weights for the
    MXU, f32 biases / row-params for the VPU."""
    bf16, f32 = jnp.bfloat16, jnp.float32
    w = {k: params[k].astype(bf16) for k in
         ("wc1", "wc2", "wl", "w1a", "w1b", "w2b", "wa2", "w3b", "w3c", "wl2")}
    w["wa1_g"] = params["wa1"][MLP1_DIMS[1]:].astype(bf16)            # (100, 100)

    # fused same-LHS pair [w2a | wa1_m]; each half lane-padded to 128
    w2a_p = jnp.zeros((MLP1_DIMS[1], 128), f32).at[:, :MLP2_DIMS[0]].set(params["w2a"])
    wa1m_p = jnp.zeros((MLP1_DIMS[1], 128), f32).at[:, :ATTN_DIMS[0]].set(
        params["wa1"][:MLP1_DIMS[1]])
    w["w_m1f"] = jnp.concatenate([w2a_p, wa1m_p], axis=1).astype(bf16)  # (100, 256)

    # K-padded weights matching the zero-padded concat activations
    w["w3a"] = jnp.zeros((JOINT_PAD, MLP3_DIMS[0]), f32).at[:JOINT_IN].set(
        params["w3a"]).astype(bf16)                                    # (64, 150)
    w["wl1"] = jnp.zeros((HEAD_PAD, FC1), f32).at[:HEAD_IN].set(
        params["wl1"]).astype(bf16)                                    # (256, 256)
    w["wm"] = jnp.zeros((FC2, ACT_PAD), f32).at[:, :ACT_DIM].set(
        params["wm"]).astype(bf16)                                     # (256, 128)

    b = {k: params[k].astype(f32) for k in
         ("bc1", "bc2", "bl", "b1a", "b1b", "b2a", "b2b", "ba1", "ba2", "ba3",
          "b3a", "b3b", "b3c", "emb", "bl1", "ln_g", "ln_b", "bl2")}
    b["bm"] = jnp.zeros((1, ACT_PAD), f32).at[:, :ACT_DIM].set(params["bm"])
    b["wa3"] = params["wa3"].T.astype(f32)           # (1, 100): VPU reduce weight
    return w, b


def _pack_weights(w):
    """Concatenate bf16 weights (grouped by lane width) into a few blobs."""
    blobs, layout = {}, {}
    for blob_name, names in _W_GROUPS:
        width = w[names[0]].shape[1]
        parts, off = [], 0
        for n in names:
            m = w[n]
            assert m.shape[1] == width
            rows = m.shape[0]
            pad = (-rows) % 16                       # bf16 sublane tile
            parts.append(jnp.pad(m, ((0, pad), (0, 0))))
            layout[n] = (blob_name, off, rows)
            off += rows + pad
        blobs[blob_name] = jnp.concatenate(parts, axis=0)
    return blobs, layout


def _pack_biases(b):
    """Stack all 1-row f32 params into one (rows, max_width) blob."""
    width = max(v.shape[1] for v in b.values())
    names = sorted(b)
    rows, layout = [], {}
    for r, n in enumerate(names):
        v = b[n]
        rows.append(jnp.pad(v, ((0, 0), (0, width - v.shape[1]))))
        layout[n] = (r, v.shape[1])
    blob = jnp.concatenate(rows, axis=0)
    pad = (-len(names)) % 8                          # f32 sublane tile
    if pad:
        blob = jnp.pad(blob, ((0, pad), (0, 0)))
    return blob, layout


def _tensorcores_per_chip():
    """Best-effort detection: v7x has 2 TensorCores per chip; grid tiles are
    sharded across them when dimension_semantics=('parallel',)."""
    try:
        kind = (getattr(jax.devices()[0], "device_kind", "") or "").lower()
        if "v7" in kind:
            return 2
    except Exception:
        pass
    return 1


def _cost_estimate(rows, w):
    per_env = ("wc1", "wc2", "wl", "wa1_g", "w3a", "w3b", "w3c", "wl1", "wl2", "wm")
    per_hum = ("w1a", "w1b", "w_m1f", "w2b", "wa2")
    mm = lambda names, mult: 2 * rows * mult * sum(
        w[k].shape[0] * w[k].shape[1] for k in names)
    flops = mm(per_env, 1) + mm(per_hum, N_HUMANS)
    weight_bytes = sum(int(np.prod(v.shape)) * v.dtype.itemsize for v in w.values())
    bytes_accessed = rows * (OBS_DIM + ACT_PAD) * 4 + weight_bytes
    transcendentals = rows * (N_HUMANS + ACT_PAD + 2)
    return pl.CostEstimate(flops=int(flops), transcendentals=int(transcendentals),
                           bytes_accessed=int(bytes_accessed))


# --------------------------------------------------------------------------
# entry points
# --------------------------------------------------------------------------
def social_nav_forward(obs, params, tile_b=128):
    """Pallas forward.  obs: (B, 84) or (84,).  Returns (B, 2) actions.

    tile_b: batch tile (rows per grid step).  128 fills the MXU on v5e and
    gives 50% row fill on v6e/v7x; use 256 on v6e/v7x when the batch allows.
    """
    assert tile_b % 8 == 0, "tile_b must be a multiple of 8 (f32 sublane tile)"
    if obs.ndim == 1:
        obs = obs[None]
    obs = obs.astype(jnp.float32)
    B = obs.shape[0]

    num_tiles = -(-B // tile_b)
    cores = _tensorcores_per_chip()
    if num_tiles > 1 and num_tiles % cores:
        num_tiles += cores - num_tiles % cores       # even split across TCs (v7x)
    B_pad = num_tiles * tile_b

    obs_p = jnp.pad(obs, ((0, B_pad - B), (0, 0)))   # padded envs: zero obs -> no humans
    robot = obs_p[:, :ROBOT_DIM]
    lidar = obs_p[:, ROBOT_DIM:ROBOT_DIM + LIDAR_DIM]
    hum = obs_p[:, ROBOT_DIM + LIDAR_DIM:].reshape(B_pad, N_HUMANS, HUMAN_DIM)
    hum = jnp.transpose(hum, (1, 0, 2))              # (10, B_pad, 4) human-major

    mats_w, mats_b = _prepare_mats(params)
    wblobs, layout_w = _pack_weights(mats_w)
    bias_blob, layout_b = _pack_biases(mats_b)
    kernel = _make_kernel(layout_w, layout_b)

    # Constant-index operands (bias + weight blobs, ~1.3 MiB total) are DMA'd
    # once; Pallas skips the copy on grid steps with an unchanged block index,
    # so no pipeline_mode override is needed.
    in_specs = [
        pl.BlockSpec((tile_b, ROBOT_DIM), lambda i: (i, 0)),
        pl.BlockSpec((tile_b, LIDAR_DIM), lambda i: (i, 0)),
        pl.BlockSpec((N_HUMANS, tile_b, HUMAN_DIM), lambda i: (0, i, 0)),
        pl.BlockSpec(bias_blob.shape, lambda i: (0, 0)),
    ] + [pl.BlockSpec(wblobs[n].shape, lambda i: (0, 0)) for n in _BLOB_NAMES]

    out = pl.pallas_call(
        kernel,
        out_shape=jax.ShapeDtypeStruct((B_pad, ACT_PAD), jnp.float32),
        grid=(num_tiles,),
        in_specs=in_specs,
        out_specs=pl.BlockSpec((tile_b, ACT_PAD), lambda i: (i, 0)),
        compiler_params=pltpu.CompilerParams(
            dimension_semantics=("parallel",),
            vmem_limit_bytes=32 * 1024 * 1024),
        cost_estimate=_cost_estimate(B_pad, mats_w),
    )(robot, lidar, hum, bias_blob, *[wblobs[n] for n in _BLOB_NAMES])
    return out[:B, :ACT_DIM]


def social_nav_reference(obs, params):
    """Pure-JAX reference using the same math and bf16 weight rounding."""
    if obs.ndim == 1:
        obs = obs[None]
    obs = obs.astype(jnp.float32)
    B = obs.shape[0]
    robot = obs[:, :ROBOT_DIM]
    lidar = obs[:, ROBOT_DIM:ROBOT_DIM + LIDAR_DIM]
    hum = obs[:, ROBOT_DIM + LIDAR_DIM:].reshape(B, N_HUMANS, HUMAN_DIM)
    hum = jnp.transpose(hum, (1, 0, 2))
    mats_w, mats_b = _prepare_mats(params)
    act = _forward_math(robot, lidar, hum, mats_w, mats_b)
    return act[:, :ACT_DIM]


# --------------------------------------------------------------------------
# deterministic synthetic parameter construction
# --------------------------------------------------------------------------
def _xavier(key, fan_in, fan_out, gain=0.5):
    std = gain * np.sqrt(2.0 / (fan_in + fan_out))
    return std * jax.random.normal(key, (fan_in, fan_out), jnp.float32)


def init_params(key):
    ks = iter(jax.random.split(key, 32))
    nk = lambda: next(ks)
    zeros = lambda n: jnp.zeros((1, n), jnp.float32)

    # Conv1d weights in torch layout (out_ch, in_ch, k) -> dense matmul matrices
    # acting on the channel-major flattened activations (matches torch.flatten).
    w1 = 0.2 * jax.random.normal(nk(), (C1, LIDAR_HIST, K1), jnp.float32)
    b1 = 0.05 * jax.random.normal(nk(), (C1,), jnp.float32)
    w2 = 0.1 * jax.random.normal(nk(), (C2, C1, K2), jnp.float32)
    b2 = 0.05 * jax.random.normal(nk(), (C2,), jnp.float32)
    w1n, b1n, w2n, b2n = (np.asarray(x) for x in (w1, b1, w2, b2))

    wc1 = np.zeros((LIDAR_RAYS, C1 * L1), np.float32)
    for c in range(C1):
        for j in range(L1):
            for k in range(K1):
                wc1[STRIDE * j + k, c * L1 + j] = w1n[c, 0, k]
    bc1 = np.repeat(b1n, L1)[None, :].astype(np.float32)

    wc2 = np.zeros((C1 * L1, C2 * L2), np.float32)
    for c2 in range(C2):
        for m in range(L2):
            for c1 in range(C1):
                for k in range(K2):
                    wc2[c1 * L1 + STRIDE * m + k, c2 * L2 + m] = w2n[c2, c1, k]
    bc2 = np.repeat(b2n, L2)[None, :].astype(np.float32)

    return dict(
        wc1=jnp.asarray(wc1), bc1=jnp.asarray(bc1),
        wc2=jnp.asarray(wc2), bc2=jnp.asarray(bc2),
        wl=_xavier(nk(), C2 * L2, LIDAR_OUT), bl=zeros(LIDAR_OUT),
        w1a=_xavier(nk(), ROBOT_DIM + HUMAN_DIM, MLP1_DIMS[0]), b1a=zeros(MLP1_DIMS[0]),
        w1b=_xavier(nk(), MLP1_DIMS[0], MLP1_DIMS[1]), b1b=zeros(MLP1_DIMS[1]),
        w2a=_xavier(nk(), MLP1_DIMS[1], MLP2_DIMS[0]), b2a=zeros(MLP2_DIMS[0]),
        w2b=_xavier(nk(), MLP2_DIMS[0], MLP2_DIMS[1]), b2b=zeros(MLP2_DIMS[1]),
        wa1=_xavier(nk(), 2 * MLP1_DIMS[1], ATTN_DIMS[0]), ba1=zeros(ATTN_DIMS[0]),
        wa2=_xavier(nk(), ATTN_DIMS[0], ATTN_DIMS[1]), ba2=zeros(ATTN_DIMS[1]),
        wa3=_xavier(nk(), ATTN_DIMS[1], ATTN_DIMS[2]), ba3=zeros(ATTN_DIMS[2]),
        w3a=_xavier(nk(), MLP2_DIMS[1] + ROBOT_DIM, MLP3_DIMS[0]), b3a=zeros(MLP3_DIMS[0]),
        w3b=_xavier(nk(), MLP3_DIMS[0], MLP3_DIMS[1]), b3b=zeros(MLP3_DIMS[1]),
        w3c=_xavier(nk(), MLP3_DIMS[1], MLP3_DIMS[2]), b3c=zeros(MLP3_DIMS[2]),
        emb=0.1 * jax.random.normal(nk(), (1, HUMAN_OUT), jnp.float32),
        wl1=_xavier(nk(), ROBOT_DIM + LIDAR_OUT + HUMAN_OUT, FC1), bl1=zeros(FC1),
        ln_g=jnp.ones((1, FC1), jnp.float32), ln_b=zeros(FC1),
        wl2=_xavier(nk(), FC1, FC2), bl2=zeros(FC2),
        wm=_xavier(nk(), FC2, ACT_DIM), bm=zeros(ACT_DIM),
    )


if __name__ == "__main__":
    key = jax.random.PRNGKey(0)
    pkey, okey = jax.random.split(key)
    params = init_params(pkey)

    B = 20                       # not a multiple of the batch tile -> exercises padding
    obs = jax.random.normal(okey, (B, OBS_DIM), jnp.float32)
    # exercise the padded-human mask and the "no humans" embedding path
    human = obs[:, ROBOT_DIM + LIDAR_DIM:].reshape(B, N_HUMANS, HUMAN_DIM)
    human = human.at[0].set(0.0)        # env 0: zero humans -> no_human_embedding
    human = human.at[1, 5:].set(0.0)    # env 1: only 5 valid humans
    obs = obs.at[:, ROBOT_DIM + LIDAR_DIM:].set(human.reshape(B, -1))

    # tile_b=16 keeps the smoke test small while exercising the multi-tile grid
    # and batch padding; the performance default is tile_b=128 (256 on v6e/v7x).
    action = social_nav_forward(obs, params, tile_b=16)
    action = jax.block_until_ready(action)

    ref = social_nav_reference(obs, params)
    assert action.shape == (B, ACT_DIM)
    assert bool(jnp.all(jnp.isfinite(action)))
    assert bool(jnp.allclose(action, ref, atol=2e-3, rtol=2e-3))
    print("KERNEL_OK")
</pallas_src>

<mosaic_0001>
module attributes {stable_mosaic.version = 11 : i64} {
  func.func @kernel(%arg0: i32, %arg1: memref<16x4xf32, #tpu.memory_space<vmem>>, %arg2: memref<16x40xf32, #tpu.memory_space<vmem>>, %arg3: memref<10x16x4xf32, #tpu.memory_space<vmem>>, %arg4: memref<24x576xf32, #tpu.memory_space<vmem>>, %arg5: memref<48x576xbf16, #tpu.memory_space<vmem>>, %arg6: memref<1200x256xbf16, #tpu.memory_space<vmem>>, %arg7: memref<80x150xbf16, #tpu.memory_space<vmem>>, %arg8: memref<512x128xbf16, #tpu.memory_space<vmem>>, %arg9: memref<656x100xbf16, #tpu.memory_space<vmem>>, %arg10: memref<112x50xbf16, #tpu.memory_space<vmem>>, %arg11: memref<16x128xf32, #tpu.memory_space<vmem>>) attributes {dimension_semantics = [#tpu.dimension_semantics<parallel>], iteration_bounds = array<i64: 2>, scalar_prefetch = 0 : i64, scratch_operands = 0 : i64, tpu.core_type = #tpu.core_type<tc>, window_params = [{transform_indices = @transform_0, window_bounds = array<i64: 16, 4>}, {transform_indices = @transform_1, window_bounds = array<i64: 16, 40>}, {transform_indices = @transform_2, window_bounds = array<i64: 10, 16, 4>}, {pipeline_mode = #tpu.pipeline_mode<synchronous>, transform_indices = @transform_3, window_bounds = array<i64: 24, 576>}, {pipeline_mode = #tpu.pipeline_mode<synchronous>, transform_indices = @transform_4, window_bounds = array<i64: 48, 576>}, {pipeline_mode = #tpu.pipeline_mode<synchronous>, transform_indices = @transform_5, window_bounds = array<i64: 1200, 256>}, {pipeline_mode = #tpu.pipeline_mode<synchronous>, transform_indices = @transform_6, window_bounds = array<i64: 80, 150>}, {pipeline_mode = #tpu.pipeline_mode<synchronous>, transform_indices = @transform_7, window_bounds = array<i64: 512, 128>}, {pipeline_mode = #tpu.pipeline_mode<synchronous>, transform_indices = @transform_8, window_bounds = array<i64: 656, 100>}, {pipeline_mode = #tpu.pipeline_mode<synchronous>, transform_indices = @transform_9, window_bounds = array<i64: 112, 50>}, {transform_indices = @transform_10, window_bounds = array<i64: 16, 128>}]} {
    %c0 = arith.constant 0 : index
    %c0_0 = arith.constant 0 : index
    %0 = vector.load %arg5[%c0, %c0_0] : memref<48x576xbf16, #tpu.memory_space<vmem>>, vector<40x576xbf16>
    %c0_1 = arith.constant 0 : index
    %c0_2 = arith.constant 0 : index
    %1 = vector.load %arg6[%c0_1, %c0_2] : memref<1200x256xbf16, #tpu.memory_space<vmem>>, vector<576x256xbf16>
    %c576 = arith.constant 576 : index
    %c0_3 = arith.constant 0 : index
    %2 = vector.load %arg6[%c576, %c0_3] : memref<1200x256xbf16, #tpu.memory_space<vmem>>, vector<256x256xbf16>
    %c832 = arith.constant 832 : index
    %c0_4 = arith.constant 0 : index
    %3 = vector.load %arg6[%c832, %c0_4] : memref<1200x256xbf16, #tpu.memory_space<vmem>>, vector<256x256xbf16>
    %c1088 = arith.constant 1088 : index
    %c0_5 = arith.constant 0 : index
    %4 = vector.load %arg6[%c1088, %c0_5] : memref<1200x256xbf16, #tpu.memory_space<vmem>>, vector<100x256xbf16>
    %c0_6 = arith.constant 0 : index
    %c0_7 = arith.constant 0 : index
    %5 = vector.load %arg7[%c0_6, %c0_7] : memref<80x150xbf16, #tpu.memory_space<vmem>>, vector<8x150xbf16>
    %c16 = arith.constant 16 : index
    %c0_8 = arith.constant 0 : index
    %6 = vector.load %arg7[%c16, %c0_8] : memref<80x150xbf16, #tpu.memory_space<vmem>>, vector<64x150xbf16>
    %c0_9 = arith.constant 0 : index
    %c0_10 = arith.constant 0 : index
    %7 = vector.load %arg8[%c0_9, %c0_10] : memref<512x128xbf16, #tpu.memory_space<vmem>>, vector<256x128xbf16>
    %c256 = arith.constant 256 : index
    %c0_11 = arith.constant 0 : index
    %8 = vector.load %arg8[%c256, %c0_11] : memref<512x128xbf16, #tpu.memory_space<vmem>>, vector<256x128xbf16>
    %c0_12 = arith.constant 0 : index
    %c0_13 = arith.constant 0 : index
    %9 = vector.load %arg9[%c0_12, %c0_13] : memref<656x100xbf16, #tpu.memory_space<vmem>>, vector<150x100xbf16>
    %c160 = arith.constant 160 : index
    %c0_14 = arith.constant 0 : index
    %10 = vector.load %arg9[%c160, %c0_14] : memref<656x100xbf16, #tpu.memory_space<vmem>>, vector<100x100xbf16>
    %c272 = arith.constant 272 : index
    %c0_15 = arith.constant 0 : index
    %11 = vector.load %arg9[%c272, %c0_15] : memref<656x100xbf16, #tpu.memory_space<vmem>>, vector<100x100xbf16>
    %c384 = arith.constant 384 : index
    %c0_16 = arith.constant 0 : index
    %12 = vector.load %arg9[%c384, %c0_16] : memref<656x100xbf16, #tpu.memory_space<vmem>>, vector<150x100xbf16>
    %c544 = arith.constant 544 : index
    %c0_17 = arith.constant 0 : index
    %13 = vector.load %arg9[%c544, %c0_17] : memref<656x100xbf16, #tpu.memory_space<vmem>>, vector<100x100xbf16>
    %c0_18 = arith.constant 0 : index
    %c0_19 = arith.constant 0 : index
    %14 = vector.load %arg10[%c0_18, %c0_19] : memref<112x50xbf16, #tpu.memory_space<vmem>>, vector<100x50xbf16>
    %c0_20 = arith.constant 0 : index
    %c0_21 = arith.constant 0 : index
    %15 = vector.load %arg4[%c0_20, %c0_21] : memref<24x576xf32, #tpu.memory_space<vmem>>, vector<1x150xf32>
    %c1 = arith.constant 1 : index
    %c0_22 = arith.constant 0 : index
    %16 = vector.load %arg4[%c1, %c0_22] : memref<24x576xf32, #tpu.memory_space<vmem>>, vector<1x100xf32>
    %c2 = arith.constant 2 : index
    %c0_23 = arith.constant 0 : index
    %17 = vector.load %arg4[%c2, %c0_23] : memref<24x576xf32, #tpu.memory_space<vmem>>, vector<1x100xf32>
    %c3 = arith.constant 3 : index
    %c0_24 = arith.constant 0 : index
    %18 = vector.load %arg4[%c3, %c0_24] : memref<24x576xf32, #tpu.memory_space<vmem>>, vector<1x50xf32>
    %c4 = arith.constant 4 : index
    %c0_25 = arith.constant 0 : index
    %19 = vector.load %arg4[%c4, %c0_25] : memref<24x576xf32, #tpu.memory_space<vmem>>, vector<1x150xf32>
    %c5 = arith.constant 5 : index
    %c0_26 = arith.constant 0 : index
    %20 = vector.load %arg4[%c5, %c0_26] : memref<24x576xf32, #tpu.memory_space<vmem>>, vector<1x100xf32>
    %c6 = arith.constant 6 : index
    %c0_27 = arith.constant 0 : index
    %21 = vector.load %arg4[%c6, %c0_27] : memref<24x576xf32, #tpu.memory_space<vmem>>, vector<1x100xf32>
    %c7 = arith.constant 7 : index
    %c0_28 = arith.constant 0 : index
    %22 = vector.load %arg4[%c7, %c0_28] : memref<24x576xf32, #tpu.memory_space<vmem>>, vector<1x100xf32>
    %c8 = arith.constant 8 : index
    %c0_29 = arith.constant 0 : index
    %23 = vector.load %arg4[%c8, %c0_29] : memref<24x576xf32, #tpu.memory_space<vmem>>, vector<1x100xf32>
    %c9 = arith.constant 9 : index
    %c0_30 = arith.constant 0 : index
    %24 = vector.load %arg4[%c9, %c0_30] : memref<24x576xf32, #tpu.memory_space<vmem>>, vector<1x1xf32>
    %c10 = arith.constant 10 : index
    %c0_31 = arith.constant 0 : index
    %25 = vector.load %arg4[%c10, %c0_31] : memref<24x576xf32, #tpu.memory_space<vmem>>, vector<1x576xf32>
    %c11 = arith.constant 11 : index
    %c0_32 = arith.constant 0 : index
    %26 = vector.load %arg4[%c11, %c0_32] : memref<24x576xf32, #tpu.memory_space<vmem>>, vector<1x256xf32>
    %c12 = arith.constant 12 : index
    %c0_33 = arith.constant 0 : index
    %27 = vector.load %arg4[%c12, %c0_33] : memref<24x576xf32, #tpu.memory_space<vmem>>, vector<1x128xf32>
    %c13 = arith.constant 13 : index
    %c0_34 = arith.constant 0 : index
    %28 = vector.load %arg4[%c13, %c0_34] : memref<24x576xf32, #tpu.memory_space<vmem>>, vector<1x256xf32>
    %c14 = arith.constant 14 : index
    %c0_35 = arith.constant 0 : index
    %29 = vector.load %arg4[%c14, %c0_35] : memref<24x576xf32, #tpu.memory_space<vmem>>, vector<1x256xf32>
    %c15 = arith.constant 15 : index
    %c0_36 = arith.constant 0 : index
    %30 = vector.load %arg4[%c15, %c0_36] : memref<24x576xf32, #tpu.memory_space<vmem>>, vector<1x128xf32>
    %c16_37 = arith.constant 16 : index
    %c0_38 = arith.constant 0 : index
    %31 = vector.load %arg4[%c16_37, %c0_38] : memref<24x576xf32, #tpu.memory_space<vmem>>, vector<1x100xf32>
    %c17 = arith.constant 17 : index
    %c0_39 = arith.constant 0 : index
    %32 = vector.load %arg4[%c17, %c0_39] : memref<24x576xf32, #tpu.memory_space<vmem>>, vector<1x256xf32>
    %c18 = arith.constant 18 : index
    %c0_40 = arith.constant 0 : index
    %33 = vector.load %arg4[%c18, %c0_40] : memref<24x576xf32, #tpu.memory_space<vmem>>, vector<1x256xf32>
    %c19 = arith.constant 19 : index
    %c0_41 = arith.constant 0 : index
    %34 = vector.load %arg4[%c19, %c0_41] : memref<24x576xf32, #tpu.memory_space<vmem>>, vector<1x100xf32>
    %c0_42 = arith.constant 0 : index
    %c0_43 = arith.constant 0 : index
    %35 = vector.load %arg1[%c0_42, %c0_43] : memref<16x4xf32, #tpu.memory_space<vmem>>, vector<16x4xf32>
    %c0_44 = arith.constant 0 : index
    %c0_45 = arith.constant 0 : index
    %36 = vector.load %arg2[%c0_44, %c0_45] : memref<16x40xf32, #tpu.memory_space<vmem>>, vector<16x40xf32>
    %37 = arith.truncf %36 : vector<16x40xf32> to vector<16x40xbf16>
    %cst = arith.constant dense<0.000000e+00> : vector<16x576xf32>
    %38 = tpu.matmul %37, %0, %cst {dimension_numbers = #tpu.dot_dimension_numbers<[1], [0], [0], [1], [0, 0, 1, 1], [], []>} : vector<16x40xbf16>, vector<40x576xbf16>, vector<16x576xf32> -> vector<16x576xf32>
    %39 = vector.broadcast %25 : vector<1x576xf32> to vector<16x576xf32>
    %40 = arith.addf %38, %39 : vector<16x576xf32>
    %cst_46 = arith.constant 0.000000e+00 : f32
    %41 = vector.broadcast %cst_46 : f32 to vector<16x576xf32>
    %42 = arith.cmpf oge, %40, %41 : vector<16x576xf32>
    %cst_47 = arith.constant 0.00999999977 : f32
    %43 = vector.broadcast %cst_47 : f32 to vector<16x576xf32>
    %44 = arith.mulf %43, %40 : vector<16x576xf32>
    %45 = arith.select %42, %40, %44 : vector<16x576xi1>, vector<16x576xf32>
    %46 = arith.truncf %45 : vector<16x576xf32> to vector<16x576xbf16>
    %cst_48 = arith.constant dense<0.000000e+00> : vector<16x256xf32>
    %47 = tpu.matmul %46, %1, %cst_48 {dimension_numbers = #tpu.dot_dimension_numbers<[1], [0], [0], [1], [0, 0, 1, 1], [], []>} : vector<16x576xbf16>, vector<576x256xbf16>, vector<16x256xf32> -> vector<16x256xf32>
    %48 = vector.broadcast %26 : vector<1x256xf32> to vector<16x256xf32>
    %49 = arith.addf %47, %48 : vector<16x256xf32>
    %cst_49 = arith.constant 0.000000e+00 : f32
    %50 = vector.broadcast %cst_49 : f32 to vector<16x256xf32>
    %51 = arith.cmpf oge, %49, %50 : vector<16x256xf32>
    %cst_50 = arith.constant 0.00999999977 : f32
    %52 = vector.broadcast %cst_50 : f32 to vector<16x256xf32>
    %53 = arith.mulf %52, %49 : vector<16x256xf32>
    %54 = arith.select %51, %49, %53 : vector<16x256xi1>, vector<16x256xf32>
    %55 = arith.truncf %54 : vector<16x256xf32> to vector<16x256xbf16>
    %cst_51 = arith.constant dense<0.000000e+00> : vector<16x128xf32>
    %56 = tpu.matmul %55, %7, %cst_51 {dimension_numbers = #tpu.dot_dimension_numbers<[1], [0], [0], [1], [0, 0, 1, 1], [], []>} : vector<16x256xbf16>, vector<256x128xbf16>, vector<16x128xf32> -> vector<16x128xf32>
    %57 = vector.broadcast %27 : vector<1x128xf32> to vector<16x128xf32>
    %58 = arith.addf %56, %57 : vector<16x128xf32>
    %c0_52 = arith.constant 0 : index
    %c0_53 = arith.constant 0 : index
    %c0_54 = arith.constant 0 : index
    %59 = vector.load %arg3[%c0_52, %c0_53, %c0_54] : memref<10x16x4xf32, #tpu.memory_space<vmem>>, vector<1x16x4xf32>
    %60 = vector.shape_cast %59 : vector<1x16x4xf32> to vector<16x4xf32>
    %61 = tpu.concatenate %35, %60 in 1 : vector<16x4xf32>, vector<16x4xf32> -> vector<16x8xf32>
    %62 = math.absf %60 : vector<16x4xf32>
    %cst_55 = arith.constant dense<0xFF800000> : vector<16xf32>
    %63 = vector.multi_reduction <maximumf>, %62, %cst_55 [1] : vector<16x4xf32> to vector<16xf32>
    %64 = vector.shape_cast %63 : vector<16xf32> to vector<16x1xf32>
    %cst_56 = arith.constant 0.000000e+00 : f32
    %65 = vector.broadcast %cst_56 : f32 to vector<16x1xf32>
    %66 = arith.cmpf ogt, %64, %65 : vector<16x1xf32>
    %67 = arith.extui %66 : vector<16x1xi1> to vector<16x1xi32>
    %68 = arith.sitofp %67 : vector<16x1xi32> to vector<16x1xf32>
    %c1_57 = arith.constant 1 : index
    %c0_58 = arith.constant 0 : index
    %c0_59 = arith.constant 0 : index
    %69 = vector.load %arg3[%c1_57, %c0_58, %c0_59] : memref<10x16x4xf32, #tpu.memory_space<vmem>>, vector<1x16x4xf32>
    %70 = vector.shape_cast %69 : vector<1x16x4xf32> to vector<16x4xf32>
    %71 = tpu.concatenate %35, %70 in 1 : vector<16x4xf32>, vector<16x4xf32> -> vector<16x8xf32>
    %72 = math.absf %70 : vector<16x4xf32>
    %cst_60 = arith.constant dense<0xFF800000> : vector<16xf32>
    %73 = vector.multi_reduction <maximumf>, %72, %cst_60 [1] : vector<16x4xf32> to vector<16xf32>
    %74 = vector.shape_cast %73 : vector<16xf32> to vector<16x1xf32>
    %cst_61 = arith.constant 0.000000e+00 : f32
    %75 = vector.broadcast %cst_61 : f32 to vector<16x1xf32>
    %76 = arith.cmpf ogt, %74, %75 : vector<16x1xf32>
    %77 = arith.extui %76 : vector<16x1xi1> to vector<16x1xi32>
    %78 = arith.sitofp %77 : vector<16x1xi32> to vector<16x1xf32>
    %c2_62 = arith.constant 2 : index
    %c0_63 = arith.constant 0 : index
    %c0_64 = arith.constant 0 : index
    %79 = vector.load %arg3[%c2_62, %c0_63, %c0_64] : memref<10x16x4xf32, #tpu.memory_space<vmem>>, vector<1x16x4xf32>
    %80 = vector.shape_cast %79 : vector<1x16x4xf32> to vector<16x4xf32>
    %81 = tpu.concatenate %35, %80 in 1 : vector<16x4xf32>, vector<16x4xf32> -> vector<16x8xf32>
    %82 = math.absf %80 : vector<16x4xf32>
    %cst_65 = arith.constant dense<0xFF800000> : vector<16xf32>
    %83 = vector.multi_reduction <maximumf>, %82, %cst_65 [1] : vector<16x4xf32> to vector<16xf32>
    %84 = vector.shape_cast %83 : vector<16xf32> to vector<16x1xf32>
    %cst_66 = arith.constant 0.000000e+00 : f32
    %85 = vector.broadcast %cst_66 : f32 to vector<16x1xf32>
    %86 = arith.cmpf ogt, %84, %85 : vector<16x1xf32>
    %87 = arith.extui %86 : vector<16x1xi1> to vector<16x1xi32>
    %88 = arith.sitofp %87 : vector<16x1xi32> to vector<16x1xf32>
    %c3_67 = arith.constant 3 : index
    %c0_68 = arith.constant 0 : index
    %c0_69 = arith.constant 0 : index
    %89 = vector.load %arg3[%c3_67, %c0_68, %c0_69] : memref<10x16x4xf32, #tpu.memory_space<vmem>>, vector<1x16x4xf32>
    %90 = vector.shape_cast %89 : vector<1x16x4xf32> to vector<16x4xf32>
    %91 = tpu.concatenate %35, %90 in 1 : vector<16x4xf32>, vector<16x4xf32> -> vector<16x8xf32>
    %92 = math.absf %90 : vector<16x4xf32>
    %cst_70 = arith.constant dense<0xFF800000> : vector<16xf32>
    %93 = vector.multi_reduction <maximumf>, %92, %cst_70 [1] : vector<16x4xf32> to vector<16xf32>
    %94 = vector.shape_cast %93 : vector<16xf32> to vector<16x1xf32>
    %cst_71 = arith.constant 0.000000e+00 : f32
    %95 = vector.broadcast %cst_71 : f32 to vector<16x1xf32>
    %96 = arith.cmpf ogt, %94, %95 : vector<16x1xf32>
    %97 = arith.extui %96 : vector<16x1xi1> to vector<16x1xi32>
    %98 = arith.sitofp %97 : vector<16x1xi32> to vector<16x1xf32>
    %c4_72 = arith.constant 4 : index
    %c0_73 = arith.constant 0 : index
    %c0_74 = arith.constant 0 : index
    %99 = vector.load %arg3[%c4_72, %c0_73, %c0_74] : memref<10x16x4xf32, #tpu.memory_space<vmem>>, vector<1x16x4xf32>
    %100 = vector.shape_cast %99 : vector<1x16x4xf32> to vector<16x4xf32>
    %101 = tpu.concatenate %35, %100 in 1 : vector<16x4xf32>, vector<16x4xf32> -> vector<16x8xf32>
    %102 = math.absf %100 : vector<16x4xf32>
    %cst_75 = arith.constant dense<0xFF800000> : vector<16xf32>
    %103 = vector.multi_reduction <maximumf>, %102, %cst_75 [1] : vector<16x4xf32> to vector<16xf32>
    %104 = vector.shape_cast %103 : vector<16xf32> to vector<16x1xf32>
    %cst_76 = arith.constant 0.000000e+00 : f32
    %105 = vector.broadcast %cst_76 : f32 to vector<16x1xf32>
    %106 = arith.cmpf ogt, %104, %105 : vector<16x1xf32>
    %107 = arith.extui %106 : vector<16x1xi1> to vector<16x1xi32>
    %108 = arith.sitofp %107 : vector<16x1xi32> to vector<16x1xf32>
    %c5_77 = arith.constant 5 : index
    %c0_78 = arith.constant 0 : index
    %c0_79 = arith.constant 0 : index
    %109 = vector.load %arg3[%c5_77, %c0_78, %c0_79] : memref<10x16x4xf32, #tpu.memory_space<vmem>>, vector<1x16x4xf32>
    %110 = vector.shape_cast %109 : vector<1x16x4xf32> to vector<16x4xf32>
    %111 = tpu.concatenate %35, %110 in 1 : vector<16x4xf32>, vector<16x4xf32> -> vector<16x8xf32>
    %112 = math.absf %110 : vector<16x4xf32>
    %cst_80 = arith.constant dense<0xFF800000> : vector<16xf32>
    %113 = vector.multi_reduction <maximumf>, %112, %cst_80 [1] : vector<16x4xf32> to vector<16xf32>
    %114 = vector.shape_cast %113 : vector<16xf32> to vector<16x1xf32>
    %cst_81 = arith.constant 0.000000e+00 : f32
    %115 = vector.broadcast %cst_81 : f32 to vector<16x1xf32>
    %116 = arith.cmpf ogt, %114, %115 : vector<16x1xf32>
    %117 = arith.extui %116 : vector<16x1xi1> to vector<16x1xi32>
    %118 = arith.sitofp %117 : vector<16x1xi32> to vector<16x1xf32>
    %c6_82 = arith.constant 6 : index
    %c0_83 = arith.constant 0 : index
    %c0_84 = arith.constant 0 : index
    %119 = vector.load %arg3[%c6_82, %c0_83, %c0_84] : memref<10x16x4xf32, #tpu.memory_space<vmem>>, vector<1x16x4xf32>
    %120 = vector.shape_cast %119 : vector<1x16x4xf32> to vector<16x4xf32>
    %121 = tpu.concatenate %35, %120 in 1 : vector<16x4xf32>, vector<16x4xf32> -> vector<16x8xf32>
    %122 = math.absf %120 : vector<16x4xf32>
    %cst_85 = arith.constant dense<0xFF800000> : vector<16xf32>
    %123 = vector.multi_reduction <maximumf>, %122, %cst_85 [1] : vector<16x4xf32> to vector<16xf32>
    %124 = vector.shape_cast %123 : vector<16xf32> to vector<16x1xf32>
    %cst_86 = arith.constant 0.000000e+00 : f32
    %125 = vector.broadcast %cst_86 : f32 to vector<16x1xf32>
    %126 = arith.cmpf ogt, %124, %125 : vector<16x1xf32>
    %127 = arith.extui %126 : vector<16x1xi1> to vector<16x1xi32>
    %128 = arith.sitofp %127 : vector<16x1xi32> to vector<16x1xf32>
    %c7_87 = arith.constant 7 : index
    %c0_88 = arith.constant 0 : index
    %c0_89 = arith.constant 0 : index
    %129 = vector.load %arg3[%c7_87, %c0_88, %c0_89] : memref<10x16x4xf32, #tpu.memory_space<vmem>>, vector<1x16x4xf32>
    %130 = vector.shape_cast %129 : vector<1x16x4xf32> to vector<16x4xf32>
    %131 = tpu.concatenate %35, %130 in 1 : vector<16x4xf32>, vector<16x4xf32> -> vector<16x8xf32>
    %132 = math.absf %130 : vector<16x4xf32>
    %cst_90 = arith.constant dense<0xFF800000> : vector<16xf32>
    %133 = vector.multi_reduction <maximumf>, %132, %cst_90 [1] : vector<16x4xf32> to vector<16xf32>
    %134 = vector.shape_cast %133 : vector<16xf32> to vector<16x1xf32>
    %cst_91 = arith.constant 0.000000e+00 : f32
    %135 = vector.broadcast %cst_91 : f32 to vector<16x1xf32>
    %136 = arith.cmpf ogt, %134, %135 : vector<16x1xf32>
    %137 = arith.extui %136 : vector<16x1xi1> to vector<16x1xi32>
    %138 = arith.sitofp %137 : vector<16x1xi32> to vector<16x1xf32>
    %c8_92 = arith.constant 8 : index
    %c0_93 = arith.constant 0 : index
    %c0_94 = arith.constant 0 : index
    %139 = vector.load %arg3[%c8_92, %c0_93, %c0_94] : memref<10x16x4xf32, #tpu.memory_space<vmem>>, vector<1x16x4xf32>
    %140 = vector.shape_cast %139 : vector<1x16x4xf32> to vector<16x4xf32>
    %141 = tpu.concatenate %35, %140 in 1 : vector<16x4xf32>, vector<16x4xf32> -> vector<16x8xf32>
    %142 = math.absf %140 : vector<16x4xf32>
    %cst_95 = arith.constant dense<0xFF800000> : vector<16xf32>
    %143 = vector.multi_reduction <maximumf>, %142, %cst_95 [1] : vector<16x4xf32> to vector<16xf32>
    %144 = vector.shape_cast %143 : vector<16xf32> to vector<16x1xf32>
    %cst_96 = arith.constant 0.000000e+00 : f32
    %145 = vector.broadcast %cst_96 : f32 to vector<16x1xf32>
    %146 = arith.cmpf ogt, %144, %145 : vector<16x1xf32>
    %147 = arith.extui %146 : vector<16x1xi1> to vector<16x1xi32>
    %148 = arith.sitofp %147 : vector<16x1xi32> to vector<16x1xf32>
    %c9_97 = arith.constant 9 : index
    %c0_98 = arith.constant 0 : index
    %c0_99 = arith.constant 0 : index
    %149 = vector.load %arg3[%c9_97, %c0_98, %c0_99] : memref<10x16x4xf32, #tpu.memory_space<vmem>>, vector<1x16x4xf32>
    %150 = vector.shape_cast %149 : vector<1x16x4xf32> to vector<16x4xf32>
    %151 = tpu.concatenate %35, %150 in 1 : vector<16x4xf32>, vector<16x4xf32> -> vector<16x8xf32>
    %152 = math.absf %150 : vector<16x4xf32>
    %cst_100 = arith.constant dense<0xFF800000> : vector<16xf32>
    %153 = vector.multi_reduction <maximumf>, %152, %cst_100 [1] : vector<16x4xf32> to vector<16xf32>
    %154 = vector.shape_cast %153 : vector<16xf32> to vector<16x1xf32>
    %cst_101 = arith.constant 0.000000e+00 : f32
    %155 = vector.broadcast %cst_101 : f32 to vector<16x1xf32>
    %156 = arith.cmpf ogt, %154, %155 : vector<16x1xf32>
    %157 = arith.extui %156 : vector<16x1xi1> to vector<16x1xi32>
    %158 = arith.sitofp %157 : vector<16x1xi32> to vector<16x1xf32>
    %159 = tpu.concatenate %61, %71, %81, %91, %101, %111, %121, %131, %141, %151 in 0 : vector<16x8xf32>, vector<16x8xf32>, vector<16x8xf32>, vector<16x8xf32>, vector<16x8xf32>, vector<16x8xf32>, vector<16x8xf32>, vector<16x8xf32>, vector<16x8xf32>, vector<16x8xf32> -> vector<160x8xf32>
    %160 = tpu.concatenate %68, %78, %88, %98, %108, %118, %128, %138, %148, %158 in 0 : vector<16x1xf32>, vector<16x1xf32>, vector<16x1xf32>, vector<16x1xf32>, vector<16x1xf32>, vector<16x1xf32>, vector<16x1xf32>, vector<16x1xf32>, vector<16x1xf32>, vector<16x1xf32> -> vector<160x1xf32>
    %161 = vector.extract_strided_slice %160 {offsets = [0, 0], sizes = [16, 1], strides = [1, 1]} : vector<160x1xf32> to vector<16x1xf32>
    %162 = vector.extract_strided_slice %160 {offsets = [16, 0], sizes = [16, 1], strides = [1, 1]} : vector<160x1xf32> to vector<16x1xf32>
    %163 = arith.addf %161, %162 : vector<16x1xf32>
    %164 = vector.extract_strided_slice %160 {offsets = [32, 0], sizes = [16, 1], strides = [1, 1]} : vector<160x1xf32> to vector<16x1xf32>
    %165 = arith.addf %163, %164 : vector<16x1xf32>
    %166 = vector.extract_strided_slice %160 {offsets = [48, 0], sizes = [16, 1], strides = [1, 1]} : vector<160x1xf32> to vector<16x1xf32>
    %167 = arith.addf %165, %166 : vector<16x1xf32>
    %168 = vector.extract_strided_slice %160 {offsets = [64, 0], sizes = [16, 1], strides = [1, 1]} : vector<160x1xf32> to vector<16x1xf32>
    %169 = arith.addf %167, %168 : vector<16x1xf32>
    %170 = vector.extract_strided_slice %160 {offsets = [80, 0], sizes = [16, 1], strides = [1, 1]} : vector<160x1xf32> to vector<16x1xf32>
    %171 = arith.addf %169, %170 : vector<16x1xf32>
    %172 = vector.extract_strided_slice %160 {offsets = [96, 0], sizes = [16, 1], strides = [1, 1]} : vector<160x1xf32> to vector<16x1xf32>
    %173 = arith.addf %171, %172 : vector<16x1xf32>
    %174 = vector.extract_strided_slice %160 {offsets = [112, 0], sizes = [16, 1], strides = [1, 1]} : vector<160x1xf32> to vector<16x1xf32>
    %175 = arith.addf %173, %174 : vector<16x1xf32>
    %176 = vector.extract_strided_slice %160 {offsets = [128, 0], sizes = [16, 1], strides = [1, 1]} : vector<160x1xf32> to vector<16x1xf32>
    %177 = arith.addf %175, %176 : vector<16x1xf32>
    %178 = vector.extract_strided_slice %160 {offsets = [144, 0], sizes = [16, 1], strides = [1, 1]} : vector<160x1xf32> to vector<16x1xf32>
    %179 = arith.addf %177, %178 : vector<16x1xf32>
    %cst_102 = arith.constant 1.000000e+00 : f32
    %180 = vector.broadcast %cst_102 : f32 to vector<16x1xf32>
    %181 = arith.maximumf %179, %180 : vector<16x1xf32>
    %182 = arith.truncf %159 : vector<160x8xf32> to vector<160x8xbf16>
    %cst_103 = arith.constant dense<0.000000e+00> : vector<160x150xf32>
    %183 = tpu.matmul %182, %5, %cst_103 {dimension_numbers = #tpu.dot_dimension_numbers<[1], [0], [0], [1], [0, 0, 1, 1], [], []>} : vector<160x8xbf16>, vector<8x150xbf16>, vector<160x150xf32> -> vector<160x150xf32>
    %184 = vector.broadcast %15 : vector<1x150xf32> to vector<160x150xf32>
    %185 = arith.addf %183, %184 : vector<160x150xf32>
    %cst_104 = arith.constant 0.000000e+00 : f32
    %186 = vector.broadcast %cst_104 : f32 to vector<160x150xf32>
    %187 = arith.maximumf %185, %186 : vector<160x150xf32>
    %188 = arith.truncf %187 : vector<160x150xf32> to vector<160x150xbf16>
    %cst_105 = arith.constant dense<0.000000e+00> : vector<160x100xf32>
    %189 = tpu.matmul %188, %9, %cst_105 {dimension_numbers = #tpu.dot_dimension_numbers<[1], [0], [0], [1], [0, 0, 1, 1], [], []>} : vector<160x150xbf16>, vector<150x100xbf16>, vector<160x100xf32> -> vector<160x100xf32>
    %190 = vector.broadcast %16 : vector<1x100xf32> to vector<160x100xf32>
    %191 = arith.addf %189, %190 : vector<160x100xf32>
    %cst_106 = arith.constant 0.000000e+00 : f32
    %192 = vector.broadcast %cst_106 : f32 to vector<160x100xf32>
    %193 = arith.maximumf %191, %192 : vector<160x100xf32>
    %194 = arith.truncf %193 : vector<160x100xf32> to vector<160x100xbf16>
    %cst_107 = arith.constant dense<0.000000e+00> : vector<160x256xf32>
    %195 = tpu.matmul %194, %4, %cst_107 {dimension_numbers = #tpu.dot_dimension_numbers<[1], [0], [0], [1], [0, 0, 1, 1], [], []>} : vector<160x100xbf16>, vector<100x256xbf16>, vector<160x256xf32> -> vector<160x256xf32>
    %196 = vector.extract_strided_slice %195 {offsets = [0, 0], sizes = [160, 100], strides = [1, 1]} : vector<160x256xf32> to vector<160x100xf32>
    %197 = vector.broadcast %17 : vector<1x100xf32> to vector<160x100xf32>
    %198 = arith.addf %196, %197 : vector<160x100xf32>
    %cst_108 = arith.constant 0.000000e+00 : f32
    %199 = vector.broadcast %cst_108 : f32 to vector<160x100xf32>
    %200 = arith.maximumf %198, %199 : vector<160x100xf32>
    %201 = arith.truncf %200 : vector<160x100xf32> to vector<160x100xbf16>
    %cst_109 = arith.constant dense<0.000000e+00> : vector<160x50xf32>
    %202 = tpu.matmul %201, %14, %cst_109 {dimension_numbers = #tpu.dot_dimension_numbers<[1], [0], [0], [1], [0, 0, 1, 1], [], []>} : vector<160x100xbf16>, vector<100x50xbf16>, vector<160x50xf32> -> vector<160x50xf32>
    %203 = vector.broadcast %18 : vector<1x50xf32> to vector<160x50xf32>
    %204 = arith.addf %202, %203 : vector<160x50xf32>
    %205 = vector.extract_strided_slice %195 {offsets = [0, 128], sizes = [160, 100], strides = [1, 1]} : vector<160x256xf32> to vector<160x100xf32>
    %206 = vector.broadcast %160 : vector<160x1xf32> to vector<160x100xf32>
    %207 = arith.mulf %193, %206 : vector<160x100xf32>
    %208 = vector.extract_strided_slice %207 {offsets = [0, 0], sizes = [16, 100], strides = [1, 1]} : vector<160x100xf32> to vector<16x100xf32>
    %209 = vector.extract_strided_slice %207 {offsets = [16, 0], sizes = [16, 100], strides = [1, 1]} : vector<160x100xf32> to vector<16x100xf32>
    %210 = arith.addf %208, %209 : vector<16x100xf32>
    %211 = vector.extract_strided_slice %207 {offsets = [32, 0], sizes = [16, 100], strides = [1, 1]} : vector<160x100xf32> to vector<16x100xf32>
    %212 = arith.addf %210, %211 : vector<16x100xf32>
    %213 = vector.extract_strided_slice %207 {offsets = [48, 0], sizes = [16, 100], strides = [1, 1]} : vector<160x100xf32> to vector<16x100xf32>
    %214 = arith.addf %212, %213 : vector<16x100xf32>
    %215 = vector.extract_strided_slice %207 {offsets = [64, 0], sizes = [16, 100], strides = [1, 1]} : vector<160x100xf32> to vector<16x100xf32>
    %216 = arith.addf %214, %215 : vector<16x100xf32>
    %217 = vector.extract_strided_slice %207 {offsets = [80, 0], sizes = [16, 100], strides = [1, 1]} : vector<160x100xf32> to vector<16x100xf32>
    %218 = arith.addf %216, %217 : vector<16x100xf32>
    %219 = vector.extract_strided_slice %207 {offsets = [96, 0], sizes = [16, 100], strides = [1, 1]} : vector<160x100xf32> to vector<16x100xf32>
    %220 = arith.addf %218, %219 : vector<16x100xf32>
    %221 = vector.extract_strided_slice %207 {offsets = [112, 0], sizes = [16, 100], strides = [1, 1]} : vector<160x100xf32> to vector<16x100xf32>
    %222 = arith.addf %220, %221 : vector<16x100xf32>
    %223 = vector.extract_strided_slice %207 {offsets = [128, 0], sizes = [16, 100], strides = [1, 1]} : vector<160x100xf32> to vector<16x100xf32>
    %224 = arith.addf %222, %223 : vector<16x100xf32>
    %225 = vector.extract_strided_slice %207 {offsets = [144, 0], sizes = [16, 100], strides = [1, 1]} : vector<160x100xf32> to vector<16x100xf32>
    %226 = arith.addf %224, %225 : vector<16x100xf32>
    %227 = vector.broadcast %181 : vector<16x1xf32> to vector<16x100xf32>
    %228 = arith.divf %226, %227 : vector<16x100xf32>
    %229 = arith.truncf %228 : vector<16x100xf32> to vector<16x100xbf16>
    %cst_110 = arith.constant dense<0.000000e+00> : vector<16x100xf32>
    %230 = tpu.matmul %229, %10, %cst_110 {dimension_numbers = #tpu.dot_dimension_numbers<[1], [0], [0], [1], [0, 0, 1, 1], [], []>} : vector<16x100xbf16>, vector<100x100xbf16>, vector<16x100xf32> -> vector<16x100xf32>
    %231 = tpu.concatenate %230, %230, %230, %230, %230, %230, %230, %230, %230, %230 in 0 : vector<16x100xf32>, vector<16x100xf32>, vector<16x100xf32>, vector<16x100xf32>, vector<16x100xf32>, vector<16x100xf32>, vector<16x100xf32>, vector<16x100xf32>, vector<16x100xf32>, vector<16x100xf32> -> vector<160x100xf32>
    %232 = arith.addf %205, %231 : vector<160x100xf32>
    %233 = vector.broadcast %22 : vector<1x100xf32> to vector<160x100xf32>
    %234 = arith.addf %232, %233 : vector<160x100xf32>
    %cst_111 = arith.constant 0.000000e+00 : f32
    %235 = vector.broadcast %cst_111 : f32 to vector<160x100xf32>
    %236 = arith.maximumf %234, %235 : vector<160x100xf32>
    %237 = arith.truncf %236 : vector<160x100xf32> to vector<160x100xbf16>
    %cst_112 = arith.constant dense<0.000000e+00> : vector<160x100xf32>
    %238 = tpu.matmul %237, %11, %cst_112 {dimension_numbers = #tpu.dot_dimension_numbers<[1], [0], [0], [1], [0, 0, 1, 1], [], []>} : vector<160x100xbf16>, vector<100x100xbf16>, vector<160x100xf32> -> vector<160x100xf32>
    %239 = vector.broadcast %23 : vector<1x100xf32> to vector<160x100xf32>
    %240 = arith.addf %238, %239 : vector<160x100xf32>
    %cst_113 = arith.constant 0.000000e+00 : f32
    %241 = vector.broadcast %cst_113 : f32 to vector<160x100xf32>
    %242 = arith.maximumf %240, %241 : vector<160x100xf32>
    %243 = vector.broadcast %34 : vector<1x100xf32> to vector<160x100xf32>
    %244 = arith.mulf %242, %243 : vector<160x100xf32>
    %cst_114 = arith.constant dense<0.000000e+00> : vector<160xf32>
    %245 = vector.multi_reduction <add>, %244, %cst_114 [1] : vector<160x100xf32> to vector<160xf32>
    %246 = vector.shape_cast %245 : vector<160xf32> to vector<160x1xf32>
    %247 = vector.broadcast %24 : vector<1x1xf32> to vector<160x1xf32>
    %248 = arith.addf %246, %247 : vector<160x1xf32>
    %cst_115 = arith.constant 0.000000e+00 : f32
    %249 = vector.broadcast %cst_115 : f32 to vector<160x1xf32>
    %250 = arith.cmpf ogt, %160, %249 : vector<160x1xf32>
    %cst_116 = arith.constant -1.000000e+30 : f32
    %251 = vector.broadcast %cst_116 : f32 to vector<160x1xf32>
    %252 = arith.select %250, %248, %251 : vector<160x1xi1>, vector<160x1xf32>
    %253 = vector.extract_strided_slice %252 {offsets = [0, 0], sizes = [16, 1], strides = [1, 1]} : vector<160x1xf32> to vector<16x1xf32>
    %254 = vector.extract_strided_slice %252 {offsets = [16, 0], sizes = [16, 1], strides = [1, 1]} : vector<160x1xf32> to vector<16x1xf32>
    %255 = arith.maximumf %253, %254 : vector<16x1xf32>
    %256 = vector.extract_strided_slice %252 {offsets = [32, 0], sizes = [16, 1], strides = [1, 1]} : vector<160x1xf32> to vector<16x1xf32>
    %257 = arith.maximumf %255, %256 : vector<16x1xf32>
    %258 = vector.extract_strided_slice %252 {offsets = [48, 0], sizes = [16, 1], strides = [1, 1]} : vector<160x1xf32> to vector<16x1xf32>
    %259 = arith.maximumf %257, %258 : vector<16x1xf32>
    %260 = vector.extract_strided_slice %252 {offsets = [64, 0], sizes = [16, 1], strides = [1, 1]} : vector<160x1xf32> to vector<16x1xf32>
    %261 = arith.maximumf %259, %260 : vector<16x1xf32>
    %262 = vector.extract_strided_slice %252 {offsets = [80, 0], sizes = [16, 1], strides = [1, 1]} : vector<160x1xf32> to vector<16x1xf32>
    %263 = arith.maximumf %261, %262 : vector<16x1xf32>
    %264 = vector.extract_strided_slice %252 {offsets = [96, 0], sizes = [16, 1], strides = [1, 1]} : vector<160x1xf32> to vector<16x1xf32>
    %265 = arith.maximumf %263, %264 : vector<16x1xf32>
    %266 = vector.extract_strided_slice %252 {offsets = [112, 0], sizes = [16, 1], strides = [1, 1]} : vector<160x1xf32> to vector<16x1xf32>
    %267 = arith.maximumf %265, %266 : vector<16x1xf32>
    %268 = vector.extract_strided_slice %252 {offsets = [128, 0], sizes = [16, 1], strides = [1, 1]} : vector<160x1xf32> to vector<16x1xf32>
    %269 = arith.maximumf %267, %268 : vector<16x1xf32>
    %270 = vector.extract_strided_slice %252 {offsets = [144, 0], sizes = [16, 1], strides = [1, 1]} : vector<160x1xf32> to vector<16x1xf32>
    %271 = arith.maximumf %269, %270 : vector<16x1xf32>
    %272 = tpu.concatenate %271, %271, %271, %271, %271, %271, %271, %271, %271, %271 in 0 : vector<16x1xf32>, vector<16x1xf32>, vector<16x1xf32>, vector<16x1xf32>, vector<16x1xf32>, vector<16x1xf32>, vector<16x1xf32>, vector<16x1xf32>, vector<16x1xf32>, vector<16x1xf32> -> vector<160x1xf32>
    %273 = arith.subf %252, %272 : vector<160x1xf32>
    %274 = math.exp %273 : vector<160x1xf32>
    %275 = arith.mulf %274, %160 : vector<160x1xf32>
    %276 = vector.extract_strided_slice %275 {offsets = [0, 0], sizes = [16, 1], strides = [1, 1]} : vector<160x1xf32> to vector<16x1xf32>
    %277 = vector.extract_strided_slice %275 {offsets = [16, 0], sizes = [16, 1], strides = [1, 1]} : vector<160x1xf32> to vector<16x1xf32>
    %278 = arith.addf %276, %277 : vector<16x1xf32>
    %279 = vector.extract_strided_slice %275 {offsets = [32, 0], sizes = [16, 1], strides = [1, 1]} : vector<160x1xf32> to vector<16x1xf32>
    %280 = arith.addf %278, %279 : vector<16x1xf32>
    %281 = vector.extract_strided_slice %275 {offsets = [48, 0], sizes = [16, 1], strides = [1, 1]} : vector<160x1xf32> to vector<16x1xf32>
    %282 = arith.addf %280, %281 : vector<16x1xf32>
    %283 = vector.extract_strided_slice %275 {offsets = [64, 0], sizes = [16, 1], strides = [1, 1]} : vector<160x1xf32> to vector<16x1xf32>
    %284 = arith.addf %282, %283 : vector<16x1xf32>
    %285 = vector.extract_strided_slice %275 {offsets = [80, 0], sizes = [16, 1], strides = [1, 1]} : vector<160x1xf32> to vector<16x1xf32>
    %286 = arith.addf %284, %285 : vector<16x1xf32>
    %287 = vector.extract_strided_slice %275 {offsets = [96, 0], sizes = [16, 1], strides = [1, 1]} : vector<160x1xf32> to vector<16x1xf32>
    %288 = arith.addf %286, %287 : vector<16x1xf32>
    %289 = vector.extract_strided_slice %275 {offsets = [112, 0], sizes = [16, 1], strides = [1, 1]} : vector<160x1xf32> to vector<16x1xf32>
    %290 = arith.addf %288, %289 : vector<16x1xf32>
    %291 = vector.extract_strided_slice %275 {offsets = [128, 0], sizes = [16, 1], strides = [1, 1]} : vector<160x1xf32> to vector<16x1xf32>
    %292 = arith.addf %290, %291 : vector<16x1xf32>
    %293 = vector.extract_strided_slice %275 {offsets = [144, 0], sizes = [16, 1], strides = [1, 1]} : vector<160x1xf32> to vector<16x1xf32>
    %294 = arith.addf %292, %293 : vector<16x1xf32>
    %295 = vector.broadcast %275 : vector<160x1xf32> to vector<160x50xf32>
    %296 = arith.mulf %204, %295 : vector<160x50xf32>
    %297 = vector.extract_strided_slice %296 {offsets = [0, 0], sizes = [16, 50], strides = [1, 1]} : vector<160x50xf32> to vector<16x50xf32>
    %298 = vector.extract_strided_slice %296 {offsets = [16, 0], sizes = [16, 50], strides = [1, 1]} : vector<160x50xf32> to vector<16x50xf32>
    %299 = arith.addf %297, %298 : vector<16x50xf32>
    %300 = vector.extract_strided_slice %296 {offsets = [32, 0], sizes = [16, 50], strides = [1, 1]} : vector<160x50xf32> to vector<16x50xf32>
    %301 = arith.addf %299, %300 : vector<16x50xf32>
    %302 = vector.extract_strided_slice %296 {offsets = [48, 0], sizes = [16, 50], strides = [1, 1]} : vector<160x50xf32> to vector<16x50xf32>
    %303 = arith.addf %301, %302 : vector<16x50xf32>
    %304 = vector.extract_strided_slice %296 {offsets = [64, 0], sizes = [16, 50], strides = [1, 1]} : vector<160x50xf32> to vector<16x50xf32>
    %305 = arith.addf %303, %304 : vector<16x50xf32>
    %306 = vector.extract_strided_slice %296 {offsets = [80, 0], sizes = [16, 50], strides = [1, 1]} : vector<160x50xf32> to vector<16x50xf32>
    %307 = arith.addf %305, %306 : vector<16x50xf32>
    %308 = vector.extract_strided_slice %296 {offsets = [96, 0], sizes = [16, 50], strides = [1, 1]} : vector<160x50xf32> to vector<16x50xf32>
    %309 = arith.addf %307, %308 : vector<16x50xf32>
    %310 = vector.extract_strided_slice %296 {offsets = [112, 0], sizes = [16, 50], strides = [1, 1]} : vector<160x50xf32> to vector<16x50xf32>
    %311 = arith.addf %309, %310 : vector<16x50xf32>
    %312 = vector.extract_strided_slice %296 {offsets = [128, 0], sizes = [16, 50], strides = [1, 1]} : vector<160x50xf32> to vector<16x50xf32>
    %313 = arith.addf %311, %312 : vector<16x50xf32>
    %314 = vector.extract_strided_slice %296 {offsets = [144, 0], sizes = [16, 50], strides = [1, 1]} : vector<160x50xf32> to vector<16x50xf32>
    %315 = arith.addf %313, %314 : vector<16x50xf32>
    %cst_117 = arith.constant 0.000000e+00 : f32
    %316 = vector.broadcast %cst_117 : f32 to vector<16x1xf32>
    %317 = arith.cmpf ogt, %294, %316 : vector<16x1xf32>
    %cst_118 = arith.constant 1.000000e+00 : f32
    %318 = vector.broadcast %cst_118 : f32 to vector<16x1xf32>
    %319 = arith.select %317, %294, %318 : vector<16x1xi1>, vector<16x1xf32>
    %320 = vector.broadcast %319 : vector<16x1xf32> to vector<16x50xf32>
    %321 = arith.divf %315, %320 : vector<16x50xf32>
    %cst_119 = arith.constant 0.000000e+00 : f32
    %322 = vector.broadcast %cst_119 : f32 to vector<16x10xf32>
    %323 = tpu.concatenate %35, %321, %322 in 1 : vector<16x4xf32>, vector<16x50xf32>, vector<16x10xf32> -> vector<16x64xf32>
    %324 = arith.truncf %323 : vector<16x64xf32> to vector<16x64xbf16>
    %cst_120 = arith.constant dense<0.000000e+00> : vector<16x150xf32>
    %325 = tpu.matmul %324, %6, %cst_120 {dimension_numbers = #tpu.dot_dimension_numbers<[1], [0], [0], [1], [0, 0, 1, 1], [], []>} : vector<16x64xbf16>, vector<64x150xbf16>, vector<16x150xf32> -> vector<16x150xf32>
    %326 = vector.broadcast %19 : vector<1x150xf32> to vector<16x150xf32>
    %327 = arith.addf %325, %326 : vector<16x150xf32>
    %cst_121 = arith.constant 0.000000e+00 : f32
    %328 = vector.broadcast %cst_121 : f32 to vector<16x150xf32>
    %329 = arith.maximumf %327, %328 : vector<16x150xf32>
    %330 = arith.truncf %329 : vector<16x150xf32> to vector<16x150xbf16>
    %cst_122 = arith.constant dense<0.000000e+00> : vector<16x100xf32>
    %331 = tpu.matmul %330, %12, %cst_122 {dimension_numbers = #tpu.dot_dimension_numbers<[1], [0], [0], [1], [0, 0, 1, 1], [], []>} : vector<16x150xbf16>, vector<150x100xbf16>, vector<16x100xf32> -> vector<16x100xf32>
    %332 = vector.broadcast %20 : vector<1x100xf32> to vector<16x100xf32>
    %333 = arith.addf %331, %332 : vector<16x100xf32>
    %cst_123 = arith.constant 0.000000e+00 : f32
    %334 = vector.broadcast %cst_123 : f32 to vector<16x100xf32>
    %335 = arith.maximumf %333, %334 : vector<16x100xf32>
    %336 = arith.truncf %335 : vector<16x100xf32> to vector<16x100xbf16>
    %cst_124 = arith.constant dense<0.000000e+00> : vector<16x100xf32>
    %337 = tpu.matmul %336, %13, %cst_124 {dimension_numbers = #tpu.dot_dimension_numbers<[1], [0], [0], [1], [0, 0, 1, 1], [], []>} : vector<16x100xbf16>, vector<100x100xbf16>, vector<16x100xf32> -> vector<16x100xf32>
    %338 = vector.broadcast %21 : vector<1x100xf32> to vector<16x100xf32>
    %339 = arith.addf %337, %338 : vector<16x100xf32>
    %cst_125 = arith.constant 5.000000e-01 : f32
    %340 = vector.broadcast %cst_125 : f32 to vector<16x1xf32>
    %341 = arith.cmpf olt, %179, %340 : vector<16x1xf32>
    %cst_126 = arith.constant 0.000000e+00 : f32
    %342 = vector.broadcast %cst_126 : f32 to vector<16x100xf32>
    %343 = vector.broadcast %31 : vector<1x100xf32> to vector<16x100xf32>
    %344 = arith.addf %343, %342 : vector<16x100xf32>
    %345 = vector.shape_cast %341 : vector<16x1xi1> to vector<16x1xi1>
    %346 = vector.broadcast %345 : vector<16x1xi1> to vector<16x100xi1>
    %347 = arith.select %346, %344, %339 : vector<16x100xi1>, vector<16x100xf32>
    %cst_127 = arith.constant 0.000000e+00 : f32
    %348 = vector.broadcast %cst_127 : f32 to vector<16x24xf32>
    %349 = tpu.concatenate %35, %58, %347, %348 in 1 : vector<16x4xf32>, vector<16x128xf32>, vector<16x100xf32>, vector<16x24xf32> -> vector<16x256xf32>
    %350 = arith.truncf %349 : vector<16x256xf32> to vector<16x256xbf16>
    %cst_128 = arith.constant dense<0.000000e+00> : vector<16x256xf32>
    %351 = tpu.matmul %350, %2, %cst_128 {dimension_numbers = #tpu.dot_dimension_numbers<[1], [0], [0], [1], [0, 0, 1, 1], [], []>} : vector<16x256xbf16>, vector<256x256xbf16>, vector<16x256xf32> -> vector<16x256xf32>
    %352 = vector.broadcast %28 : vector<1x256xf32> to vector<16x256xf32>
    %353 = arith.addf %351, %352 : vector<16x256xf32>
    %cst_129 = arith.constant dense<0.000000e+00> : vector<16xf32>
    %354 = vector.multi_reduction <add>, %353, %cst_129 [1] : vector<16x256xf32> to vector<16xf32>
    %355 = vector.shape_cast %354 : vector<16xf32> to vector<16x1xf32>
    %cst_130 = arith.constant 2.560000e+02 : f32
    %356 = vector.broadcast %cst_130 : f32 to vector<16x1xf32>
    %357 = arith.divf %355, %356 : vector<16x1xf32>
    %358 = vector.broadcast %357 : vector<16x1xf32> to vector<16x256xf32>
    %359 = arith.subf %353, %358 : vector<16x256xf32>
    %360 = arith.mulf %359, %359 : vector<16x256xf32>
    %cst_131 = arith.constant dense<0.000000e+00> : vector<16xf32>
    %361 = vector.multi_reduction <add>, %360, %cst_131 [1] : vector<16x256xf32> to vector<16xf32>
    %362 = vector.shape_cast %361 : vector<16xf32> to vector<16x1xf32>
    %cst_132 = arith.constant 2.560000e+02 : f32
    %363 = vector.broadcast %cst_132 : f32 to vector<16x1xf32>
    %364 = arith.divf %362, %363 : vector<16x1xf32>
    %365 = vector.broadcast %357 : vector<16x1xf32> to vector<16x256xf32>
    %366 = arith.subf %353, %365 : vector<16x256xf32>
    %cst_133 = arith.constant 9.99999974E-6 : f32
    %367 = vector.broadcast %cst_133 : f32 to vector<16x1xf32>
    %368 = arith.addf %364, %367 : vector<16x1xf32>
    %369 = math.rsqrt %368 : vector<16x1xf32>
    %370 = vector.broadcast %369 : vector<16x1xf32> to vector<16x256xf32>
    %371 = arith.mulf %366, %370 : vector<16x256xf32>
    %372 = vector.broadcast %33 : vector<1x256xf32> to vector<16x256xf32>
    %373 = arith.mulf %371, %372 : vector<16x256xf32>
    %374 = vector.broadcast %32 : vector<1x256xf32> to vector<16x256xf32>
    %375 = arith.addf %373, %374 : vector<16x256xf32>
    %cst_134 = arith.constant 0.000000e+00 : f32
    %376 = vector.broadcast %cst_134 : f32 to vector<16x256xf32>
    %377 = arith.cmpf oge, %375, %376 : vector<16x256xf32>
    %cst_135 = arith.constant 0.00999999977 : f32
    %378 = vector.broadcast %cst_135 : f32 to vector<16x256xf32>
    %379 = arith.mulf %378, %375 : vector<16x256xf32>
    %380 = arith.select %377, %375, %379 : vector<16x256xi1>, vector<16x256xf32>
    %381 = arith.truncf %380 : vector<16x256xf32> to vector<16x256xbf16>
    %cst_136 = arith.constant dense<0.000000e+00> : vector<16x256xf32>
    %382 = tpu.matmul %381, %3, %cst_136 {dimension_numbers = #tpu.dot_dimension_numbers<[1], [0], [0], [1], [0, 0, 1, 1], [], []>} : vector<16x256xbf16>, vector<256x256xbf16>, vector<16x256xf32> -> vector<16x256xf32>
    %383 = vector.broadcast %29 : vector<1x256xf32> to vector<16x256xf32>
    %384 = arith.addf %382, %383 : vector<16x256xf32>
    %cst_137 = arith.constant 0.000000e+00 : f32
    %385 = vector.broadcast %cst_137 : f32 to vector<16x256xf32>
    %386 = arith.cmpf oge, %384, %385 : vector<16x256xf32>
    %cst_138 = arith.constant 0.00999999977 : f32
    %387 = vector.broadcast %cst_138 : f32 to vector<16x256xf32>
    %388 = arith.mulf %387, %384 : vector<16x256xf32>
    %389 = arith.select %386, %384, %388 : vector<16x256xi1>, vector<16x256xf32>
    %390 = arith.truncf %389 : vector<16x256xf32> to vector<16x256xbf16>
    %cst_139 = arith.constant dense<0.000000e+00> : vector<16x128xf32>
    %391 = tpu.matmul %390, %8, %cst_139 {dimension_numbers = #tpu.dot_dimension_numbers<[1], [0], [0], [1], [0, 0, 1, 1], [], []>} : vector<16x256xbf16>, vector<256x128xbf16>, vector<16x128xf32> -> vector<16x128xf32>
    %392 = vector.broadcast %30 : vector<1x128xf32> to vector<16x128xf32>
    %393 = arith.addf %391, %392 : vector<16x128xf32>
    %394 = math.tanh %393 : vector<16x128xf32>
    %c0_140 = arith.constant 0 : index
    %c0_141 = arith.constant 0 : index
    %395 = vector.load %arg11[%c0_140, %c0_141] : memref<16x128xf32, #tpu.memory_space<vmem>>, vector<16x128xf32>
    tpu.vector_store %arg11[%c0_140, %c0_141], %394 {strides = array<i32>} : memref<16x128xf32, #tpu.memory_space<vmem>>, vector<16x128xf32>,
    return
  }
  func.func @transform_0(%arg0: i32) -> (i32, i32) {
    %c0_i32 = arith.constant 0 : i32
    %c0_i32_0 = arith.constant 0 : i32
    return %arg0, %c0_i32 : i32, i32
  }
  func.func @transform_1(%arg0: i32) -> (i32, i32) {
    %c0_i32 = arith.constant 0 : i32
    %c0_i32_0 = arith.constant 0 : i32
    return %arg0, %c0_i32 : i32, i32
  }
  func.func @transform_2(%arg0: i32) -> (i32, i32, i32) {
    %c0_i32 = arith.constant 0 : i32
    %c0_i32_0 = arith.constant 0 : i32
    %c0_i32_1 = arith.constant 0 : i32
    return %c0_i32, %arg0, %c0_i32_0 : i32, i32, i32
  }
  func.func @transform_3(%arg0: i32) -> (i32, i32) {
    %c0_i32 = arith.constant 0 : i32
    %c0_i32_0 = arith.constant 0 : i32
    %c0_i32_1 = arith.constant 0 : i32
    return %c0_i32, %c0_i32_0 : i32, i32
  }
  func.func @transform_4(%arg0: i32) -> (i32, i32) {
    %c0_i32 = arith.constant 0 : i32
    %c0_i32_0 = arith.constant 0 : i32
    %c0_i32_1 = arith.constant 0 : i32
    return %c0_i32, %c0_i32_0 : i32, i32
  }
  func.func @transform_5(%arg0: i32) -> (i32, i32) {
    %c0_i32 = arith.constant 0 : i32
    %c0_i32_0 = arith.constant 0 : i32
    %c0_i32_1 = arith.constant 0 : i32
    return %c0_i32, %c0_i32_0 : i32, i32
  }
  func.func @transform_6(%arg0: i32) -> (i32, i32) {
    %c0_i32 = arith.constant 0 : i32
    %c0_i32_0 = arith.constant 0 : i32
    %c0_i32_1 = arith.constant 0 : i32
    return %c0_i32, %c0_i32_0 : i32, i32
  }
  func.func @transform_7(%arg0: i32) -> (i32, i32) {
    %c0_i32 = arith.constant 0 : i32
    %c0_i32_0 = arith.constant 0 : i32
    %c0_i32_1 = arith.constant 0 : i32
    return %c0_i32, %c0_i32_0 : i32, i32
  }
  func.func @transform_8(%arg0: i32) -> (i32, i32) {
    %c0_i32 = arith.constant 0 : i32
    %c0_i32_0 = arith.constant 0 : i32
    %c0_i32_1 = arith.constant 0 : i32
    return %c0_i32, %c0_i32_0 : i32, i32
  }
  func.func @transform_9(%arg0: i32) -> (i32, i32) {
    %c0_i32 = arith.constant 0 : i32
    %c0_i32_0 = arith.constant 0 : i32
    %c0_i32_1 = arith.constant 0 : i32
    return %c0_i32, %c0_i32_0 : i32, i32
  }
  func.func @transform_10(%arg0: i32) -> (i32, i32) {
    %c0_i32 = arith.constant 0 : i32
    %c0_i32_0 = arith.constant 0 : i32
    return %arg0, %c0_i32 : i32, i32
  }
}

</mosaic_0001>

<bundles_post_ra>
// kernel: tpu_custom_call.1
= control target key start
LH: loop header
LB: loop body
LE: loop exit
PB: predicated region body
PF: predicated region fallthrough
CT: control target
= control target key end

     0   :  { %s8621_s0 = inlined_call_operand.vmem [shape: f32[32,4], index: 0, kind: input, shape index: {}]   ;;  %s8622_s1 = inlined_call_operand.hbm [shape: f32[32,40], index: 1, kind: input, shape index: {}]   ;;  %s8623_s2 = inlined_call_operand.vmem [shape: f32[10,32,4], index: 2, kind: input, shape index: {}]   ;;  %s8624_s3 = inlined_call_operand.hbm [shape: f32[24,576], index: 3, kind: input, shape index: {}]   ;;  %s8625_s4 = inlined_call_operand.hbm [shape: bf16[48,576], index: 4, kind: input, shape index: {}]   ;;  %s8626_s5 = inlined_call_operand.vmem [shape: bf16[1200,256], index: 5, kind: input, shape index: {}]   ;;  %s8627_s6 = inlined_call_operand.vmem [shape: bf16[80,150], index: 6, kind: input, shape index: {}]   ;;  %s8628_s7 = inlined_call_operand.hbm [shape: bf16[512,128], index: 7, kind: input, shape index: {}]   ;;  %s8629_s8 = inlined_call_operand.vmem [shape: bf16[656,100], index: 8, kind: input, shape index: {}]   ;;  %s8630_s9 = inlined_call_operand.vmem [shape: bf16[112,50], index: 9, kind: input, shape index: {}]   ;;  %s8631_s10 = inlined_call_operand.hbm [shape: f32[32,128], index: 10, kind: output, shape index: {}]  }
   0x1   :  { %8654 = sst [smem:[#allocation41_spill]] %s8624_s3 }
   0x2   :  { %8655 = sst [smem:[#allocation42_spill]] %s8630_s9 }
   0x3   :  { %8656 = sst [smem:[#allocation43_spill]] %s8631_s10 }
   0x4   :  { %15 = vsyncpa [#allocation3], 0 }
   0x5   :  { %17 = vsyncpa [#allocation3 + $0x1], 0 }
   0x6   :  { %18 = vsyncpa [#allocation7], 0 }
   0x7   :  { %19 = vsyncpa [#allocation10], 0 }
   0x8   :  { %20 = vsyncpa [#allocation4], 0 }
   0x9   :  { %22 = vsyncpa [#allocation4 + $0x1], 0  ;;  %s6675_s13 = smov 0   ;;  %s6677_s14 = smov 0  }
   0xa   :  { %s6679_s15 = smov 0   ;;  %s6681_s16 = smov 0  }
   0xb LB: > { %8657 = sst [smem:[#allocation16_spill]] %s6587_s13  ;;  %s6696_s17 = sadd.s32 4294967295, %s6599_s16   ;;  %s6599_s16 = sphi %s6681_s16, %s8727_s16   ;;  %s6595_s15 = sphi %s6679_s15, %s8731_s15   ;;  %s6591_s14 = sphi %s6677_s14, %s8730_s14   ;;  %s6587_s13 = sphi %s6675_s13, %s8729_s13  }
   0xc   : > { %s5202_s18 = sadd.s32 4294967294, %s6599_s16   ;;  %s6700_s19 = sadd.s32 1, %s6599_s16  }
   0xd   : > { %8658 = sst [smem:[#allocation17_spill]] %s6700_s19  ;;  %s61_s20 = sadd.s32 1, %s6595_s15 }
   0xe   : > { %s58_s21 = ssub.s32 %s6599_s16, %s6700_s19  ;;  %p68_p0 = scmp.ne.s32.totalorder %s6595_s15, %s6591_s14 }
   0xf   : > { %p59_p1 = scmp.eq.s32.totalorder %s58_s21, 0  ;;  %p69_p2 = scmp.eq.s32.totalorder %s6599_s16, 0 }
  0x10   : > { %p74_p3 = scmp.ne.s32.totalorder %s6591_s14, %s6587_s13  ;;  %p8635_p4 = scmp.eq.s32.totalorder %s6696_s17, 0 }
  0x11   : > { %s6712_s22 = scalar_select %p59_p1, %s6595_s15, %s61_s20  }
  0x12   : > { %p6714_p5 = por %p69_p2, %p68_p0  ;;  %p6720_p6 = por %p8635_p4, %p74_p3 }
  0x13   : > { %8659 = sst [smem:[#allocation18_spill]] %s6712_s22  ;;  %p271_p7 = scmp.eq.s32.totalorder %s6696_s17, 1 }
  0x14   : > { %s8660_s23 = scalar_select %p6714_p5, 1, 0 }
  0x15   : > { %s8661_s24 = scalar_select %p6720_p6, 1, 0 }
  0x16   : > { %p277_p8 = scmp.eq.s32.totalorder %s5202_s18, 1  ;;  %p5203_p9 = scmp.ge.s32.totalorder %s6599_s16, 1 }
  0x17   : > { %p284_p10 = scmp.lt.s32.totalorder %s6599_s16, 3  ;;  %p6727_p11 = por %p271_p7, %p68_p0 }
  0x18   : > { %p6731_p12 = por %p277_p8, %p74_p3  ;;  %s6601_s28 = smov [#allocation6]  }
  0x19   : > { %s8662_s25 = scalar_select %p6727_p11, 1, 0 }
  0x1a   : > { %s8664_s26 = scalar_select %p6731_p12, 1, 0 }
  0x1b   : > { %8663 = sst [smem:[#allocation19_spill]] %s8662_s25  ;;  %p6735_p13 = pnand %p5203_p9, %p284_p10 }
  0x1c   : > { %8665 = sst [smem:[#allocation20_spill]] %s8664_s26  ;;  %s296_s29 = sshll.u32 %s6601_s28, 4  ;;  %s297_s29 = int_to_ptr.vmem [resolvable:$true] %s296_s29 }
  0x1d   : > { %s8666_s27 = scalar_select %p6735_p13, 1, 0 }
  0x1e   : > { %p5831_p1 = pneg %p6735_p13  ;;  %s6602_s11 = smov [#allocation8]  }
  0x1f   : > { %s309_s12 = sshll.u32 %s6602_s11, 4  ;;  %s8668_s3 = sld [smem:[#allocation41_spill]]  ;;  %s6747_s12 = int_to_ptr.vmem [resolvable:$true] %s309_s12 }
  0x20   : > { %p6743_p2 = pnand %p5831_p1, %p8635_p4 }
  0x22   : > { %p6757_p3 = pneg %p6743_p2 }
  0x25   : > { %s6413_s21 = scalar_lea.hbm %s8668_s3, 1920 }
  0x26   : > { %p6414_p0 = scmp.ne.s32.totalorder %s8668_s3, %s6413_s21  ;;  %p6420_p9 = scmp.lt.u32.totalorder %s6413_s21, %s8668_s3 }
  0x28   : > { %p6416_p7 = pnand %p6757_p3, %p6414_p0 }
  0x2a   : > { %p6417_p8 = pneg %p6416_p7 }
  0x2c   : > { %p6422_p10 = pnand %p6420_p9, %p6417_p8 }
  0x2e   : > { %6425 = shalt.err (!%p6422_p10)
}
  0x2f   : > { %s6426_s18 = scalar_lea.vmem %s297_s29, 1920  ;;  %p6434_p11 = scmp.lt.s32.totalorder %s297_s29, %s297_s29 }
  0x30   : > { %p6427_p1 = scmp.ne.s32.totalorder %s297_s29, %s6426_s18  ;;  %p6435_p6 = scmp.lt.s32.totalorder %s6426_s18, %s6426_s18 }
  0x32   : > { %p6429_p4 = pnand %p6427_p1, %p6757_p3  ;;  %p6436_p13 = por %p6435_p6, %p6434_p11 }
  0x34   : > { %p6430_p12 = pneg %p6429_p4 }
  0x36   : > { %p6437_p5 = pnand %p6436_p13, %p6430_p12 }
  0x38   : > { %6440 = shalt.err (!%p6437_p5)
}
  0x39   : > { %s6603_s19 = smov 640   ;;  %s6604_s22 = smov 40  }
  0x3a   : > { %5834 = dma.hbm_to_vmem [thread:$0]  (!%p6743_p2), %s8668_s3, 1920, %s297_s29, [#allocation7], %s6603_s19, %s6603_s19, %s6604_s22  }
  0x3b   : > { %s6441_s13 = scalar_lea.hbm %s8625_s4, 1920 }
  0x3c   : > { %p6442_p4 = scmp.ne.s32.totalorder %s8625_s4, %s6441_s13  ;;  %p6448_p11 = scmp.lt.u32.totalorder %s6441_s13, %s8625_s4 }
  0x3e   : > { %p6444_p6 = pnand %p6442_p4, %p6757_p3 }
  0x40   : > { %p6445_p5 = pneg %p6444_p6 }
  0x42   : > { %p6450_p12 = pnand %p6448_p11, %p6445_p5 }
  0x44   : > { %6453 = shalt.err (!%p6450_p12)
}
  0x45   : > { %s6454_s29 = scalar_lea.vmem %s6747_s12, 1920  ;;  %p6462_p8 = scmp.lt.s32.totalorder %s6747_s12, %s6747_s12 }
  0x46   : > { %p6455_p13 = scmp.ne.s32.totalorder %s6747_s12, %s6454_s29  ;;  %p6463_p9 = scmp.lt.s32.totalorder %s6454_s29, %s6454_s29 }
  0x48   : > { %p6457_p0 = pnand %p6455_p13, %p6757_p3  ;;  %p6464_p10 = por %p6463_p9, %p6462_p8 }
  0x4a   : > { %p6458_p7 = pneg %p6457_p0 }
  0x4c   : > { %p6465_p1 = pnand %p6464_p10, %p6458_p7 }
  0x4e   : > { %6468 = shalt.err (!%p6465_p1)
}
  0x4f   : > { %s6605_s10 = smov 320   ;;  %s6606_s9 = smov 20  }
  0x50   : > { %5837 = dma.hbm_to_vmem [thread:$0]  (!%p6743_p2), %s8625_s4, 1920, %s6747_s12, [#allocation7], %s6605_s10, %s6605_s10, %s6606_s9  }
  0x51   : > { %s6607_s19 = smov [#allocation9]   ;;  %s6469_s21 = scalar_lea.hbm %s8628_s7, 4096 }
  0x52   : > { %s328_s22 = sshll.u32 %s6607_s19, 4  ;;  %p6470_p4 = scmp.ne.s32.totalorder %s8628_s7, %s6469_s21  ;;  %s329_s22 = int_to_ptr.vmem [resolvable:$true] %s328_s22 }
  0x53   : > { %p6476_p11 = scmp.lt.u32.totalorder %s6469_s21, %s8628_s7 }
  0x54   : > { %p6472_p6 = pnand %p6470_p4, %p6757_p3 }
  0x56   : > { %p6473_p5 = pneg %p6472_p6 }
  0x58   : > { %p6478_p12 = pnand %p6476_p11, %p6473_p5 }
  0x5a   : > { %6481 = shalt.err (!%p6478_p12)
}
  0x5b   : > { %s6482_s12 = scalar_lea.vmem %s329_s22, 4096  ;;  %p6490_p8 = scmp.lt.s32.totalorder %s329_s22, %s329_s22 }
  0x5c   : > { %p6483_p13 = scmp.ne.s32.totalorder %s329_s22, %s6482_s12  ;;  %p6491_p9 = scmp.lt.s32.totalorder %s6482_s12, %s6482_s12 }
  0x5e   : > { %p6485_p0 = pnand %p6483_p13, %p6757_p3  ;;  %p6492_p10 = por %p6491_p9, %p6490_p8 }
  0x60   : > { %p6486_p7 = pneg %p6485_p0 }
  0x62   : > { %p6493_p1 = pnand %p6492_p10, %p6486_p7 }
  0x64   : > { %6496 = shalt.err (!%p6493_p1)
}
  0x65   : > { %s6608_s10 = smov 64   ;;  %s6609_s9 = smov 4  }
  0x66   : > { %5840 = dma.hbm_to_vmem [thread:$0]  (!%p6743_p2), %s8628_s7, 4096, %s329_s22, [#allocation10], %s6608_s10, %s6608_s10, %s6609_s9  }
  0x67   : > { %p5207_p4 = scmp.ge.s32.totalorder %s6599_s16, 2 }
  0x68   : > { %s6818_s28 = sand.u32 (!%p5207_p4), 1, %s6595_s15   ;;  %s5584_s25 = sshll.u32 (!%p5207_p4), %s6599_s16, 8 }
  0x69   : > { %344 = sbr.rel (%p5207_p4) target bundleno = 145 (0x91), region = 44  ;;  %s5208_s19 = sshll.u32 (!%p5207_p4), %s6818_s28, 4 }
  0x6a   : > { %s6825_s20 = scalar_lea.hbm (!%p5207_p4), %s8622_s1, %s5584_s25  ;;  %s361_s22 = scalar_lea.vmem (!%p5207_p4), [#allocation2], %s5208_s19 }
  0x6b   : > { %s368_s21 = sshll.u32 (!%p5207_p4), %s361_s22, 4  ;;  %s358_s11 = scalar_lea.sflag (!%p5207_p4), [#allocation3], %s6818_s28  ;;  %s6827_s21 = int_to_ptr.vmem [resolvable:$true] %s368_s21 }
  0x6c   : > { %s6497_s18 = scalar_lea.hbm (!%p5207_p4), %s6825_s20, 256  ;;  %p8670_p3 = scmp.ne.s32.totalorder (!%p5207_p4), %s8660_s23, 0 }
  0x6d   : > { %p6498_p2 = scmp.ne.s32.totalorder (!%p5207_p4), %s6825_s20, %s6497_s18  ;;  %s6501_s10 = scalar_lea.hbm (!%p5207_p4), %s8622_s1, 512 }
  0x6e   : > { %p6502_p11 = scmp.lt.u32.totalorder (!%p5207_p4), %s6825_s20, %s8622_s1  ;;  %p6503_p12 = scmp.lt.u32.totalorder (!%p5207_p4), %s6501_s10, %s6497_s18 }
  0x6f   : > { %p6499_p6 = pnand (!%p5207_p4), %p6498_p2, %p8670_p3  ;;  %p6505_p0 = scmp.lt.u32.totalorder (!%p5207_p4), %s6497_s18, %s6825_s20 }
  0x70   : > { %p6504_p13 = por %p6503_p12, %p6502_p11 }
  0x71   : > { %p6500_p5 = pneg %p6499_p6 }
  0x72   : > { %p6506_p7 = por %p6505_p0, %p6504_p13 }
  0x74   : > { %p6507_p8 = pnand %p6506_p7, %p6500_p5 }
  0x76   : > { %6510 = shalt.err (!%p6507_p8)
}
  0x77   : > { %s6511_s3 = scalar_lea.vmem %s6827_s21, 256  ;;  %s6610_s25 = smov [#allocation2]  }
  0x78   : > { %p6512_p9 = scmp.ne.s32.totalorder %s6827_s21, %s6511_s3  ;;  %s6515_s19 = sshll.u32 %s6610_s25, 4  ;;  %s6516_s19 = int_to_ptr.vmem [resolvable:$false] %s6515_s19 }
  0x79   : > { %s6517_s26 = scalar_lea.vmem %s6516_s19, 512  ;;  %p6518_p2 = scmp.lt.s32.totalorder %s6827_s21, %s6516_s19 }
  0x7a   : > { %p6513_p10 = pnand %p6512_p9, %p8670_p3  ;;  %p6519_p6 = scmp.lt.s32.totalorder %s6517_s26, %s6511_s3 }
  0x7c   : > { %p6514_p1 = pneg %p6513_p10  ;;  %p6520_p11 = por %p6519_p6, %p6518_p2 }
  0x7e   : > { %p6521_p12 = pnand %p6520_p11, %p6514_p1 }
  0x80   : > { %6524 = shalt.err (!%p6521_p12)
}
  0x81   : > { %s6611_s30 = smov 128   ;;  %s6612_s22 = smov 8  }
  0x82   : > { %5821 = dma.hbm_to_vmem [thread:$0]  (%p8670_p3), %s6825_s20, 256, %s6827_s21, %s358_s11, %s6611_s30, %s6611_s30, %s6612_s22  }
  0x83   : > { %377 = sbr.rel (!%p8670_p3) target bundleno = 145 (0x91), region = 56  ;;  %s5585_s29 = sshll.u32 (%p8670_p3), %s6599_s16, 4 }
  0x84   : > { %s5813_s18 = smul.u32 (%p8670_p3), 160, %s6818_s28  ;;  %s6860_s9 = scalar_lea.vmem (%p8670_p3), %s8623_s2, %s5585_s29 }
  0x85   : > { %v450_v0 = vld [vmem:[%s6860_s9] sm:$0xff] (%p8670_p3)  ;;  %v452_v1 = vld [vmem:[%s6860_s9 + $0x8] sm:$0xff] (%p8670_p3) }
  0x86   : > { %v454_v2 = vld [vmem:[%s6860_s9 + $0x20] sm:$0xff] (%p8670_p3)  ;;  %s6865_s23 = scalar_lea.vmem (%p8670_p3), [#allocation5], %s5813_s18  ;;  %v456_v3 = vld [vmem:[%s6860_s9 + $0x28] sm:$0xff] (%p8670_p3) }
  0x87   : > { %451 = vst [vmem:[%s6865_s23] sm:$0xff] (%p8670_p3), %v450_v0  ;;  %453 = vst [vmem:[%s6865_s23 + $0x8] sm:$0xff] (%p8670_p3), %v452_v1  ;;  %v458_v4 = vld [vmem:[%s6860_s9 + $0x40] sm:$0xff] (%p8670_p3)  ;;  %v460_v5 = vld [vmem:[%s6860_s9 + $0x48] sm:$0xff] (%p8670_p3) }
  0x88   : > { %455 = vst [vmem:[%s6865_s23 + $0x10] sm:$0xff] (%p8670_p3), %v454_v2  ;;  %457 = vst [vmem:[%s6865_s23 + $0x18] sm:$0xff] (%p8670_p3), %v456_v3  ;;  %v462_v6 = vld [vmem:[%s6860_s9 + $0x60] sm:$0xff] (%p8670_p3)  ;;  %v464_v7 = vld [vmem:[%s6860_s9 + $0x68] sm:$0xff] (%p8670_p3) }
  0x89   : > { %459 = vst [vmem:[%s6865_s23 + $0x20] sm:$0xff] (%p8670_p3), %v458_v4  ;;  %461 = vst [vmem:[%s6865_s23 + $0x28] sm:$0xff] (%p8670_p3), %v460_v5  ;;  %v466_v8 = vld [vmem:[%s6860_s9 + $0x80] sm:$0xff] (%p8670_p3)  ;;  %v468_v9 = vld [vmem:[%s6860_s9 + $0x88] sm:$0xff] (%p8670_p3) }
  0x8a   : > { %463 = vst [vmem:[%s6865_s23 + $0x30] sm:$0xff] %v462_v6  ;;  %465 = vst [vmem:[%s6865_s23 + $0x38] sm:$0xff] %v464_v7  ;;  %v470_v10 = vld [vmem:[%s6860_s9 + $0xa0] sm:$0xff]  ;;  %v472_v11 = vld [vmem:[%s6860_s9 + $0xa8] sm:$0xff] }
  0x8b   : > { %467 = vst [vmem:[%s6865_s23 + $0x40] sm:$0xff] %v466_v8  ;;  %469 = vst [vmem:[%s6865_s23 + $0x48] sm:$0xff] %v468_v9  ;;  %v474_v12 = vld [vmem:[%s6860_s9 + $0xc0] sm:$0xff]  ;;  %v476_v13 = vld [vmem:[%s6860_s9 + $0xc8] sm:$0xff] }
  0x8c   : > { %471 = vst [vmem:[%s6865_s23 + $0x50] sm:$0xff] %v470_v10  ;;  %473 = vst [vmem:[%s6865_s23 + $0x58] sm:$0xff] %v472_v11  ;;  %v478_v14 = vld [vmem:[%s6860_s9 + $0xe0] sm:$0xff]  ;;  %v480_v15 = vld [vmem:[%s6860_s9 + $0xe8] sm:$0xff] }
  0x8d   : > { %475 = vst [vmem:[%s6865_s23 + $0x60] sm:$0xff] %v474_v12  ;;  %477 = vst [vmem:[%s6865_s23 + $0x68] sm:$0xff] %v476_v13  ;;  %v482_v16 = vld [vmem:[%s6860_s9 + $0x100] sm:$0xff]  ;;  %v484_v17 = vld [vmem:[%s6860_s9 + $0x108] sm:$0xff] }
  0x8e   : > { %479 = vst [vmem:[%s6865_s23 + $0x70] sm:$0xff] %v478_v14  ;;  %481 = vst [vmem:[%s6865_s23 + $0x78] sm:$0xff] %v480_v15  ;;  %v486_v18 = vld [vmem:[%s6860_s9 + $0x120] sm:$0xff]  ;;  %v488_v19 = vld [vmem:[%s6860_s9 + $0x128] sm:$0xff] }
  0x8f   : > { %483 = vst [vmem:[%s6865_s23 + $0x80] sm:$0xff] %v482_v16  ;;  %485 = vst [vmem:[%s6865_s23 + $0x88] sm:$0xff] %v484_v17 }
  0x90   : > { %487 = vst [vmem:[%s6865_s23 + $0x90] sm:$0xff] %v486_v18  ;;  %489 = vst [vmem:[%s6865_s23 + $0x98] sm:$0xff] %v488_v19 }
  0x91 PF: > { %p8671_p3 = scmp.ne.s32.totalorder %s8666_s27, 0 }
  0x93   : > { %498 = sbr.rel (%p8671_p3) target bundleno = 4189 (0x105d), region = 94 }
  0x9a   : > { %s6907_s28 = sand.u32 1, %s6591_s14   ;;  %p8672_p5 = scmp.ne.s32.totalorder %s8661_s24, 0 }
  0x9b   : > { %s5214_s20 = sshll.u32 %s6907_s28, 4  ;;  %s501_s21 = scalar_lea.sflag [#allocation3], %s6907_s28 }
  0x9c   : > { %s504_s11 = scalar_lea.vmem [#allocation2], %s5214_s20 }
  0x9d   : > { %6570 = dma.done.wait (%p8672_p5), %s501_s21, 256  }
  0x9e   : > { %6572 = vsyncadd (%p8672_p5), %s501_s21, 4294967040  ;;  %s5814_s27 = smul.u32 160, %s6907_s28  ;;  %p8673_p13 = scmp.eq.s32.totalorder %s6696_s17, 0 }
  0xa0   : > { %s6918_s13 = scalar_lea.vmem [#allocation5], %s5814_s27 }
  0xa1   : > { %6574 = dma.done.wait (%p8673_p13), [#allocation7], 3840   ;;  %p8674_p0 = pmov %p8673_p13 }
  0xa3   : > { %6576 = vsyncadd (%p8674_p0), [#allocation7], 4294963456  ;;  %p8675_p7 = pmov %p8674_p0 }
  0xa4   : > { %p8676_p8 = pmov %p8674_p0 }
  0xa5   : > { %6578 = dma.done.wait (%p8675_p7), [#allocation10], 4096  }
  0xa6   : > { %6580 = vsyncadd (%p8676_p8), [#allocation10], 4294963200  ;;  %v8647_v20 = vmov 0   ;;  %v6018_v21 = vld [vmem:[#allocation8 + $0x4] ss:$20 sps:$4 sm:$0xff]   ;;  %v591_v24 = vld [vmem:[#allocation8 + $0x50] sm:$0xff] }
  0xa7   : > { %1083 = vmatprep.mubr.bf16.mxu0 %v8647_v20  ;;  %5951 = vset.pattern.permute.xlu1 %v8647_v20  ;;  %v6020_v22 = vld [vmem:[#allocation8] ss:$20 sps:$4 sm:$0xff]   ;;  %v6023_v25 = vld [vmem:[#allocation8 + $0x28] ss:$20 sps:$4 sm:$0xff]   ;;  %v5232_v26 = vcombine.high %v591_v24, %v591_v24  ;;  %v5231_v27 = vcombine.low %v591_v24, %v591_v24  ;;  %vm1035_vm0 = vcmask 1043456   ;;  %vm1031_vm1 = vcmask 326656  }
  0xa8   : > { %5957 = vset.pattern.permute.xlu0 %v8647_v20  ;;  %1051 = vmatprep.subr.bf16.mxu0 %v6018_v21  ;;  %v6021_v23 = vld [vmem:[#allocation8 + $0x2c] ss:$20 sps:$4 sm:$0xff]   ;;  %v6026_v32 = vld [vmem:[#allocation8 + $0x8] ss:$20 sps:$4 sm:$0xff]   ;;  %v6039_v35 = vld [vmem:[%s8626_s5] ss:$8 sps:$4 sm:$0xff]  }
  0xa9   : > { %1052 = vmatpush1.bf16.msra.mxu0 %v6020_v22  ;;  %v937_v28 = vld [vmem:[%s504_s11] sm:$0xff]  ;;  %v938_v29 = vld [vmem:[%s504_s11 + $0x8] sm:$0xff]  ;;  %v1037_v31 = vsel %vm1035_vm0, %v5231_v27, 0  ;;  %v8645_v50 = vmov 0.0   ;;  %vm6615_vm2 = vmmov 0   ;;  %s6616_s25 = smov 4  }
  0xaa   : > { %1053 = vmatprep.subr.bf16.mxu0 %v6021_v23  ;;  %v6028_v30 = vld [vmem:[#allocation8 + $0xc] ss:$20 sps:$4 sm:$0xff]   ;;  %v939_v33 = vpack.c.bf16 %v938_v29, %v937_v28  ;;  %v6037_v34 = vld [vmem:[%s8626_s5 + $0x4] ss:$8 sps:$4 sm:$0xff]   ;;  %v6029_v41 = vld [vmem:[#allocation8 + $0x30] ss:$20 sps:$4 sm:$0xff]  }
  0xab   : > { %v6031_v36 = vld [vmem:[#allocation8 + $0x34] ss:$20 sps:$4 sm:$0xff]   ;;  %v6040_v37 = vld [vmem:[%s8626_s5 + $0x14] ss:$8 sps:$4 sm:$0xff]   ;;  %v592_v38 = vld [vmem:[#allocation8 + $0x58] sm:$0xff]  ;;  %1588 = vmatprep.subr.bf16.mxu1 %v6037_v34  ;;  %vm1584_vm13 = vcmask 523264  }
  0xac   : > { %1589 = vmatpush1.bf16.msra.mxu1 %v6039_v35  ;;  %v6042_v39 = vld [vmem:[%s8626_s5 + $0x10] ss:$8 sps:$4 sm:$0xff]   ;;  %v6043_v40 = vld [vmem:[%s8626_s5 + $0x24] ss:$8 sps:$4 sm:$0xff]   ;;  %v5234_v42 = vcombine.high %v592_v38, %v592_v38  ;;  %v5233_v43 = vcombine.low %v592_v38, %v592_v38  ;;  %v6045_v44 = vld [vmem:[%s8626_s5 + $0x20] ss:$8 sps:$4 sm:$0xff]  }
  0xad   : > { %1054 = vmatpush1.bf16.msra.mxu0 %v6023_v25  ;;  %1590 = vmatprep.subr.bf16.mxu1 %v6040_v37  ;;  %v6046_v45 = vld [vmem:[%s8626_s5 + $0x34] ss:$8 sps:$4 sm:$0xff]   ;;  %v6048_v47 = vld [vmem:[%s8626_s5 + $0x30] ss:$8 sps:$4 sm:$0xff]   ;;  %v6049_v48 = vld [vmem:[%s8626_s5 + $0x44] ss:$8 sps:$4 sm:$0xff]  }
  0xae   : > { %5236 = vmatprep.subr.msk.bf16.mxu0 %vm1035_vm0, %v5232_v26  ;;  %v1043_v46 = vsel %vm1035_vm0, %v5233_v43, 0  ;;  %v6034_v49 = vld [vmem:[#allocation8 + $0x10] ss:$20 sps:$4 sm:$0xff]   ;;  %v6035_v53 = vld [vmem:[#allocation8 + $0x38] ss:$20 sps:$4 sm:$0xff]   ;;  %vm1878_vm14 = vcmask 31744  }
  0xaf   : > { %v6051_v51 = vld [vmem:[%s8626_s5 + $0x40] ss:$8 sps:$4 sm:$0xff]   ;;  %v6052_v52 = vld [vmem:[%s8626_s5 + $0x54] ss:$8 sps:$4 sm:$0xff]   ;;  %v6036_v54 = vld [vmem:[#allocation8 + $0x60] ss:$0 sps:$4 sm:$0xff]  }
  0xb0   : > { %1591 = vmatpush1.bf16.msra.mxu1 %v6042_v39  ;;  %v6054_v55 = vld [vmem:[%s8626_s5 + $0x50] ss:$8 sps:$4 sm:$0xff]   ;;  %v6055_v56 = vld [vmem:[%s8626_s5 + $0x64] ss:$8 sps:$4 sm:$0xff]   ;;  %v6057_v57 = vld [vmem:[%s8626_s5 + $0x60] ss:$8 sps:$4 sm:$0xff]  }
  0xb1   : > { %1056 = vmatpush1.bf16.msra.mxu0 %v1037_v31  ;;  %1592 = vmatprep.subr.bf16.mxu1 %v6043_v40  ;;  %v1049_v58 = vsel %vm1035_vm0, %v6036_v54, 0  ;;  %v6058_v59 = vld [vmem:[%s8626_s5 + $0x74] ss:$8 sps:$4 sm:$0xff]   ;;  %v6060_v60 = vld [vmem:[%s8626_s5 + $0x70] ss:$8 sps:$4 sm:$0xff]   ;;  %v7048_v15 = vld [vmem:[%s6918_s13 + $0x8] sm:$0xff] }
  0xb2   : > { %1094 = vmatprep.subr.bf16.mxu0 %v6028_v30  ;;  %v6061_v61 = vld [vmem:[%s8626_s5 + $0x84] ss:$8 sps:$4 sm:$0xff]   ;;  %v6063_v62 = vld [vmem:[%s8626_s5 + $0x80] ss:$8 sps:$4 sm:$0xff]   ;;  %v6064_v63 = vld [vmem:[%s8626_s5 + $0x94] ss:$8 sps:$4 sm:$0xff]  }
  0xb3   : > { %v6066_v0 = vld [vmem:[%s8626_s5 + $0x90] ss:$8 sps:$4 sm:$0xff]   ;;  %v6067_v1 = vld [vmem:[%s8626_s5 + $0xa4] ss:$8 sps:$4 sm:$0xff]   ;;  %v6069_v2 = vld [vmem:[%s8626_s5 + $0xa0] ss:$8 sps:$4 sm:$0xff]  }
  0xb4   : > { %5237 = vmatmul.mubr.msk.bf16.vlgmr.msra.gmra.mrb[0].mxu0 %vm1031_vm1, %v939_v33  ;;  %1593 = vmatpush1.bf16.msra.mxu1 %v6045_v44  ;;  %v6070_v3 = vld [vmem:[%s8626_s5 + $0xb4] ss:$8 sps:$4 sm:$0xff]   ;;  %v6072_v4 = vld [vmem:[%s8626_s5 + $0xb0] ss:$8 sps:$4 sm:$0xff]   ;;  %v6073_v5 = vld [vmem:[%s8626_s5 + $0xc4] ss:$8 sps:$4 sm:$0xff]  }
  0xb5   : > { %1095 = vmatpush1.bf16.msra.mxu0 %v6026_v32  ;;  %1126 = vmatprep.mubr.bf16.mxu0 %v8647_v20  ;;  %v6075_v6 = vld [vmem:[%s8626_s5 + $0xc0] ss:$8 sps:$4 sm:$0xff]   ;;  %v6076_v7 = vld [vmem:[%s8626_s5 + $0xd4] ss:$8 sps:$4 sm:$0xff]   ;;  %v6078_v8 = vld [vmem:[%s8626_s5 + $0xd0] ss:$8 sps:$4 sm:$0xff]  }
  0xb6   : > { %1096 = vmatprep.subr.bf16.mxu0 %v6031_v36  ;;  %1594 = vmatprep.subr.bf16.mxu1 %v6046_v45  ;;  %v6079_v9 = vld [vmem:[%s8626_s5 + $0xe4] ss:$8 sps:$4 sm:$0xff]   ;;  %v6081_v10 = vld [vmem:[%s8626_s5 + $0xe0] ss:$8 sps:$4 sm:$0xff]   ;;  %v6082_v11 = vld [vmem:[%s8626_s5 + $0xf4] ss:$8 sps:$4 sm:$0xff]  }
  0xb7   : > { %v6084_v12 = vld [vmem:[%s8626_s5 + $0xf0] ss:$8 sps:$4 sm:$0xff]   ;;  %v6087_v13 = vld [vmem:[%s8626_s5 + $0x104] ss:$8 sps:$4 sm:$0xff]   ;;  %s8680_s10 = sld [smem:[#allocation42_spill]]  ;;  %s568_s26 = scalar_lea.vmem [#allocation11], %s5214_s20 }
  0xb8   : > { %1595 = vmatpush1.bf16.msra.mxu1 %v6048_v47  ;;  %v7045_v14 = vld [vmem:[%s6918_s13] sm:$0xff]  ;;  %v7051_v16 = vld [vmem:[%s6918_s13 + $0x10] sm:$0xff]  ;;  %v7056_v18 = vld [vmem:[%s6918_s13 + $0x18] sm:$0xff]  ;;  %s5070_s30 = sshll.u32 %s568_s26, 4  ;;  %s8722_s12 = sld [smem:[#allocation43_spill]]  ;;  %s8577_s30 = int_to_ptr.vmem [resolvable:$true] %s5070_s30 }
  0xb9   : > { %1097 = vmatpush1.bf16.msra.mxu0 %v6029_v41  ;;  %1596 = vmatprep.subr.bf16.mxu1 %v6049_v48  ;;  %v5901_v17 = vpack.i.bf16 %v7048_v15, %v7045_v14  ;;  %v7059_v19 = vld [vmem:[%s6918_s13 + $0x20] sm:$0xff]  ;;  %v7062_v21 = vld [vmem:[%s6918_s13 + $0x28] sm:$0xff]  ;;  %v7067_v23 = vld [vmem:[%s6918_s13 + $0x30] sm:$0xff]  ;;  %v5906_v25 = vpack.i.bf16 %v7056_v18, %v7051_v16  ;;  %s5057_s23 = scalar_lea.sflag [#allocation4], %s6907_s28  ;;  %s6525_s21 = scalar_lea.vmem %s8577_s30, 256 }
  0xba   : > { %5238 = vmatprep.subr.msk.bf16.mxu0 %vm1035_vm0, %v5234_v42  ;;  %v5911_v22 = vpack.i.bf16 %v7062_v21, %v7059_v19  ;;  %v7070_v24 = vld [vmem:[%s6918_s13 + $0x38] sm:$0xff]  ;;  %v7079_v27 = vld [vmem:[%s6918_s13 + $0x40] sm:$0xff]  ;;  %v7082_v28 = vld [vmem:[%s6918_s13 + $0x48] sm:$0xff]  ;;  %p6526_p10 = scmp.ne.s32.totalorder %s8577_s30, %s6525_s21 }
  0xbb   : > { %5902 = vrot.lane.b32.xlu0 %v5901_v17, %s6616_s25  ;;  %v5916_v26 = vpack.i.bf16 %v7070_v24, %v7067_v23  ;;  %v7085_v29 = vld [vmem:[%s6918_s13 + $0x50] sm:$0xff]  ;;  %v7088_v30 = vld [vmem:[%s6918_s13 + $0x58] sm:$0xff]  ;;  %v5921_v32 = vpack.i.bf16 %v7082_v28, %v7079_v27  ;;  %v7097_v36 = vld [vmem:[%s6918_s13 + $0x60] sm:$0xff] }
  0xbc   : > { %1597 = vmatpush1.bf16.msra.mxu1 %v6051_v51  ;;  %5912 = vrot.lane.b32.xlu1 %v5911_v22, %s6616_s25  ;;  %v6145_v31 = vld [vmem:[#allocation9 + $0x40] sm:$0xff]   ;;  %v6147_v34 = vld [vmem:[#allocation9 + $0x48] sm:$0xff]   ;;  %v5926_v35 = vpack.i.bf16 %v7088_v30, %v7085_v29  ;;  %v7100_v37 = vld [vmem:[%s6918_s13 + $0x68] sm:$0xff] }
  0xbd   : > { %1099 = vmatpush1.bf16.msra.mxu0 %v1043_v46  ;;  %1598 = vmatprep.subr.bf16.mxu1 %v6052_v52  ;;  %v7103_v38 = vld [vmem:[%s6918_s13 + $0x70] sm:$0xff]  ;;  %v7106_v39 = vld [vmem:[%s6918_s13 + $0x78] sm:$0xff]  ;;  %v6149_v41 = vld [vmem:[#allocation9 + $0x50] sm:$0xff]   ;;  %v5931_v42 = vpack.i.bf16 %v7100_v37, %v7097_v36 }
  0xbe   : > { %5685 = vmatprep.subr.bf16.mxu0 %v8645_v50  ;;  %v6148_v40 = vld [vmem:[#allocation9 + $0x8] sm:$0xff]   ;;  %v5936_v43 = vpack.i.bf16 %v7106_v39, %v7103_v38  ;;  %v7115_v44 = vld [vmem:[%s6918_s13 + $0x80] sm:$0xff]  ;;  %v7118_v45 = vld [vmem:[%s6918_s13 + $0x88] sm:$0xff] }
  0xbf   : > { %5907 = vrot.lane.b32.xlu0 %v5906_v25, %s6616_s25  ;;  %v7121_v46 = vld [vmem:[%s6918_s13 + $0x90] sm:$0xff]  ;;  %v7124_v47 = vld [vmem:[%s6918_s13 + $0x98] sm:$0xff]  ;;  %v6150_v48 = vld [vmem:[#allocation9 + $0x10] sm:$0xff]   ;;  %v5941_v51 = vpack.i.bf16 %v7118_v45, %v7115_v44  ;;  %s5219_s13 = sshll.u32 %s6696_s17, 1 }
  0xc0   : > { %5239 = vmatmul.mubr.msk.bf16.vlgmr.msra.gmra.mrb[4].mxu0 %vm1031_vm1, %v939_v33  ;;  %1599 = vmatpush1.bf16.msra.mxu1 %v6054_v55  ;;  %v5946_v52 = vpack.i.bf16 %v7124_v47, %v7121_v46  ;;  %v6153_v54 = vld [vmem:[#allocation9 + $0x60] sm:$0xff]   ;;  %v941_v55 = vlaneseq  ;;  %p570_p9 = scmp.lt.s32.totalorder %s5219_s13, 3 }
  0xc1   : > { %5686 = vmatpush3.bf16.msra.mxu0 %v6034_v49  ;;  %5691 = vmatprep.mubr.msk.bf16.mxu0 %vm6615_vm2, %v8645_v50  ;;  %v6151_v49 = vld [vmem:[#allocation9 + $0x58] sm:$0xff]  }
  0xc2   : > { %5687 = vmatprep.subr.bf16.mxu0 %v8645_v50  ;;  %1600 = vmatprep.subr.bf16.mxu1 %v6055_v56  ;;  %v6154_v56 = vld [vmem:[#allocation9 + $0x20] sm:$0xff]   ;;  %s8733_s13 = smov (!%p570_p9, %s5219_s13), 3 }
  0xc3   : > { %5917 = vrot.lane.b32.xlu1 %v5916_v26, %s6616_s25  ;;  %5922 = vrot.lane.b32.xlu0 %v5921_v32, %s6616_s25  ;;  %s5220_s19 = sshll.u32 %s8733_s13, 3 }
  0xc4   : > { %1601 = vmatpush1.bf16.msra.mxu1 %v6057_v57  ;;  %v6155_v57 = vld [vmem:[#allocation9 + $0x68] sm:$0xff]   ;;  %s7332_s22 = scalar_lea.vmem %s8621_s0, %s5220_s19  ;;  %s5586_s19 = sshll.u32 %s6696_s17, 8 }
  0xc5   : > { %5688 = vmatpush3.bf16.msra.mxu0 %v6035_v53  ;;  %1602 = vmatprep.subr.bf16.mxu1 %v6058_v59  ;;  %v6152_v53 = vld [vmem:[#allocation9 + $0x18] sm:$0xff]   ;;  %s8575_s9 = scalar_lea.hbm %s8722_s12, %s5586_s19  ;;  %s6617_s17 = smov [#allocation11]  }
  0xc6   : > { %5689 = vmatprep.subr.bf16.mxu0 %v8645_v50  ;;  %v918_v59 = vld [vmem:[#allocation6 + $0x2a] ss:$8 sm:$0xf]  ;;  %s6529_s20 = sshll.u32 %s6617_s17, 4  ;;  %s6530_s20 = int_to_ptr.vmem [resolvable:$false] %s6529_s20 }
  0xc7   : > { %5927 = vrot.lane.b32.xlu1 %v5926_v35, %s6616_s25  ;;  %5932 = vrot.lane.b32.xlu0 %v5931_v42, %s6616_s25  ;;  %v6085_v35 = vld [vmem:[%s8626_s5 + $0x100] ss:$8 sps:$4 sm:$0xff]   ;;  %s6531_s11 = scalar_lea.vmem %s6530_s20, 512  ;;  %p6532_p11 = scmp.lt.s32.totalorder %s8577_s30, %s6530_s20 }
  0xc8   : > { %1603 = vmatpush1.bf16.msra.mxu1 %v6060_v60  ;;  %v919_v60 = vld [vmem:[#allocation6 + $0x2a] ss:$8 sm:$0x10]  ;;  %p6533_p12 = scmp.lt.s32.totalorder %s6531_s11, %s6525_s21 }
  0xc9   : > { %5690 = vmatpush3.bf16.msra.mxu0 %v1049_v58  ;;  %1604 = vmatprep.subr.bf16.mxu1 %v6061_v61  ;;  %v7134_v58 = vshrl.u32 %v941_v55, 7  ;;  %v7136_v61 = vor.u32 %v919_v60, %v918_v59 }
  0xca   : > { %5591 = vmatprep.subr.bf16.mxu0 %v6145_v31  ;;  %p6534_p3 = por %p6533_p12, %p6532_p11 }
  0xcb   : > { %5937 = vrot.lane.b32.xlu1 %v5936_v43, %s6616_s25  ;;  %5942 = vrot.lane.b32.xlu0 %v5941_v51, %s6616_s25  ;;  %v955_v22 = vsub.s32 3, %v7134_v58 }
  0xcc   : > { %5692 = vmatmul.mubr.msk.bf16.vlgmr.msra.gmra.mrb[8].mxu0 %vm1031_vm1, %v939_v33  ;;  %1605 = vmatpush1.bf16.msra.mxu1 %v6063_v62  ;;  %v6146_v33 = vld [vmem:[#allocation9] sm:$0xff]   ;;  %v7139_v62 = vsub.s32 0, %v7134_v58 }
  0xcd   : > { %1606 = vmatprep.subr.bf16.mxu1 %v6064_v63  ;;  %5592 = vmatpush3.bf16.msra.mxu0 %v6146_v33  ;;  %v7142_v63 = vsub.s32 1, %v7134_v58  ;;  %v956_v42 = vrot.slane %v7136_v61, %v955_v22 }
  0xce   : > { %5593 = vmatprep.subr.bf16.mxu0 %v6147_v34  ;;  %8677 = vst [vmem:[#allocation21_spill] sm:$0xff] %v7139_v62 }
  0xcf   : > { %5947 = vrot.lane.b32.xlu1 %v5946_v52, %s6616_s25  ;;  %8678 = vst [vmem:[#allocation22_spill] sm:$0xff] %v7142_v63  ;;  %v6093_v52 = vld [vmem:[%s8626_s5 + $0x124] ss:$8 sps:$4 sm:$0xff]  }
  0xd0   : > { %1607 = vmatpush1.bf16.msra.mxu1 %v6066_v0  ;;  %v944_v0 = vrot.slane %v7136_v61, %v7139_v62 }
  0xd1   : > { %1608 = vmatprep.subr.bf16.mxu1 %v6067_v1  ;;  %5594 = vmatpush3.bf16.msra.mxu0 %v6148_v40  ;;  %v948_v1 = vrot.slane %v7136_v61, %v7142_v63 }
  0xd2   : > { %5595 = vmatprep.subr.bf16.mxu0 %v6149_v41  ;;  %v6090_v41 = vld [vmem:[%s8626_s5 + $0x114] ss:$8 sps:$4 sm:$0xff]  }
  0xd4   : > { %1609 = vmatpush1.bf16.msra.mxu1 %v6069_v2 }
  0xd5   : > { %1610 = vmatprep.subr.bf16.mxu1 %v6070_v3  ;;  %5596 = vmatpush3.bf16.msra.mxu0 %v6150_v48  ;;  %v6088_v48 = vld [vmem:[%s8626_s5 + $0x110] ss:$8 sps:$4 sm:$0xff]  }
  0xd6   : > { %5597 = vmatprep.subr.bf16.mxu0 %v6151_v49 }
  0xd8   : > { %1611 = vmatpush1.bf16.msra.mxu1 %v6072_v4 }
  0xd9   : > { %1612 = vmatprep.subr.bf16.mxu1 %v6073_v5  ;;  %5598 = vmatpush3.bf16.msra.mxu0 %v6152_v53 }
  0xda   : > { %5599 = vmatprep.subr.bf16.mxu0 %v6153_v54 }
  0xdc   : > { %1613 = vmatpush1.bf16.msra.mxu1 %v6075_v6 }
  0xdd   : > { %1614 = vmatprep.subr.bf16.mxu1 %v6076_v7  ;;  %5600 = vmatpush3.bf16.msra.mxu0 %v6154_v56 }
  0xde   : > { %5601 = vmatprep.subr.bf16.mxu0 %v6155_v57 }
  0xe0   : > { %1615 = vmatpush1.bf16.msra.mxu1 %v6078_v8 }
  0xe1   : > { %1616 = vmatprep.subr.bf16.mxu1 %v6079_v9 }
  0xe4   : > { %1617 = vmatpush1.bf16.msra.mxu1 %v6081_v10 }
  0xe5   : > { %1618 = vmatprep.subr.bf16.mxu1 %v6082_v11 }
  0xe8   : > { %1619 = vmatpush1.bf16.msra.mxu1 %v6084_v12 }
  0xe9   : > { %1631 = vmatprep.subr.bf16.mxu1 %v6087_v13  ;;  %v951_v13 = vsub.s32 2, %v7134_v58 }
  0xeb   : > { %v952_v40 = vrot.slane %v7136_v61, %v951_v13 }
 0x187   : > { %v1085_v2 = vpop.f32.mrb[0].mxu0 }
 0x188   : > { %v1086_v3 = vadd.f32 %v1085_v2, %v944_v0  ;;  %v1087_v4 = vpop.f32.mrb[1].mxu0 }
 0x189   : > { %v1088_v5 = vadd.f32 %v1087_v4, %v948_v1  ;;  %v1089_v6 = vpop.f32.mrb[2].mxu0  ;;  %v6096_v4 = vld [vmem:[%s8626_s5 + $0x134] ss:$8 sps:$4 sm:$0xff]  }
 0x18a   : > { %v1188_v7 = vmul.f32 0.01, %v1086_v3  ;;  %v1090_v8 = vadd.f32 %v1089_v6, %v944_v0  ;;  %v1091_v9 = vpop.f32.mrb[3].mxu0  ;;  %vm1178_vm3 = vcmp.ge.f32.partialorder %v1086_v3, 0.0  ;;  %v6091_v0 = vld [vmem:[%s8626_s5 + $0x120] ss:$8 sps:$4 sm:$0xff]  }
 0x18b   : > { %v1189_v10 = vmul.f32 0.01, %v1088_v5  ;;  %v1092_v11 = vadd.f32 %v1091_v9, %v948_v1  ;;  %vm1179_vm5 = vcmp.ge.f32.partialorder %v1088_v5, 0.0 }
 0x18c   : > { %vm1183_vm4 = vcmp.ge.f32.partialorder %v1090_v8, 0.0  ;;  %v1193_v12 = vmul.f32 0.01, %v1090_v8  ;;  %v1198_v25 = vsel %vm1178_vm3, %v1086_v3, %v1188_v7  ;;  %v959_v3 = vsub.s32 4, %v7134_v58 }
 0x18d   : > { %v1194_v17 = vmul.f32 0.01, %v1092_v11  ;;  %vm1184_vm6 = vcmp.ge.f32.partialorder %v1092_v11, 0.0  ;;  %v1199_v31 = vsel %vm1179_vm5, %v1088_v5, %v1189_v10  ;;  %v6094_v10 = vld [vmem:[%s8626_s5 + $0x130] ss:$8 sps:$4 sm:$0xff]   ;;  %vm2502_vm5 = vcmask 1042432  }
 0x18e   : > { %v1203_v26 = vsel %vm1183_vm4, %v1090_v8, %v1193_v12  ;;  %v6099_v12 = vld [vmem:[%s8626_s5 + $0x144] ss:$8 sps:$4 sm:$0xff]  }
 0x18f   : > { %v1204_v32 = vsel %vm1184_vm6, %v1092_v11, %v1194_v17  ;;  %v1208_v33 = vpack.c.bf16 %v1203_v26, %v1198_v25  ;;  %v960_v11 = vrot.slane %v7136_v61, %v959_v3  ;;  %v6097_v17 = vld [vmem:[%s8626_s5 + $0x140] ss:$8 sps:$4 sm:$0xff]   ;;  %v6102_v26 = vld [vmem:[%s8626_s5 + $0x154] ss:$8 sps:$4 sm:$0xff]  }
 0x190   : > { %v1209_v34 = vpack.c.bf16 %v1204_v32, %v1199_v31  ;;  %v6126_v3 = vld [vmem:[%s8626_s5 + $0x1d4] ss:$8 sps:$4 sm:$0xff]  }
 0x192   : > { %1620 = vmatprep.mubr.bf16.mxu1 %v1209_v34  ;;  %v6100_v34 = vld [vmem:[%s8626_s5 + $0x150] ss:$8 sps:$4 sm:$0xff]  }
 0x193   : > { %1621 = vmatmul.mubr.bf16.vlgmr.msra.gmra.mrb[0].mxu1 %v1208_v33  ;;  %v1128_v43 = vpop.f32.mrb[4].mxu0 }
 0x194   : > { %1632 = vmatpush1.bf16.msra.mxu1 %v6085_v35  ;;  %v1129_v49 = vadd.f32 %v1128_v43, %v952_v40  ;;  %v1130_v51 = vpop.f32.mrb[5].mxu0 }
 0x195   : > { %1633 = vmatprep.subr.bf16.mxu1 %v6090_v41  ;;  %v1131_v53 = vadd.f32 %v1130_v51, %v956_v42  ;;  %v1132_v54 = vpop.f32.mrb[6].mxu0  ;;  %v6105_v41 = vld [vmem:[%s8626_s5 + $0x164] ss:$8 sps:$4 sm:$0xff]   ;;  %v6106_v51 = vld [vmem:[%s8626_s5 + $0x170] ss:$8 sps:$4 sm:$0xff]  }
 0x196   : > { %vm1180_vm7 = vcmp.ge.f32.partialorder %v1129_v49, 0.0  ;;  %v1190_v55 = vmul.f32 0.01, %v1129_v49  ;;  %v1133_v56 = vadd.f32 %v1132_v54, %v952_v40  ;;  %v1134_v57 = vpop.f32.mrb[7].mxu0  ;;  %v6114_v54 = vld [vmem:[%s8626_s5 + $0x194] ss:$8 sps:$4 sm:$0xff]  }
 0x197   : > { %vm1181_vm8 = vcmp.ge.f32.partialorder %v1131_v53, 0.0  ;;  %v1191_v59 = vmul.f32 0.01, %v1131_v53  ;;  %v1135_v60 = vadd.f32 %v1134_v57, %v956_v42  ;;  %v6115_v57 = vld [vmem:[%s8626_s5 + $0x1a0] ss:$8 sps:$4 sm:$0xff]  }
 0x198   : > { %1634 = vmatpush1.bf16.msra.mxu1 %v6088_v48  ;;  %v7167_v1 = vsel %vm1180_vm7, %v1129_v49, %v1190_v55  ;;  %vm1185_vm9 = vcmp.ge.f32.partialorder %v1133_v56, 0.0  ;;  %v1195_v2 = vmul.f32 0.01, %v1133_v56  ;;  %v6103_v48 = vld [vmem:[%s8626_s5 + $0x160] ss:$8 sps:$4 sm:$0xff]  }
 0x199   : > { %1635 = vmatprep.subr.bf16.mxu1 %v6093_v52  ;;  %vm1186_vm10 = vcmp.ge.f32.partialorder %v1135_v60, 0.0  ;;  %v1196_v5 = vmul.f32 0.01, %v1135_v60  ;;  %v1201_v6 = vsel %vm1181_vm8, %v1131_v53, %v1191_v59  ;;  %v6108_v49 = vld [vmem:[%s8626_s5 + $0x174] ss:$8 sps:$4 sm:$0xff]  }
 0x19a   : > { %v7173_v7 = vsel %vm1185_vm9, %v1133_v56, %v1195_v2  ;;  %v6111_v52 = vld [vmem:[%s8626_s5 + $0x184] ss:$8 sps:$4 sm:$0xff]   ;;  %v6109_v53 = vld [vmem:[%s8626_s5 + $0x180] ss:$8 sps:$4 sm:$0xff]   ;;  %v6112_v55 = vld [vmem:[%s8626_s5 + $0x190] ss:$8 sps:$4 sm:$0xff]  }
 0x19b   : > { %v1210_v8 = vpack.c.bf16 %v7173_v7, %v7167_v1  ;;  %v1206_v9 = vsel %vm1186_vm10, %v1135_v60, %v1196_v5  ;;  %v6117_v56 = vld [vmem:[%s8626_s5 + $0x1a4] ss:$8 sps:$4 sm:$0xff]   ;;  %v6120_v59 = vld [vmem:[%s8626_s5 + $0x1b4] ss:$8 sps:$4 sm:$0xff]   ;;  %v6118_v60 = vld [vmem:[%s8626_s5 + $0x1b0] ss:$8 sps:$4 sm:$0xff]  }
 0x19c   : > { %1636 = vmatpush1.bf16.msra.mxu1 %v6091_v0  ;;  %v1211_v58 = vpack.c.bf16 %v1206_v9, %v1201_v6  ;;  %v6123_v0 = vld [vmem:[%s8626_s5 + $0x1c4] ss:$8 sps:$4 sm:$0xff]   ;;  %v6121_v2 = vld [vmem:[%s8626_s5 + $0x1c0] ss:$8 sps:$4 sm:$0xff]   ;;  %v6132_v9 = vld [vmem:[%s8626_s5 + $0x1f4] ss:$8 sps:$4 sm:$0xff]  }
 0x19d   : > { %1637 = vmatprep.subr.bf16.mxu1 %v6096_v4  ;;  %v6124_v4 = vld [vmem:[%s8626_s5 + $0x1d0] ss:$8 sps:$4 sm:$0xff]   ;;  %v6129_v5 = vld [vmem:[%s8626_s5 + $0x1e4] ss:$8 sps:$4 sm:$0xff]   ;;  %v6127_v6 = vld [vmem:[%s8626_s5 + $0x1e0] ss:$8 sps:$4 sm:$0xff]  }
 0x19e   : > { %1663 = vmatprep.mubr.bf16.mxu1 %v1211_v58  ;;  %v6135_v58 = vld [vmem:[%s8626_s5 + $0x204] ss:$8 sps:$4 sm:$0xff]   ;;  %v6144_v1 = vld [vmem:[%s8626_s5 + $0x234] ss:$8 sps:$4 sm:$0xff]   ;;  %v6142_v7 = vld [vmem:[%s8626_s5 + $0x230] ss:$8 sps:$4 sm:$0xff]  }
 0x19f   : > { %v1171_v13 = vpop.f32.mrb[8].mxu0 }
 0x1a0   : > { %1638 = vmatpush1.bf16.msra.mxu1 %v6094_v10  ;;  %v1172_v22 = vadd.f32 %v1171_v13, %v960_v11  ;;  %v5693_v25 = vpop.f32.mrb[9].mxu0  ;;  %v6130_v10 = vld [vmem:[%s8626_s5 + $0x1f0] ss:$8 sps:$4 sm:$0xff]  }
 0x1a1   : > { %1639 = vmatprep.subr.bf16.mxu1 %v6099_v12  ;;  %v1174_v61 = vpop.f32.mrb[10].mxu0  ;;  %v6138_v12 = vld [vmem:[%s8626_s5 + $0x214] ss:$8 sps:$4 sm:$0xff]   ;;  %v6136_v13 = vld [vmem:[%s8626_s5 + $0x210] ss:$8 sps:$4 sm:$0xff]  }
 0x1a2   : > { %vm1182_vm11 = vcmp.ge.f32.partialorder %v1172_v22, 0.0  ;;  %v1192_v31 = vmul.f32 0.01, %v1172_v22  ;;  %v1175_v32 = vadd.f32 %v1174_v61, %v960_v11  ;;  %v5694_v33 = vpop.f32.mrb[11].mxu0  ;;  %v6133_v11 = vld [vmem:[%s8626_s5 + $0x200] ss:$8 sps:$4 sm:$0xff]  }
 0x1a3   : > { %v6157_v25 = vld [vmem:[#allocation9 + $0x70] sm:$0xff]   ;;  %v6159_v61 = vld [vmem:[#allocation9 + $0x78] sm:$0xff]  }
 0x1a4   : > { %1640 = vmatpush1.bf16.msra.mxu1 %v6097_v17  ;;  %v7193_v35 = vsel %vm1182_vm11, %v1172_v22, %v1192_v31  ;;  %vm1187_vm12 = vcmp.ge.f32.partialorder %v1175_v32, 0.0  ;;  %v1197_v40 = vmul.f32 0.01, %v1175_v32  ;;  %v6141_v17 = vld [vmem:[%s8626_s5 + $0x224] ss:$8 sps:$4 sm:$0xff]  }
 0x1a5   : > { %1641 = vmatprep.subr.bf16.mxu1 %v6102_v26  ;;  %v6139_v22 = vld [vmem:[%s8626_s5 + $0x220] ss:$8 sps:$4 sm:$0xff]   ;;  %v6158_v26 = vld [vmem:[#allocation9 + $0x30] sm:$0xff]  }
 0x1a6   : > { %v1207_v42 = vsel %vm1187_vm12, %v1175_v32, %v1197_v40  ;;  %v6160_v31 = vld [vmem:[#allocation9 + $0x38] sm:$0xff]   ;;  %v1908_v40 = vand.u32 2147483647, %v7051_v16  ;;  %v1989_v16 = vand.u32 2147483647, %v7079_v27 }
 0x1a7   : > { %v1212_v43 = vpack.c.bf16 %v1207_v42, %v7193_v35  ;;  %v7289_v32 = vld [vmem:[%s8627_s6] sm:$0xff]  ;;  %v1881_v35 = vand.u32 2147483647, %v7045_v14  ;;  %v1935_v42 = vand.u32 2147483647, %v7059_v19 }
 0x1a8   : > { %1642 = vmatpush1.bf16.msra.mxu1 %v6100_v34  ;;  %v5369_v33 = vcombine.high %v7289_v32, %v7289_v32  ;;  %v1882_v34 = vand.u32 2147483647, %v7048_v15  ;;  %v1909_v15 = vand.u32 2147483647, %v7056_v18  ;;  %v1963_v18 = vand.u32 2147483647, %v7070_v24 }
 0x1a9   : > { %1643 = vmatprep.subr.bf16.mxu1 %v6105_v41  ;;  %v2043_v27 = vand.u32 2147483647, %v7097_v36  ;;  %v2017_v24 = vand.u32 2147483647, %v7088_v30 }
 0x1aa   : > { %v1886_v41 = vsel %vm1878_vm14, %v1882_v34, -inf  ;;  %v1913_v19 = vsel %vm1878_vm14, %v1909_v15, -inf  ;;  %v6163_v15 = vld [vmem:[%s8629_s8] sm:$0xff]  }
 0x1ab   : > { %1887 = vmax.xlane.f32.xlu1 %v1886_v41  ;;  %v2021_v36 = vsel %vm1878_vm14, %v2017_v24, -inf  ;;  %v6167_v24 = vld [vmem:[%s8629_s8 + $0x20] sm:$0xff]  }
 0x1ac   : > { %1644 = vmatpush1.bf16.msra.mxu1 %v6103_v48  ;;  %v1937_v48 = vsel %vm1878_vm14, %v1935_v42, -inf }
 0x1ad   : > { %1645 = vmatprep.subr.bf16.mxu1 %v6108_v49  ;;  %v1962_v49 = vand.u32 2147483647, %v7067_v23  ;;  %v2016_v23 = vand.u32 2147483647, %v7085_v29  ;;  %v2070_v29 = vand.u32 2147483647, %v7103_v38 }
 0x1af   : > { %1938 = vmax.xlane.f32.xlu1 %v1937_v48  ;;  %v1964_v14 = vsel %vm1878_vm14, %v1962_v49, -inf }
 0x1b0   : > { %1646 = vmatpush1.bf16.msra.mxu1 %v6106_v51  ;;  %v1910_v51 = vsel %vm1878_vm14, %v1908_v40, -inf  ;;  %v7336_v40 = vld [vmem:[%s7332_s22] sm:$0xff] }
 0x1b1   : > { %1647 = vmatprep.subr.bf16.mxu1 %v6111_v52  ;;  %v1936_v52 = vand.u32 2147483647, %v7062_v21  ;;  %v1990_v21 = vand.u32 2147483647, %v7082_v28 }
 0x1b3   : > { %1965 = vmax.xlane.f32.xlu1 %v1964_v14 }
 0x1b4   : > { %1648 = vmatpush1.bf16.msra.mxu1 %v6109_v53  ;;  %v1991_v53 = vsel %vm1878_vm14, %v1989_v16, -inf }
 0x1b5   : > { %1649 = vmatprep.subr.bf16.mxu1 %v6114_v54  ;;  %v1940_v54 = vsel %vm1878_vm14, %v1936_v52, -inf  ;;  %v5913_v52 = vpop.permute.xlu1 %5912 }
 0x1b7   : > { %1992 = vmax.xlane.f32.xlu1 %v1991_v53 }
 0x1b8   : > { %1650 = vmatpush1.bf16.msra.mxu1 %v6112_v55  ;;  %v2018_v55 = vsel %vm1878_vm14, %v2016_v23, -inf  ;;  %v5915_v23 = vunpack.i.h.bf16 %v5913_v52 }
 0x1b9   : > { %1651 = vmatprep.subr.bf16.mxu1 %v6117_v56  ;;  %v1967_v56 = vsel %vm1878_vm14, %v1963_v18, -inf  ;;  %v6165_v18 = vld [vmem:[%s8629_s8 + $0x10] sm:$0xff]  }
 0x1bb   : > { %2019 = vmax.xlane.f32.xlu1 %v2018_v55 }
 0x1bc   : > { %1652 = vmatpush1.bf16.msra.mxu1 %v6115_v57  ;;  %v2045_v57 = vsel %vm1878_vm14, %v2043_v27, -inf }
 0x1bd   : > { %1653 = vmatprep.subr.bf16.mxu1 %v6120_v59  ;;  %v1994_v59 = vsel %vm1878_vm14, %v1990_v21, -inf  ;;  %v5918_v21 = vpop.permute.xlu1 %5917 }
 0x1bf   : > { %2046 = vmax.xlane.f32.xlu1 %v2045_v57 }
 0x1c0   : > { %1654 = vmatpush1.bf16.msra.mxu1 %v6118_v60  ;;  %v2072_v60 = vsel %vm1878_vm14, %v2070_v29, -inf  ;;  %v5920_v29 = vunpack.i.h.bf16 %v5918_v21 }
 0x1c1   : > { %1655 = vmatprep.subr.bf16.mxu1 %v6123_v0  ;;  %v2044_v0 = vand.u32 2147483647, %v7100_v37 }
 0x1c3   : > { %2073 = vmax.xlane.f32.xlu1 %v2072_v60  ;;  %v2048_v28 = vsel %vm1878_vm14, %v2044_v0, -inf  ;;  %v6168_v0 = vld [vmem:[%s8629_s8 + $0x28] sm:$0xff]  }
 0x1c4   : > { %1656 = vmatpush1.bf16.msra.mxu1 %v6121_v2  ;;  %v922_v2 = vld [vmem:[#allocation6 + $0x2b] ss:$8 sm:$0x3] }
 0x1c5   : > { %1657 = vmatprep.subr.bf16.mxu1 %v6126_v3  ;;  %v1217_v38 = vrot.slane %v922_v2, %v7139_v62  ;;  %v1221_v30 = vrot.slane %v922_v2, %v7142_v63 }
 0x1c8   : > { %1658 = vmatpush1.bf16.msra.mxu1 %v6124_v4 }
 0x1c9   : > { %1659 = vmatprep.subr.bf16.mxu1 %v6129_v5 }
 0x1cc   : > { %1660 = vmatpush1.bf16.msra.mxu1 %v6127_v6 }
 0x1cd   : > { %1661 = vmatprep.subr.bf16.mxu1 %v6132_v9 }
 0x1d0   : > { %1662 = vmatpush1.bf16.msra.mxu1 %v6130_v10 }
 0x1d1   : > { %1674 = vmatprep.subr.bf16.mxu1 %v6135_v58 }
 0x1d3   : > { %1664 = vmatmul.mubr.bf16.vlgmr.msra.gmra.mrb[0].mxu1 %v1210_v8  ;;  %v6156_v8 = vld [vmem:[#allocation9 + $0x28] sm:$0xff]  }
 0x1d4   : > { %1675 = vmatpush1.bf16.msra.mxu1 %v6133_v11  ;;  %1706 = vmatprep.mubr.bf16.mxu1 %v8647_v20 }
 0x1d5   : > { %1676 = vmatprep.subr.bf16.mxu1 %v6138_v12  ;;  %5602 = vmatpush3.bf16.msra.mxu0 %v6156_v8 }
 0x1d6   : > { %5603 = vmatprep.subr.bf16.mxu0 %v6157_v25 }
 0x1d8   : > { %1677 = vmatpush1.bf16.msra.mxu1 %v6136_v13 }
 0x1d9   : > { %1678 = vmatprep.subr.bf16.mxu1 %v6141_v17  ;;  %5604 = vmatpush3.bf16.msra.mxu0 %v6158_v26 }
 0x1da   : > { %5605 = vmatprep.subr.bf16.mxu0 %v6159_v61 }
 0x1dc   : > { %1679 = vmatpush1.bf16.msra.mxu1 %v6139_v22  ;;  %v5368_v22 = vcombine.low %v7289_v32, %v7289_v32  ;;  %v7339_v32 = vld [vmem:[%s7332_s22 + $0x8] sm:$0xff] }
 0x1dd   : > { %1680 = vmatprep.subr.bf16.mxu1 %v6144_v1  ;;  %5606 = vmatpush3.bf16.msra.mxu0 %v6160_v31  ;;  %v5903_v1 = vpop.permute.xlu0 %5902  ;;  %v1934_v27 = vsel %vm1878_vm14, %v7339_v32, %v5915_v23  ;;  %v2097_v23 = vand.u32 2147483647, %v7115_v44  ;;  %v2125_v44 = vand.u32 2147483647, %v7124_v47  ;;  %v6173_v47 = vld [vmem:[%s8626_s5 + $0x440] ss:$8 sps:$4 sm:$0xff]  }
 0x1de   : > { %5370 = vmatprep.subr.msk.bf16.mxu0 %vm1035_vm0, %v5369_v33  ;;  %v5905_v33 = vunpack.i.h.bf16 %v5903_v1  ;;  %v5904_v34 = vunpack.i.l.bf16 %v5903_v1 }
 0x1e0   : > { %1681 = vmatpush1.bf16.msra.mxu1 %v6142_v7  ;;  %v1879_v41 = vsel %vm1878_vm14, %v7336_v40, %v5904_v34  ;;  %v1880_v42 = vsel %vm1878_vm14, %v7339_v32, %v5905_v33 }
 0x1e1   : > { %v2158_v48 = vpack.c.bf16 %v1880_v42, %v1879_v41 }
 0x1e3   : > { %5313 = vmatmul.mubr.msk.bf16.vlgmr.msra.gmra.mrb[0].mxu1 %vm1584_vm13, %v1212_v43  ;;  %v1883_v43 = vsel %vm1878_vm14, %v1881_v35, -inf  ;;  %v2216_v35 = vsel %vm1035_vm0, %v5368_v22, 0  ;;  %vm2184_vm0 = vcmask 64512  }
 0x1e4   : > { %2784 = vmatprep.mubr.bf16.mxu1 %v8647_v20  ;;  %1884 = vmax.xlane.f32.xlu0 %v1883_v43  ;;  %v5908_v43 = vpop.permute.xlu0 %5907 }
 0x1e5   : > { %v5910_v49 = vunpack.i.h.bf16 %v5908_v43 }
 0x1e7   : > { %v1907_v16 = vsel %vm1878_vm14, %v7339_v32, %v5910_v49 }
 0x1e8   : > { %1911 = vmax.xlane.f32.xlu0 %v1910_v51  ;;  %v5909_v51 = vunpack.i.l.bf16 %v5908_v43 }
 0x1ea   : > { %v1906_v14 = vsel %vm1878_vm14, %v7336_v40, %v5909_v51 }
 0x1eb   : > { %v2159_v53 = vpack.c.bf16 %v1907_v16, %v1906_v14 }
 0x1ec   : > { %1914 = vmax.xlane.f32.xlu0 %v1913_v19  ;;  %v6164_v19 = vld [vmem:[%s8629_s8 + $0x8] sm:$0xff]  }
 0x1f0   : > { %1941 = vmax.xlane.f32.xlu0 %v1940_v54  ;;  %v5914_v54 = vunpack.i.l.bf16 %v5913_v52 }
 0x1f2   : > { %v1933_v55 = vsel %vm1878_vm14, %v7336_v40, %v5914_v54  ;;  %v2071_v54 = vand.u32 2147483647, %v7106_v39  ;;  %v6171_v39 = vld [vmem:[%s8629_s8 + $0x40] sm:$0xff]  }
 0x1f3   : > { %v2160_v57 = vpack.c.bf16 %v1934_v27, %v1933_v55  ;;  %v2098_v27 = vand.u32 2147483647, %v7118_v45  ;;  %v6172_v45 = vld [vmem:[%s8629_s8 + $0x48] ss:$0 sps:$4 sm:$0x77]  }
 0x1f4   : > { %1968 = vmax.xlane.f32.xlu0 %v1967_v56  ;;  %v6166_v56 = vld [vmem:[%s8629_s8 + $0x18] sm:$0xff]   ;;  %v2075_v55 = vsel %vm1878_vm14, %v2071_v54, -inf }
 0x1f8   : > { %1995 = vmax.xlane.f32.xlu0 %v1994_v59  ;;  %v5919_v59 = vunpack.i.l.bf16 %v5918_v21  ;;  %v2129_v21 = vsel %vm1878_vm14, %v2125_v44, -inf }
 0x1fa   : > { %v1960_v60 = vsel %vm1878_vm14, %v7336_v40, %v5919_v59  ;;  %v6175_v59 = vld [vmem:[%s8626_s5 + $0x444] ss:$8 sps:$4 sm:$0xff]  }
 0x1fb   : > { %2752 = vmatprep.subr.bf16.mxu1 %v6175_v59 }
 0x1fc   : > { %2022 = vmax.xlane.f32.xlu0 %v2021_v36  ;;  %v1961_v36 = vsel %vm1878_vm14, %v7339_v32, %v5920_v29  ;;  %2753 = vmatpush1.bf16.msra.mxu1 %v6173_v47 }
 0x1fd   : > { %v2161_v2 = vpack.c.bf16 %v1961_v36, %v1960_v60 }
 0x200   : > { %2049 = vmax.xlane.f32.xlu0 %v2048_v28  ;;  %v5923_v28 = vpop.permute.xlu0 %5922 }
 0x204   : > { %2076 = vmax.xlane.f32.xlu0 %v2075_v55 }
 0x2b6   : > { %v1708_v3 = vpop.f32.mrb[0].mxu1 }
 0x2b7   : > { %v5799_v4 = vadd.f32 %v1708_v3, %v1217_v38  ;;  %v1710_v5 = vpop.f32.mrb[1].mxu1  ;;  %v6169_v3 = vld [vmem:[%s8629_s8 + $0x30] sm:$0xff]  }
 0x2b8   : > { %v5800_v6 = vadd.f32 %v1710_v5, %v1221_v30  ;;  %v1712_v9 = vpop.f32.mrb[2].mxu1 }
 0x2b9   : > { %v1721_v10 = vmul.f32 0.01, %v5799_v4  ;;  %v5801_v37 = vadd.f32 %v1712_v9, %v1217_v38  ;;  %v1714_v58 = vpop.f32.mrb[3].mxu1  ;;  %vm1717_vm15 = vcmp.ge.f32.partialorder %v5799_v4, 0.0  ;;  %v5925_v38 = vunpack.i.h.bf16 %v5923_v28  ;;  %v5928_v9 = vpop.permute.xlu1 %5927 }
 0x2ba   : > { %v1722_v11 = vmul.f32 0.01, %v5800_v6  ;;  %v5802_v12 = vadd.f32 %v1714_v58, %v1221_v30  ;;  %vm1718_vm1 = vcmp.ge.f32.partialorder %v5800_v6, 0.0  ;;  %v5924_v30 = vunpack.i.l.bf16 %v5923_v28  ;;  %v6176_v28 = vld [vmem:[%s8626_s5 + $0x450] ss:$8 sps:$4 sm:$0xff]  }
 0x2bb   : > { %vm1719_vm3 = vcmp.ge.f32.partialorder %v5801_v37, 0.0  ;;  %v1723_v13 = vmul.f32 0.01, %v5801_v37  ;;  %v1725_v7 = vsel %vm1717_vm15, %v5799_v4, %v1721_v10  ;;  %v1988_v5 = vsel %vm1878_vm14, %v7339_v32, %v5925_v38 }
 0x2bc   : > { %vm1720_vm4 = vcmp.ge.f32.partialorder %v5802_v12, 0.0  ;;  %v1724_v17 = vmul.f32 0.01, %v5802_v12  ;;  %v1726_v26 = vsel %vm1718_vm1, %v5800_v6, %v1722_v11  ;;  %v1987_v4 = vsel %vm1878_vm14, %v7336_v40, %v5924_v30  ;;  %v6170_v6 = vld [vmem:[%s8629_s8 + $0x38] sm:$0xff]   ;;  %v6181_v30 = vld [vmem:[%s8626_s5 + $0x464] ss:$8 sps:$4 sm:$0xff]  }
 0x2bd   : > { %v1727_v8 = vsel %vm1719_vm3, %v5801_v37, %v1723_v13  ;;  %v2162_v10 = vpack.c.bf16 %v1988_v5, %v1987_v4  ;;  %v5930_v37 = vunpack.i.h.bf16 %v5928_v9  ;;  %v5929_v58 = vunpack.i.l.bf16 %v5928_v9  ;;  %v5933_v13 = vpop.permute.xlu0 %5932  ;;  %v6184_v9 = vld [vmem:[%s8626_s5 + $0x474] ss:$8 sps:$4 sm:$0xff]  }
 0x2be   : > { %v1729_v25 = vpack.c.bf16 %v1727_v8, %v1725_v7  ;;  %v1728_v61 = vsel %vm1720_vm4, %v5802_v12, %v1724_v17  ;;  %v5935_v22 = vunpack.i.h.bf16 %v5933_v13  ;;  %v5934_v1 = vunpack.i.l.bf16 %v5933_v13  ;;  %v6187_v13 = vld [vmem:[%s8626_s5 + $0x484] ss:$8 sps:$4 sm:$0xff]  }
 0x2bf   : > { %v1730_v31 = vpack.c.bf16 %v1728_v61, %v1726_v26  ;;  %v2014_v11 = vsel %vm1878_vm14, %v7336_v40, %v5929_v58  ;;  %v2015_v12 = vsel %vm1878_vm14, %v7339_v32, %v5930_v37  ;;  %v6182_v58 = vld [vmem:[%s8626_s5 + $0x470] ss:$8 sps:$4 sm:$0xff]  }
 0x2c0   : > { %v2163_v17 = vpack.c.bf16 %v2015_v12, %v2014_v11  ;;  %v2041_v7 = vsel %vm1878_vm14, %v7336_v40, %v5934_v1  ;;  %v2042_v8 = vsel %vm1878_vm14, %v7339_v32, %v5935_v22 }
 0x2c1   : > { %1859 = vmatprep.mubr.bf16.mxu0 %v1730_v31  ;;  %v2164_v26 = vpack.c.bf16 %v2042_v8, %v2041_v7  ;;  %v6185_v7 = vld [vmem:[%s8626_s5 + $0x480] ss:$8 sps:$4 sm:$0xff]  }
 0x2c2   : > { %1860 = vmatmul.mubr.bf16.vlgmr.msra.gmra.mrb[12].mxu0 %v1729_v25  ;;  %v5938_v25 = vpop.permute.xlu1 %5937 }
 0x2c3   : > { %2222 = vmatpush1.bf16.msra.mxu0 %v2216_v35  ;;  %2253 = vmatprep.mubr.bf16.mxu0 %v8647_v20  ;;  %v5940_v61 = vunpack.i.h.bf16 %v5938_v25  ;;  %v5939_v31 = vunpack.i.l.bf16 %v5938_v25  ;;  %v5943_v35 = vpop.permute.xlu0 %5942 }
 0x2c4   : > { %2506 = vmatprep.subr.bf16.mxu0 %v8647_v20  ;;  %v5945_v42 = vunpack.i.h.bf16 %v5943_v35  ;;  %v5944_v43 = vunpack.i.l.bf16 %v5943_v35 }
 0x2c5   : > { %v2068_v33 = vsel %vm1878_vm14, %v7336_v40, %v5939_v31  ;;  %v2069_v34 = vsel %vm1878_vm14, %v7339_v32, %v5940_v61 }
 0x2c6   : > { %v2165_v41 = vpack.c.bf16 %v2069_v34, %v2068_v33  ;;  %v2096_v49 = vsel %vm1878_vm14, %v7339_v32, %v5945_v42  ;;  %v5948_v51 = vpop.permute.xlu1 %5947 }
 0x2c7   : > { %v5950_v14 = vunpack.i.h.bf16 %v5948_v51  ;;  %v5949_v16 = vunpack.i.l.bf16 %v5948_v51  ;;  %v1885_v29 = vpop.xlane.xlu0 %1884 }
 0x2c8   : > { %vm1889_vm7 = vcmp.gt.f32.partialorder %v1885_v29, 0.0 }
 0x2c9   : > { %v2123_v52 = vsel %vm1878_vm14, %v7339_v32, %v5950_v14  ;;  %v7465_v36 = vsel %vm1889_vm7, 1.0, %v8645_v50 }
 0x2ca   : > { %5371 = vmatmul.mubr.msk.bf16.vlgmr.msra.gmra.mrb[16].mxu0 %vm2184_vm0, %v2158_v48  ;;  %v2095_v48 = vsel %vm1878_vm14, %v7336_v40, %v5944_v43 }
 0x2cb   : > { %2263 = vmatprep.mubr.bf16.mxu0 %v8647_v20  ;;  %2507 = vmatpush1.bf16.msra.mxu0 %v6163_v15  ;;  %v2166_v15 = vpack.c.bf16 %v2096_v49, %v2095_v48 }
 0x2cc   : > { %2508 = vmatprep.subr.bf16.mxu0 %v8647_v20 }
 0x2cf   : > { %2509 = vmatpush1.bf16.msra.mxu0 %v6164_v19  ;;  %v2122_v19 = vsel %vm1878_vm14, %v7336_v40, %v5949_v16  ;;  %v2124_v40 = vand.u32 2147483647, %v7121_v46  ;;  %v2504_v46 = vsel %vm2502_vm5, %v6172_v45, 0 }
 0x2d0   : > { %2510 = vmatprep.subr.bf16.mxu0 %v8647_v20 }
 0x2d1   : > { %v2126_v32 = vsel %vm1878_vm14, %v2124_v40, -inf }
 0x2d2   : > { %5372 = vmatmul.mubr.msk.bf16.gmra.mrb[20].mxu0 %vm2184_vm0, %v2159_v53  ;;  %v2167_v53 = vpack.c.bf16 %v2123_v52, %v2122_v19 }
 0x2d3   : > { %2273 = vmatprep.mubr.bf16.mxu0 %v8647_v20  ;;  %2511 = vmatpush1.bf16.msra.mxu0 %v6165_v18  ;;  %v2099_v18 = vsel %vm1878_vm14, %v2097_v23, -inf }
 0x2d4   : > { %2512 = vmatprep.subr.bf16.mxu0 %v8647_v20  ;;  %2100 = vmax.xlane.f32.xlu1 %v2099_v18 }
 0x2d7   : > { %2513 = vmatpush1.bf16.msra.mxu0 %v6166_v56  ;;  %v2102_v56 = vsel %vm1878_vm14, %v2098_v27, -inf }
 0x2d8   : > { %2514 = vmatprep.subr.bf16.mxu0 %v8647_v20  ;;  %2127 = vmax.xlane.f32.xlu1 %v2126_v32  ;;  %v906_v32 = vld [vmem:[#allocation6] ss:$8 sm:$0x3] }
 0x2d9   : > { %2103 = vmax.xlane.f32.xlu0 %v2102_v56  ;;  %v7552_v47 = vrot.slane %v906_v32, %v7142_v63 }
 0x2da   : > { %5373 = vmatmul.mubr.msk.bf16.gmra.mrb[24].mxu0 %vm2184_vm0, %v2160_v57  ;;  %v1888_v57 = vpop.xlane.xlu1 %1887 }
 0x2db   : > { %2283 = vmatprep.mubr.bf16.mxu0 %v8647_v20  ;;  %2515 = vmatpush1.bf16.msra.mxu0 %v6167_v24  ;;  %vm1890_vm6 = vcmp.gt.f32.partialorder %v1888_v57, 0.0  ;;  %v6178_v24 = vld [vmem:[%s8626_s5 + $0x454] ss:$8 sps:$4 sm:$0xff]   ;;  %v7548_v57 = vrot.slane %v906_v32, %v7139_v62 }
 0x2dc   : > { %2516 = vmatprep.subr.bf16.mxu0 %v8647_v20  ;;  %v7462_v60 = vsel %vm1890_vm6, 1.0, %v8645_v50  ;;  %2754 = vmatprep.subr.bf16.mxu1 %v6178_v24 }
 0x2dd   : > { %2130 = vmax.xlane.f32.xlu0 %v2129_v21  ;;  %2755 = vmatpush1.bf16.msra.mxu1 %v6176_v28  ;;  %v923_v21 = vld [vmem:[#allocation6 + $0x2c] ss:$0 sm:$0xff] }
 0x2de   : > { %v1939_v38 = vpop.xlane.xlu1 %1938  ;;  %2756 = vmatprep.subr.bf16.mxu1 %v6181_v30 }
 0x2df   : > { %2517 = vmatpush1.bf16.msra.mxu0 %v6168_v0  ;;  %v5952_v0 = vpack.i.bf16 %v7462_v60, %v7465_v36  ;;  %vm1943_vm10 = vcmp.gt.f32.partialorder %v1939_v38, 0.0 }
 0x2e0   : > { %2518 = vmatprep.subr.bf16.mxu0 %v8647_v20  ;;  %v7493_v11 = vsel %vm1943_vm10, 1.0, %v8645_v50 }
 0x2e2   : > { %5374 = vmatmul.mubr.msk.bf16.gmra.mrb[28].mxu0 %vm2184_vm0, %v2161_v2  ;;  %v1912_v2 = vpop.xlane.xlu0 %1911 }
 0x2e3   : > { %2293 = vmatprep.mubr.bf16.mxu0 %v8647_v20  ;;  %2519 = vmatpush1.bf16.msra.mxu0 %v6169_v3  ;;  %vm1916_vm8 = vcmp.gt.f32.partialorder %v1912_v2, 0.0  ;;  %v6179_v3 = vld [vmem:[%s8626_s5 + $0x460] ss:$8 sps:$4 sm:$0xff]  }
 0x2e4   : > { %2520 = vmatprep.subr.bf16.mxu0 %v8647_v20  ;;  %v7479_v4 = vsel %vm1916_vm8, 1.0, %v8645_v50  ;;  %2757 = vmatpush1.bf16.msra.mxu1 %v6179_v3 }
 0x2e5   : > { %2758 = vmatprep.subr.bf16.mxu1 %v6184_v9  ;;  %v2138_v43 = vadd.f32 %v7479_v4, %v7465_v36 }
 0x2e6   : > { %v1915_v5 = vpop.xlane.xlu0 %1914 }
 0x2e7   : > { %2521 = vmatpush1.bf16.msra.mxu0 %v6170_v6  ;;  %v1966_v6 = vpop.xlane.xlu1 %1965  ;;  %vm1917_vm9 = vcmp.gt.f32.partialorder %v1915_v5, 0.0  ;;  %v2140_v16 = vadd.f32 %v7493_v11, %v2138_v43 }
 0x2e8   : > { %2522 = vmatprep.subr.bf16.mxu0 %v8647_v20  ;;  %vm1970_vm12 = vcmp.gt.f32.partialorder %v1966_v6, 0.0  ;;  %2759 = vmatpush1.bf16.msra.mxu1 %v6182_v58 }
 0x2e9   : > { %5953 = vperm.xlu1 %5951, %v5952_v0   ;;  %v7507_v8 = vsel %vm1970_vm12, 1.0, %v8645_v50  ;;  %2760 = vmatprep.subr.bf16.mxu1 %v6187_v13 }
 0x2ea   : > { %5375 = vmatmul.mubr.msk.bf16.gmra.mrb[32].mxu0 %vm2184_vm0, %v2162_v10  ;;  %v7485_v10 = vsel %vm1917_vm9, 1.0, %v8645_v50  ;;  %v1942_v12 = vpop.xlane.xlu0 %1941  ;;  %v2142_v54 = vadd.f32 %v7507_v8, %v2140_v16  ;;  %vm2471_vm9 = vcmask 179200  }
 0x2eb   : > { %2303 = vmatprep.mubr.bf16.mxu0 %v8647_v20  ;;  %2523 = vmatpush1.bf16.msra.mxu0 %v6171_v39  ;;  %v5958_v37 = vpack.i.bf16 %v7485_v10, %v7479_v4  ;;  %vm1944_vm11 = vcmp.gt.f32.partialorder %v1942_v12, 0.0  ;;  %v1993_v22 = vpop.xlane.xlu1 %1992 }
 0x2ec   : > { %2524 = vmatprep.subr.bf16.mxu0 %v8647_v20  ;;  %vm1997_vm1 = vcmp.gt.f32.partialorder %v1993_v22, 0.0  ;;  %2761 = vmatpush1.bf16.msra.mxu1 %v6185_v7 }
 0x2ed   : > { %v7515_v31 = vsel %vm1997_vm1, 1.0, %v8645_v50 }
 0x2ee   : > { %v1969_v25 = vpop.xlane.xlu0 %1968  ;;  %v2144_v27 = vadd.f32 %v7515_v31, %v2142_v54 }
 0x2ef   : > { %2525 = vmatpush1.bf16.msra.mxu0 %v2504_v46  ;;  %vm1971_vm15 = vcmp.gt.f32.partialorder %v1969_v25, 0.0  ;;  %v2020_v33 = vpop.xlane.xlu1 %2019 }
 0x2f0   : > { %vm2024_vm4 = vcmp.gt.f32.partialorder %v2020_v33, 0.0 }
 0x2f1   : > { %v7525_v48 = vsel %vm2024_vm4, 1.0, %v8645_v50  ;;  %vm2714_vm4 = vcmask 818176  }
 0x2f2   : > { %5376 = vmatmul.mubr.msk.bf16.gmra.mrb[36].mxu0 %vm2184_vm0, %v2163_v17  ;;  %v7499_v17 = vsel %vm1944_vm11, 1.0, %v8645_v50  ;;  %v1996_v34 = vpop.xlane.xlu0 %1995  ;;  %v2146_v29 = vadd.f32 %v7525_v48, %v2144_v27 }
 0x2f3   : > { %2313 = vmatprep.mubr.bf16.mxu0 %v8647_v20  ;;  %5959 = vperm.xlu0 %5957, %v5958_v37   ;;  %v5963_v1 = vpack.i.bf16 %v7499_v17, %v7493_v11  ;;  %vm1998_vm3 = vcmp.gt.f32.partialorder %v1996_v34, 0.0  ;;  %v2047_v49 = vpop.xlane.xlu1 %2046 }
 0x2f4   : > { %v7518_v35 = vsel %vm1998_vm3, 1.0, %v8645_v50  ;;  %vm2051_vm6 = vcmp.gt.f32.partialorder %v2047_v49, 0.0  ;;  %vm2745_vm3 = vcmask 1041408  }
 0x2f5   : > { %5964 = vperm.xlu1 %5951, %v5963_v1   ;;  %v7534_v19 = vsel %vm2051_vm6, 1.0, %v8645_v50  ;;  %vm3736_vm6 = vcmp.gt.f32.partialorder %v7479_v4, 0.0 }
 0x2f6   : > { %v2023_v42 = vpop.xlane.xlu0 %2022  ;;  %v2148_v5 = vadd.f32 %v7534_v19, %v2146_v29 }
 0x2f7   : > { %v2074_v28 = vpop.xlane.xlu1 %2073 }
 0x2f8   : > { %vm2078_vm8 = vcmp.gt.f32.partialorder %v2074_v28, 0.0 }
 0x2f9   : > { %v7566_v58 = vsel %vm2078_vm8, 1.0, %v8645_v50  ;;  %vm3737_vm8 = vcmp.gt.f32.partialorder %v7485_v10, 0.0 }
 0x2fa   : > { %5377 = vmatmul.mubr.msk.bf16.gmra.mrb[40].mxu0 %vm2184_vm0, %v2164_v26  ;;  %v7510_v26 = vsel %vm1971_vm15, 1.0, %v8645_v50  ;;  %v2050_v14 = vpop.xlane.xlu0 %2049  ;;  %v2150_v25 = vadd.f32 %v7566_v58, %v2148_v5 }
 0x2fb   : > { %2323 = vmatprep.mubr.bf16.mxu0 %v8647_v20  ;;  %v5968_v61 = vpack.i.bf16 %v7510_v26, %v7507_v8  ;;  %vm2052_vm7 = vcmp.gt.f32.partialorder %v2050_v14, 0.0 }
 0x2fc   : > { %v7537_v52 = vsel %vm2052_vm7, 1.0, %v8645_v50  ;;  %vm3738_vm7 = vcmp.gt.f32.partialorder %v7493_v11, 0.0 }
 0x2fd   : > { %5969 = vperm.xlu1 %5951, %v5968_v61   ;;  %v5983_v23 = vpack.i.bf16 %v7537_v52, %v7534_v19 }
 0x302   : > { %5378 = vmatmul.mubr.msk.bf16.gmra.mrb[44].mxu0 %vm2184_vm0, %v2165_v41  ;;  %v5973_v41 = vpack.i.bf16 %v7518_v35, %v7515_v31 }
 0x303   : > { %2333 = vmatprep.mubr.bf16.mxu0 %v8647_v20 }
 0x304   : > { %5974 = vperm.xlu1 %5951, %v5973_v41  }
 0x30a   : > { %5379 = vmatmul.mubr.msk.bf16.gmra.mrb[48].mxu0 %vm2184_vm0, %v2166_v15 }
 0x30b   : > { %2343 = vmatprep.mubr.bf16.mxu0 %v8647_v20 }
 0x312   : > { %5380 = vmatmul.mubr.msk.bf16.gmra.mrb[52].mxu0 %vm2184_vm0, %v2167_v53  ;;  %vm2025_vm0 = vcmp.gt.f32.partialorder %v2023_v42, 0.0  ;;  %v2139_v53 = vadd.f32 %v7485_v10, %v7462_v60  ;;  %v2077_v42 = vpop.xlane.xlu0 %2076 }
 0x313   : > { %v7528_v51 = vsel %vm2025_vm0, 1.0, %v8645_v50  ;;  %vm2079_vm11 = vcmp.gt.f32.partialorder %v2077_v42, 0.0  ;;  %vm3734_vm0 = vcmp.gt.f32.partialorder %v7465_v36, 0.0 }
 0x314   : > { %v5978_v15 = vpack.i.bf16 %v7528_v51, %v7525_v48  ;;  %v2141_v18 = vadd.f32 %v7499_v17, %v2139_v53  ;;  %v7576_v16 = vsel %vm2079_vm11, 1.0, %v8645_v50  ;;  %vm3739_vm11 = vcmp.gt.f32.partialorder %v7499_v17, 0.0 }
 0x316   : > { %5979 = vperm.xlu1 %5951, %v5978_v15   ;;  %v2143_v44 = vadd.f32 %v7510_v26, %v2141_v18 }
 0x318   : > { %v2145_v0 = vadd.f32 %v7518_v35, %v2143_v44 }
 0x31a   : > { %5984 = vperm.xlu1 %5951, %v5983_v23   ;;  %v2147_v37 = vadd.f32 %v7528_v51, %v2145_v0 }
 0x31c   : > { %v2149_v34 = vadd.f32 %v7537_v52, %v2147_v37 }
 0x361   : > { %v2101_v41 = vpop.xlane.xlu1 %2100 }
 0x362   : > { %vm2105_vm10 = vcmp.gt.f32.partialorder %v2101_v41, 0.0 }
 0x363   : > { %v7573_v14 = vsel %vm2105_vm10, 1.0, %v8645_v50  ;;  %vm3735_vm10 = vcmp.gt.f32.partialorder %v7462_v60, 0.0 }
 0x364   : > { %v2152_v54 = vadd.f32 %v7573_v14, %v2150_v25 }
 0x365   : > { %v2128_v27 = vpop.xlane.xlu1 %2127 }
 0x366   : > { %vm2132_vm12 = vcmp.gt.f32.partialorder %v2128_v27, 0.0 }
 0x395   : > { %v5607_v55 = vpop.f32.mrb[12].mxu0 }
 0x396   : > { %v5608_v40 = vpop.f32.mrb[13].mxu0 }
 0x397   : > { %v5609_v56 = vadd.f32 %v5608_v40, %v5607_v55  ;;  %v5610_v39 = vpop.f32.mrb[14].mxu0  ;;  %v2151_v40 = vadd.f32 %v7576_v16, %v2149_v34 }
 0x398   : > { %v5611_v45 = vpop.f32.mrb[15].mxu0 }
 0x399   : > { %v5612_v46 = vadd.f32 %v5611_v45, %v5610_v39  ;;  %v7554_v59 = vadd.f32 %v5609_v56, %v923_v21  ;;  %v2104_v39 = vpop.xlane.xlu0 %2103 }
 0x39a   : > { %vm2106_vm15 = vcmp.gt.f32.partialorder %v2104_v39, 0.0 }
 0x39b   : > { %v7556_v24 = vadd.f32 %v5612_v46, %v923_v21  ;;  %v7586_v21 = vsel %vm2132_vm12, 1.0, %v8645_v50  ;;  %v7592_v0 = vsel %vm2106_vm15, 1.0, %v8645_v50  ;;  %vm3740_vm12 = vcmp.gt.f32.partialorder %v7507_v8, 0.0 }
 0x39c   : > { %v7589_v29 = vadd.f32 %v7586_v21, %v2152_v54  ;;  %vm3742_vm15 = vcmp.gt.f32.partialorder %v7515_v31, 0.0 }
 0x39d   : > { %v2255_v2 = vpop.f32.mrb[16].mxu0 }
 0x39e   : > { %v2256_v30 = vadd.f32 %v2255_v2, %v7548_v57  ;;  %v2257_v3 = vpop.f32.mrb[17].mxu0 }
 0x39f   : > { %v2258_v6 = vadd.f32 %v2257_v3, %v7552_v47  ;;  %v2259_v9 = vpop.f32.mrb[18].mxu0  ;;  %v5993_v3 = vpack.i.bf16 %v7592_v0, %v7573_v14 }
 0x3a0   : > { %v2260_v12 = vadd.f32 %v2259_v9, %v7548_v57  ;;  %v2261_v13 = vpop.f32.mrb[19].mxu0  ;;  %v2354_v1 = vmax.f32 %v2256_v30, 0.0  ;;  %v2153_v30 = vadd.f32 %v7592_v0, %v2151_v40  ;;  %v2156_v9 = vmax.f32 %v7589_v29, 1.0 }
 0x3a1   : > { %v2262_v22 = vadd.f32 %v2261_v13, %v7552_v47  ;;  %v2355_v61 = vmax.f32 %v2258_v6, 0.0  ;;  %v2131_v6 = vpop.xlane.xlu0 %2130  ;;  %5994 = vperm.xlu0 %5957, %v5993_v3  }
 0x3a2   : > { %v2356_v7 = vmax.f32 %v2260_v12, 0.0  ;;  %vm2133_vm1 = vcmp.gt.f32.partialorder %v2131_v6, 0.0  ;;  %3260 = vperm.xlu1 %5951, %v2156_v9  }
 0x3a3   : > { %v2357_v33 = vmax.f32 %v2262_v22, 0.0 }
 0x3a4   : > { %v2394_v43 = vpack.c.bf16 %v2356_v7, %v2354_v1  ;;  %v7600_v1 = vsel %vm2133_vm1, 1.0, %v8645_v50  ;;  %vm3741_vm1 = vcmp.gt.f32.partialorder %v7510_v26, 0.0 }
 0x3a5   : > { %v2395_v49 = vpack.c.bf16 %v2357_v33, %v2355_v61  ;;  %v2265_v15 = vpop.f32.mrb[20].mxu0  ;;  %v7605_v61 = vadd.f32 %v7600_v1, %v2153_v30  ;;  %v5998_v39 = vpack.i.bf16 %v7600_v1, %v7586_v21 }
 0x3a6   : > { %v2266_v53 = vadd.f32 %v2265_v15, %v7548_v57  ;;  %v2267_v23 = vpop.f32.mrb[21].mxu0 }
 0x3a7   : > { %v2268_v18 = vadd.f32 %v2267_v23, %v7552_v47  ;;  %v2269_v55 = vpop.f32.mrb[22].mxu0  ;;  %5391 = vmatprep.mubr.msk.bf16.mxu0 %vm2471_vm9, %v2395_v49  ;;  %8679 = vst [vmem:[#allocation23_spill] sm:$0xff] %v7605_v61  ;;  %v2157_v42 = vmax.f32 %v7605_v61, 1.0  ;;  %v5988_v23 = vpack.i.bf16 %v7576_v16, %v7566_v58 }
 0x3a8   : > { %v2270_v32 = vadd.f32 %v2269_v55, %v7548_v57  ;;  %v2271_v56 = vpop.f32.mrb[23].mxu0  ;;  %2539 = vmatmul.mubr.bf16.vlgmr.msra.gmra.mrb[56].mxu0 %v2394_v43  ;;  %v2358_v45 = vmax.f32 %v2266_v53, 0.0 }
 0x3a9   : > { %v2272_v44 = vadd.f32 %v2271_v56, %v7552_v47  ;;  %v2359_v28 = vmax.f32 %v2268_v18, 0.0  ;;  %3265 = vperm.xlu1 %5951, %v2157_v42  }
 0x3aa   : > { %v2360_v46 = vmax.f32 %v2270_v32, 0.0 }
 0x3ab   : > { %v2361_v2 = vmax.f32 %v2272_v44, 0.0 }
 0x3ac   : > { %v2396_v5 = vpack.c.bf16 %v2360_v46, %v2358_v45 }
 0x3ad   : > { %v2397_v37 = vpack.c.bf16 %v2361_v2, %v2359_v28  ;;  %v2275_v12 = vpop.f32.mrb[24].mxu0  ;;  %5989 = vperm.xlu1 %5951, %v5988_v23  }
 0x3ae   : > { %v2276_v13 = vadd.f32 %v2275_v12, %v7548_v57  ;;  %v2277_v22 = vpop.f32.mrb[25].mxu0 }
 0x3af   : > { %v2278_v7 = vadd.f32 %v2277_v22, %v7552_v47  ;;  %v2279_v25 = vpop.f32.mrb[26].mxu0  ;;  %5392 = vmatprep.mubr.msk.bf16.mxu0 %vm2471_vm9, %v2397_v37 }
 0x3b0   : > { %v2280_v33 = vadd.f32 %v2279_v25, %v7548_v57  ;;  %v2281_v34 = vpop.f32.mrb[27].mxu0  ;;  %2547 = vmatmul.mubr.bf16.gmra.mrb[60].mxu0 %v2396_v5  ;;  %v2362_v43 = vmax.f32 %v2276_v13, 0.0 }
 0x3b1   : > { %v2282_v41 = vadd.f32 %v2281_v34, %v7552_v47  ;;  %v2363_v15 = vmax.f32 %v2278_v7, 0.0  ;;  %5999 = vperm.xlu1 %5951, %v5998_v39  }
 0x3b2   : > { %v2364_v49 = vmax.f32 %v2280_v33, 0.0 }
 0x3b3   : > { %v2365_v53 = vmax.f32 %v2282_v41, 0.0 }
 0x3b4   : > { %v2398_v54 = vpack.c.bf16 %v2364_v49, %v2362_v43 }
 0x3b5   : > { %v2399_v18 = vpack.c.bf16 %v2365_v53, %v2363_v15  ;;  %v2285_v55 = vpop.f32.mrb[28].mxu0 }
 0x3b6   : > { %v2286_v40 = vadd.f32 %v2285_v55, %v7548_v57  ;;  %v2287_v27 = vpop.f32.mrb[29].mxu0 }
 0x3b7   : > { %v2288_v32 = vadd.f32 %v2287_v27, %v7552_v47  ;;  %v2289_v56 = vpop.f32.mrb[30].mxu0  ;;  %5393 = vmatprep.mubr.msk.bf16.mxu0 %vm2471_vm9, %v2399_v18 }
 0x3b8   : > { %v2290_v44 = vadd.f32 %v2289_v56, %v7548_v57  ;;  %v2291_v45 = vpop.f32.mrb[31].mxu0  ;;  %2555 = vmatmul.mubr.bf16.gmra.mrb[64].mxu0 %v2398_v54  ;;  %v2366_v28 = vmax.f32 %v2286_v40, 0.0 }
 0x3b9   : > { %v2292_v46 = vadd.f32 %v2291_v45, %v7552_v47  ;;  %v2367_v30 = vmax.f32 %v2288_v32, 0.0 }
 0x3ba   : > { %v2368_v2 = vmax.f32 %v2290_v44, 0.0 }
 0x3bb   : > { %v2369_v3 = vmax.f32 %v2292_v46, 0.0 }
 0x3bc   : > { %v2400_v5 = vpack.c.bf16 %v2368_v2, %v2366_v28 }
 0x3bd   : > { %v2401_v6 = vpack.c.bf16 %v2369_v3, %v2367_v30  ;;  %v2295_v9 = vpop.f32.mrb[32].mxu0 }
 0x3be   : > { %v2296_v37 = vadd.f32 %v2295_v9, %v7548_v57  ;;  %v2297_v12 = vpop.f32.mrb[33].mxu0 }
 0x3bf   : > { %v2298_v13 = vadd.f32 %v2297_v12, %v7552_v47  ;;  %v2299_v22 = vpop.f32.mrb[34].mxu0  ;;  %5394 = vmatprep.mubr.msk.bf16.mxu0 %vm2471_vm9, %v2401_v6 }
 0x3c0   : > { %v2300_v7 = vadd.f32 %v2299_v22, %v7548_v57  ;;  %v2301_v25 = vpop.f32.mrb[35].mxu0  ;;  %2563 = vmatmul.mubr.bf16.gmra.mrb[68].mxu0 %v2400_v5  ;;  %v2370_v34 = vmax.f32 %v2296_v37, 0.0 }
 0x3c1   : > { %v2302_v33 = vadd.f32 %v2301_v25, %v7552_v47  ;;  %v2371_v42 = vmax.f32 %v2298_v13, 0.0 }
 0x3c2   : > { %v2372_v41 = vmax.f32 %v2300_v7, 0.0 }
 0x3c3   : > { %v2373_v43 = vmax.f32 %v2302_v33, 0.0 }
 0x3c4   : > { %v2402_v49 = vpack.c.bf16 %v2372_v41, %v2370_v34 }
 0x3c5   : > { %v2403_v15 = vpack.c.bf16 %v2373_v43, %v2371_v42  ;;  %v2305_v53 = vpop.f32.mrb[36].mxu0 }
 0x3c6   : > { %v2306_v23 = vadd.f32 %v2305_v53, %v7548_v57  ;;  %v2307_v54 = vpop.f32.mrb[37].mxu0 }
 0x3c7   : > { %v2308_v18 = vadd.f32 %v2307_v54, %v7552_v47  ;;  %v2309_v55 = vpop.f32.mrb[38].mxu0  ;;  %5395 = vmatprep.mubr.msk.bf16.mxu0 %vm2471_vm9, %v2403_v15 }
 0x3c8   : > { %v2310_v40 = vadd.f32 %v2309_v55, %v7548_v57  ;;  %v2311_v27 = vpop.f32.mrb[39].mxu0  ;;  %2571 = vmatmul.mubr.bf16.gmra.mrb[72].mxu0 %v2402_v49  ;;  %v2374_v56 = vmax.f32 %v2306_v23, 0.0 }
 0x3c9   : > { %v2312_v32 = vadd.f32 %v2311_v27, %v7552_v47  ;;  %v2375_v44 = vmax.f32 %v2308_v18, 0.0 }
 0x3ca   : > { %v2376_v39 = vmax.f32 %v2310_v40, 0.0 }
 0x3cb   : > { %v2377_v45 = vmax.f32 %v2312_v32, 0.0 }
 0x3cc   : > { %v2404_v46 = vpack.c.bf16 %v2376_v39, %v2374_v56 }
 0x3cd   : > { %v2405_v28 = vpack.c.bf16 %v2377_v45, %v2375_v44  ;;  %v2315_v2 = vpop.f32.mrb[40].mxu0 }
 0x3ce   : > { %v2316_v30 = vadd.f32 %v2315_v2, %v7548_v57  ;;  %v2317_v3 = vpop.f32.mrb[41].mxu0 }
 0x3cf   : > { %v2318_v5 = vadd.f32 %v2317_v3, %v7552_v47  ;;  %v2319_v6 = vpop.f32.mrb[42].mxu0  ;;  %5396 = vmatprep.mubr.msk.bf16.mxu0 %vm2471_vm9, %v2405_v28 }
 0x3d0   : > { %v2320_v9 = vadd.f32 %v2319_v6, %v7548_v57  ;;  %v2321_v37 = vpop.f32.mrb[43].mxu0  ;;  %2579 = vmatmul.mubr.bf16.gmra.mrb[76].mxu0 %v2404_v46  ;;  %v2378_v13 = vmax.f32 %v2316_v30, 0.0 }
 0x3d1   : > { %v2322_v12 = vadd.f32 %v2321_v37, %v7552_v47  ;;  %v2379_v7 = vmax.f32 %v2318_v5, 0.0 }
 0x3d2   : > { %v2380_v22 = vmax.f32 %v2320_v9, 0.0 }
 0x3d3   : > { %v2381_v25 = vmax.f32 %v2322_v12, 0.0 }
 0x3d4   : > { %v2406_v33 = vpack.c.bf16 %v2380_v22, %v2378_v13 }
 0x3d5   : > { %v2407_v34 = vpack.c.bf16 %v2381_v25, %v2379_v7  ;;  %v2325_v41 = vpop.f32.mrb[44].mxu0 }
 0x3d6   : > { %v2326_v42 = vadd.f32 %v2325_v41, %v7548_v57  ;;  %v2327_v43 = vpop.f32.mrb[45].mxu0 }
 0x3d7   : > { %v2328_v49 = vadd.f32 %v2327_v43, %v7552_v47  ;;  %v2329_v15 = vpop.f32.mrb[46].mxu0  ;;  %5397 = vmatprep.mubr.msk.bf16.mxu0 %vm2471_vm9, %v2407_v34 }
 0x3d8   : > { %v2330_v53 = vadd.f32 %v2329_v15, %v7548_v57  ;;  %v2331_v23 = vpop.f32.mrb[47].mxu0  ;;  %2587 = vmatmul.mubr.bf16.gmra.mrb[80].mxu0 %v2406_v33  ;;  %v2382_v18 = vmax.f32 %v2326_v42, 0.0 }
 0x3d9   : > { %v2332_v54 = vadd.f32 %v2331_v23, %v7552_v47  ;;  %v2383_v40 = vmax.f32 %v2328_v49, 0.0 }
 0x3da   : > { %v2384_v55 = vmax.f32 %v2330_v53, 0.0 }
 0x3db   : > { %v2385_v27 = vmax.f32 %v2332_v54, 0.0 }
 0x3dc   : > { %v2408_v32 = vpack.c.bf16 %v2384_v55, %v2382_v18  ;;  %v6190_v55 = vld [vmem:[%s8626_s5 + $0x494] ss:$8 sps:$4 sm:$0xff]  }
 0x3dd   : > { %v2409_v56 = vpack.c.bf16 %v2385_v27, %v2383_v40  ;;  %v2335_v39 = vpop.f32.mrb[48].mxu0  ;;  %2762 = vmatprep.subr.bf16.mxu1 %v6190_v55 }
 0x3de   : > { %v2336_v44 = vadd.f32 %v2335_v39, %v7548_v57  ;;  %v2337_v45 = vpop.f32.mrb[49].mxu0  ;;  %v6194_v39 = vld [vmem:[%s8680_s10 + $0x8] sm:$0xff]  }
 0x3df   : > { %v2338_v46 = vadd.f32 %v2337_v45, %v7552_v47  ;;  %v2339_v28 = vpop.f32.mrb[50].mxu0  ;;  %5398 = vmatprep.mubr.msk.bf16.mxu0 %vm2471_vm9, %v2409_v56  ;;  %v6193_v56 = vld [vmem:[%s8680_s10] sm:$0xff]   ;;  %v7670_v45 = vld [vmem:[#allocation6 + $0x1] ss:$0 sm:$0xff] }
 0x3e0   : > { %v2340_v2 = vadd.f32 %v2339_v28, %v7548_v57  ;;  %v2341_v30 = vpop.f32.mrb[51].mxu0  ;;  %2595 = vmatmul.mubr.bf16.gmra.mrb[84].mxu0 %v2408_v32  ;;  %v2386_v5 = vmax.f32 %v2336_v44, 0.0  ;;  %5695 = vmatprep.subr.bf16.mxu0 %v6193_v56  ;;  %v6195_v44 = vld [vmem:[%s8680_s10 + $0x10] sm:$0xff]  }
 0x3e1   : > { %v2342_v3 = vadd.f32 %v2341_v30, %v7552_v47  ;;  %v2387_v9 = vmax.f32 %v2338_v46, 0.0  ;;  %5696 = vmatpush3.bf16.msra.mxu0 %v6193_v56 }
 0x3e2   : > { %v2388_v6 = vmax.f32 %v2340_v2, 0.0  ;;  %5697 = vmatprep.subr.bf16.mxu0 %v6194_v39 }
 0x3e3   : > { %v2389_v37 = vmax.f32 %v2342_v3, 0.0 }
 0x3e4   : > { %v2410_v12 = vpack.c.bf16 %v2388_v6, %v2386_v5 }
 0x3e5   : > { %v2411_v13 = vpack.c.bf16 %v2389_v37, %v2387_v9  ;;  %v2345_v22 = vpop.f32.mrb[52].mxu0  ;;  %5698 = vmatpush3.bf16.msra.mxu0 %v6194_v39  ;;  %v5954_v37 = vpop.permute.xlu1 %5953 }
 0x3e6   : > { %v2346_v7 = vadd.f32 %v2345_v22, %v7548_v57  ;;  %v2347_v25 = vpop.f32.mrb[53].mxu0  ;;  %5699 = vmatprep.subr.bf16.mxu0 %v6195_v44 }
 0x3e7   : > { %v2348_v33 = vadd.f32 %v2347_v25, %v7552_v47  ;;  %v2349_v34 = vpop.f32.mrb[54].mxu0  ;;  %5399 = vmatprep.mubr.msk.bf16.mxu0 %vm2471_vm9, %v2411_v13 }
 0x3e8   : > { %v2350_v41 = vadd.f32 %v2349_v34, %v7548_v57  ;;  %v2351_v42 = vpop.f32.mrb[55].mxu0  ;;  %2603 = vmatmul.mubr.bf16.gmra.mrb[88].mxu0 %v2410_v12  ;;  %v2390_v49 = vmax.f32 %v2346_v7, 0.0  ;;  %v6188_v57 = vld [vmem:[%s8626_s5 + $0x490] ss:$8 sps:$4 sm:$0xff]   ;;  %v5960_v12 = vpop.permute.xlu0 %5959  ;;  %v5955_v7 = vunpack.i.l.bf16 %v5954_v37 }
 0x3e9   : > { %v2352_v43 = vadd.f32 %v2351_v42, %v7552_v47  ;;  %v2391_v53 = vmax.f32 %v2348_v33, 0.0  ;;  %2763 = vmatpush1.bf16.msra.mxu1 %v6188_v57  ;;  %v742_v47 = vld [vmem:[%s8626_s5 + $0x4a0] sm:$0x33]  ;;  %5700 = vmatpush3.bf16.msra.mxu0 %v6195_v44  ;;  %v5961_v34 = vunpack.i.l.bf16 %v5960_v12  ;;  %v5956_v42 = vunpack.i.h.bf16 %v5954_v37  ;;  %v5965_v55 = vpop.permute.xlu1 %5964 }
 0x3ea   : > { %v2392_v15 = vmax.f32 %v2350_v41, 0.0  ;;  %v5414_v40 = vcombine.high %v742_v47, %v742_v47  ;;  %v5413_v27 = vcombine.low %v742_v47, %v742_v47 }
 0x3eb   : > { %v2393_v23 = vmax.f32 %v2352_v43, 0.0 }
 0x3ec   : > { %v2412_v54 = vpack.c.bf16 %v2392_v15, %v2390_v49  ;;  %5415 = vmatprep.subr.msk.bf16.mxu1 %vm2745_vm3, %v5414_v40  ;;  %v2747_v32 = vsel %vm2745_vm3, %v5413_v27, 0  ;;  %v5962_v49 = vunpack.i.h.bf16 %v5960_v12 }
 0x3ed   : > { %v2413_v18 = vpack.c.bf16 %v2393_v23, %v2391_v53  ;;  %2765 = vmatpush1.bf16.msra.mxu1 %v2747_v32  ;;  %v5970_v37 = vpop.permute.xlu1 %5969 }
 0x3ef   : > { %5400 = vmatprep.mubr.msk.bf16.mxu0 %vm2471_vm9, %v2413_v18 }
 0x3f0   : > { %2611 = vmatmul.mubr.bf16.gmra.mrb[92].mxu0 %v2412_v54 }
 0x47b   : > { %v2540_v46 = vpop.f32.mrb[56].mxu0 }
 0x47c   : > { %v2541_v28 = vadd.f32 %v2540_v46, %v7670_v45  ;;  %v2542_v2 = vpop.f32.mrb[57].mxu0  ;;  %v5966_v46 = vunpack.i.l.bf16 %v5965_v55 }
 0x47d   : > { %v2543_v30 = vpop.f32.mrb[58].mxu0 }
 0x47e   : > { %v2544_v3 = vadd.f32 %v2543_v30, %v7670_v45  ;;  %v2545_v5 = vpop.f32.mrb[59].mxu0  ;;  %v2619_v6 = vmax.f32 %v2541_v28, 0.0  ;;  %v5967_v30 = vunpack.i.h.bf16 %v5965_v55 }
 0x480   : > { %v2620_v9 = vmax.f32 %v2544_v3, 0.0  ;;  %v3220_v23 = vmul.f32 %v5955_v7, %v2619_v6 }
 0x482   : > { %v2639_v13 = vpack.c.bf16 %v2620_v9, %v2619_v6  ;;  %v3221_v57 = vmul.f32 %v5956_v42, %v2620_v9 }
 0x483   : > { %v2548_v22 = vpop.f32.mrb[60].mxu0 }
 0x484   : > { %v2549_v25 = vadd.f32 %v2548_v22, %v7670_v45  ;;  %v2550_v33 = vpop.f32.mrb[61].mxu0  ;;  %5416 = vmatmul.mubr.msk.bf16.vlgmr.msra.gmra.mrb[4].mxu1 %vm2714_vm4, %v2639_v13 }
 0x485   : > { %v2551_v41 = vpop.f32.mrb[62].mxu0  ;;  %2794 = vmatprep.mubr.bf16.mxu1 %v8647_v20 }
 0x486   : > { %v2621_v43 = vmax.f32 %v2549_v25, 0.0  ;;  %v2552_v15 = vadd.f32 %v2551_v41, %v7670_v45  ;;  %v2553_v53 = vpop.f32.mrb[63].mxu0  ;;  %v5971_v41 = vunpack.i.l.bf16 %v5970_v37 }
 0x488   : > { %v3222_v54 = vmul.f32 %v5961_v34, %v2621_v43  ;;  %v2622_v18 = vmax.f32 %v2552_v15, 0.0  ;;  %v5972_v15 = vunpack.i.h.bf16 %v5970_v37 }
 0x48a   : > { %v3240_v47 = vadd.f32 %v3222_v54, %v3220_v23  ;;  %v2640_v40 = vpack.c.bf16 %v2622_v18, %v2621_v43  ;;  %v3223_v27 = vmul.f32 %v5962_v49, %v2622_v18  ;;  %v5975_v43 = vpop.permute.xlu1 %5974 }
 0x48b   : > { %v2556_v32 = vpop.f32.mrb[64].mxu0 }
 0x48c   : > { %v3241_v56 = vadd.f32 %v3223_v27, %v3221_v57  ;;  %v2557_v39 = vadd.f32 %v2556_v32, %v7670_v45  ;;  %v2558_v44 = vpop.f32.mrb[65].mxu0  ;;  %5417 = vmatmul.mubr.msk.bf16.gmra.mrb[8].mxu1 %vm2714_vm4, %v2640_v40 }
 0x48d   : > { %v2559_v28 = vpop.f32.mrb[66].mxu0  ;;  %2804 = vmatprep.mubr.bf16.mxu1 %v8647_v20  ;;  %v5976_v44 = vunpack.i.l.bf16 %v5975_v43 }
 0x48e   : > { %v2623_v2 = vmax.f32 %v2557_v39, 0.0  ;;  %v2560_v3 = vadd.f32 %v2559_v28, %v7670_v45  ;;  %v2561_v5 = vpop.f32.mrb[67].mxu0  ;;  %v5980_v55 = vpop.permute.xlu1 %5979 }
 0x490   : > { %v3224_v6 = vmul.f32 %v5966_v46, %v2623_v2  ;;  %v2624_v9 = vmax.f32 %v2560_v3, 0.0 }
 0x492   : > { %v3242_v12 = vadd.f32 %v3240_v47, %v3224_v6  ;;  %v2641_v13 = vpack.c.bf16 %v2624_v9, %v2623_v2  ;;  %v3225_v22 = vmul.f32 %v5967_v30, %v2624_v9  ;;  %v5977_v2 = vunpack.i.h.bf16 %v5975_v43  ;;  %v5985_v5 = vpop.permute.xlu1 %5984 }
 0x493   : > { %v2564_v7 = vpop.f32.mrb[68].mxu0 }
 0x494   : > { %v3243_v25 = vadd.f32 %v3241_v56, %v3225_v22  ;;  %v2565_v33 = vadd.f32 %v2564_v7, %v7670_v45  ;;  %v2566_v34 = vpop.f32.mrb[69].mxu0  ;;  %5418 = vmatmul.mubr.msk.bf16.gmra.mrb[12].mxu1 %vm2714_vm4, %v2641_v13 }
 0x495   : > { %v2567_v42 = vpop.f32.mrb[70].mxu0  ;;  %2814 = vmatprep.mubr.bf16.mxu1 %v8647_v20  ;;  %v5981_v34 = vunpack.i.l.bf16 %v5980_v55 }
 0x496   : > { %v2625_v49 = vmax.f32 %v2565_v33, 0.0  ;;  %v2568_v53 = vadd.f32 %v2567_v42, %v7670_v45  ;;  %v2569_v23 = vpop.f32.mrb[71].mxu0  ;;  %v3261_v42 = vpop.permute.xlu1 %3260 }
 0x497   : > { %6355 = vrcp.f32 %v3261_v42 }
 0x498   : > { %v3226_v54 = vmul.f32 %v5971_v41, %v2625_v49  ;;  %v2626_v18 = vmax.f32 %v2568_v53, 0.0 }
 0x49a   : > { %v3244_v57 = vadd.f32 %v3242_v12, %v3226_v54  ;;  %v2642_v47 = vpack.c.bf16 %v2626_v18, %v2625_v49  ;;  %v3227_v40 = vmul.f32 %v5972_v15, %v2626_v18  ;;  %v5982_v49 = vunpack.i.h.bf16 %v5980_v55 }
 0x49b   : > { %v2572_v27 = vpop.f32.mrb[72].mxu0  ;;  %v5987_v55 = vunpack.i.h.bf16 %v5985_v5 }
 0x49c   : > { %v3245_v32 = vadd.f32 %v3243_v25, %v3227_v40  ;;  %v2573_v56 = vadd.f32 %v2572_v27, %v7670_v45  ;;  %v2574_v39 = vpop.f32.mrb[73].mxu0  ;;  %5419 = vmatmul.mubr.msk.bf16.gmra.mrb[16].mxu1 %vm2714_vm4, %v2642_v47  ;;  %v3266_v27 = vpop.permute.xlu1 %3265 }
 0x49d   : > { %v2575_v46 = vpop.f32.mrb[74].mxu0  ;;  %2824 = vmatprep.mubr.bf16.mxu1 %v8647_v20  ;;  %6357 = vrcp.f32 %v3266_v27 }
 0x49e   : > { %v2627_v28 = vmax.f32 %v2573_v56, 0.0  ;;  %v2576_v30 = vadd.f32 %v2575_v46, %v7670_v45  ;;  %v2577_v3 = vpop.f32.mrb[75].mxu0  ;;  %v5986_v56 = vunpack.i.l.bf16 %v5985_v5 }
 0x4a0   : > { %v3228_v6 = vmul.f32 %v5976_v44, %v2627_v28  ;;  %v2628_v9 = vmax.f32 %v2576_v30, 0.0 }
 0x4a2   : > { %v3246_v37 = vadd.f32 %v3244_v57, %v3228_v6  ;;  %v2643_v12 = vpack.c.bf16 %v2628_v9, %v2627_v28  ;;  %v3229_v13 = vmul.f32 %v5977_v2, %v2628_v9  ;;  %v5990_v9 = vpop.permute.xlu1 %5989 }
 0x4a3   : > { %v2580_v22 = vpop.f32.mrb[76].mxu0 }
 0x4a4   : > { %v3247_v7 = vadd.f32 %v3245_v32, %v3229_v13  ;;  %v2581_v25 = vadd.f32 %v2580_v22, %v7670_v45  ;;  %v2582_v33 = vpop.f32.mrb[77].mxu0  ;;  %5420 = vmatmul.mubr.msk.bf16.gmra.mrb[20].mxu1 %vm2714_vm4, %v2643_v12 }
 0x4a5   : > { %v2583_v41 = vpop.f32.mrb[78].mxu0  ;;  %2834 = vmatprep.mubr.bf16.mxu1 %v8647_v20 }
 0x4a6   : > { %v2629_v43 = vmax.f32 %v2581_v25, 0.0  ;;  %v2584_v15 = vadd.f32 %v2583_v41, %v7670_v45  ;;  %v2585_v53 = vpop.f32.mrb[79].mxu0 }
 0x4a8   : > { %v3230_v23 = vmul.f32 %v5981_v34, %v2629_v43  ;;  %v2630_v54 = vmax.f32 %v2584_v15, 0.0  ;;  %v5991_v34 = vunpack.i.l.bf16 %v5990_v9 }
 0x4aa   : > { %v3248_v18 = vadd.f32 %v3246_v37, %v3230_v23  ;;  %v2644_v57 = vpack.c.bf16 %v2630_v54, %v2629_v43  ;;  %v3231_v47 = vmul.f32 %v5982_v49, %v2630_v54  ;;  %v5992_v43 = vunpack.i.h.bf16 %v5990_v9  ;;  %v5995_v54 = vpop.permute.xlu0 %5994  ;;  %v6000_v9 = vpop.permute.xlu1 %5999 }
 0x4ab   : > { %v2588_v40 = vpop.f32.mrb[80].mxu0  ;;  %v6002_v42 = vunpack.i.h.bf16 %v6000_v9 }
 0x4ac   : > { %v3249_v32 = vadd.f32 %v3247_v7, %v3231_v47  ;;  %v2589_v39 = vadd.f32 %v2588_v40, %v7670_v45  ;;  %v2590_v44 = vpop.f32.mrb[81].mxu0  ;;  %5421 = vmatmul.mubr.msk.bf16.gmra.mrb[24].mxu1 %vm2714_vm4, %v2644_v57 }
 0x4ad   : > { %v2591_v46 = vpop.f32.mrb[82].mxu0  ;;  %2844 = vmatprep.mubr.bf16.mxu1 %v8647_v20  ;;  %v5996_v44 = vunpack.i.l.bf16 %v5995_v54 }
 0x4ae   : > { %v2631_v28 = vmax.f32 %v2589_v39, 0.0  ;;  %v2592_v2 = vadd.f32 %v2591_v46, %v7670_v45  ;;  %v2593_v30 = vpop.f32.mrb[83].mxu0 }
 0x4b0   : > { %v3232_v3 = vmul.f32 %v5986_v56, %v2631_v28  ;;  %v2632_v6 = vmax.f32 %v2592_v2, 0.0 }
 0x4b2   : > { %v3250_v37 = vadd.f32 %v3248_v18, %v3232_v3  ;;  %v2645_v12 = vpack.c.bf16 %v2632_v6, %v2631_v28  ;;  %v3233_v13 = vmul.f32 %v5987_v55, %v2632_v6  ;;  %v5997_v28 = vunpack.i.h.bf16 %v5995_v54 }
 0x4b3   : > { %v2596_v22 = vpop.f32.mrb[84].mxu0 }
 0x4b4   : > { %v3251_v7 = vadd.f32 %v3249_v32, %v3233_v13  ;;  %v2597_v25 = vadd.f32 %v2596_v22, %v7670_v45  ;;  %v2598_v33 = vpop.f32.mrb[85].mxu0  ;;  %5422 = vmatmul.mubr.msk.bf16.gmra.mrb[28].mxu1 %vm2714_vm4, %v2645_v12 }
 0x4b5   : > { %v2599_v41 = vpop.f32.mrb[86].mxu0  ;;  %2854 = vmatprep.mubr.bf16.mxu1 %v8647_v20 }
 0x4b6   : > { %v2633_v5 = vmax.f32 %v2597_v25, 0.0  ;;  %v2600_v49 = vadd.f32 %v2599_v41, %v7670_v45  ;;  %v2601_v15 = vpop.f32.mrb[87].mxu0 }
 0x4b8   : > { %v3234_v53 = vmul.f32 %v5991_v34, %v2633_v5  ;;  %v2634_v23 = vmax.f32 %v2600_v49, 0.0  ;;  %v6001_v34 = vunpack.i.l.bf16 %v6000_v9 }
 0x4ba   : > { %v3252_v18 = vadd.f32 %v3250_v37, %v3234_v53  ;;  %v2646_v57 = vpack.c.bf16 %v2634_v23, %v2633_v5  ;;  %v3235_v47 = vmul.f32 %v5992_v43, %v2634_v23  ;;  %v6356_v53 = vpop.eup %6355 }
 0x4bb   : > { %v2604_v40 = vpop.f32.mrb[88].mxu0 }
 0x4bc   : > { %v3253_v32 = vadd.f32 %v3251_v7, %v3235_v47  ;;  %v2605_v56 = vadd.f32 %v2604_v40, %v7670_v45  ;;  %v2606_v39 = vpop.f32.mrb[89].mxu0  ;;  %5423 = vmatmul.mubr.msk.bf16.gmra.mrb[32].mxu1 %vm2714_vm4, %v2646_v57  ;;  %v6358_v57 = vpop.eup %6357 }
 0x4bd   : > { %v2607_v46 = vpop.f32.mrb[90].mxu0  ;;  %2864 = vmatprep.mubr.bf16.mxu1 %v8647_v20  ;;  %v6197_v39 = vld [vmem:[%s8680_s10 + $0x20] sm:$0xff]  }
 0x4be   : > { %v2635_v55 = vmax.f32 %v2605_v56, 0.0  ;;  %v2608_v2 = vadd.f32 %v2607_v46, %v7670_v45  ;;  %v2609_v30 = vpop.f32.mrb[91].mxu0  ;;  %v6199_v46 = vld [vmem:[%s8680_s10 + $0x30] ss:$0 sps:$4 sm:$0x33]  }
 0x4c0   : > { %v3236_v3 = vmul.f32 %v5996_v44, %v2635_v55  ;;  %v2636_v6 = vmax.f32 %v2608_v2, 0.0  ;;  %v6198_v44 = vld [vmem:[%s8680_s10 + $0x28] sm:$0xff]  }
 0x4c2   : > { %v3254_v37 = vadd.f32 %v3252_v18, %v3236_v3  ;;  %v2647_v12 = vpack.c.bf16 %v2636_v6, %v2635_v55  ;;  %v3237_v13 = vmul.f32 %v5997_v28, %v2636_v6  ;;  %v3005_v55 = vsel %vm2745_vm3, %v6199_v46, 0  ;;  %v7732_v28 = vld [vmem:[#allocation6 + $0x2] ss:$0 sm:$0xff] }
 0x4c3   : > { %v2612_v22 = vpop.f32.mrb[92].mxu0 }
 0x4c4   : > { %v3255_v7 = vadd.f32 %v3253_v32, %v3237_v13  ;;  %v2613_v25 = vadd.f32 %v2612_v22, %v7670_v45  ;;  %v2614_v33 = vpop.f32.mrb[93].mxu0  ;;  %5424 = vmatmul.mubr.msk.bf16.gmra.mrb[36].mxu1 %vm2714_vm4, %v2647_v12 }
 0x4c5   : > { %v2615_v41 = vpop.f32.mrb[94].mxu0  ;;  %2874 = vmatprep.mubr.bf16.mxu1 %v8647_v20 }
 0x4c6   : > { %v2637_v5 = vmax.f32 %v2613_v25, 0.0  ;;  %v2616_v43 = vadd.f32 %v2615_v41, %v7670_v45  ;;  %v2617_v27 = vpop.f32.mrb[95].mxu0  ;;  %v6196_v45 = vld [vmem:[%s8680_s10 + $0x18] sm:$0xff]  }
 0x4c7   : > { %5701 = vmatprep.subr.bf16.mxu0 %v6196_v45  ;;  %v6200_v27 = vld [vmem:[%s8629_s8 + $0x50] sm:$0xff]  }
 0x4c8   : > { %v3238_v49 = vmul.f32 %v6001_v34, %v2637_v5  ;;  %v2638_v15 = vmax.f32 %v2616_v43, 0.0  ;;  %5702 = vmatpush3.bf16.msra.mxu0 %v6196_v45 }
 0x4c9   : > { %5703 = vmatprep.subr.bf16.mxu0 %v6197_v39 }
 0x4ca   : > { %v3256_v23 = vadd.f32 %v3254_v37, %v3238_v49  ;;  %v2648_v54 = vpack.c.bf16 %v2638_v15, %v2637_v5  ;;  %v3239_v18 = vmul.f32 %v6002_v42, %v2638_v15 }
 0x4cc   : > { %v3257_v47 = vadd.f32 %v3255_v7, %v3239_v18  ;;  %5425 = vmatmul.mubr.msk.bf16.gmra.mrb[40].mxu1 %vm2714_vm4, %v2648_v54  ;;  %v7711_v40 = vmul.f32 %v6356_v53, %v3256_v23  ;;  %5704 = vmatpush3.bf16.msra.mxu0 %v6197_v39  ;;  %v6201_v18 = vld [vmem:[%s8629_s8 + $0x58] sm:$0xff]  }
 0x4cd   : > { %5705 = vmatprep.subr.bf16.mxu0 %v6198_v44 }
 0x4ce   : > { %v7713_v32 = vmul.f32 %v6358_v57, %v3257_v47 }
 0x4d0   : > { %v3272_v56 = vpack.c.bf16 %v7713_v32, %v7711_v40  ;;  %5706 = vmatpush3.bf16.msra.mxu0 %v6198_v44  ;;  %v6202_v44 = vld [vmem:[%s8629_s8 + $0x60] sm:$0xff]   ;;  %v6209_v40 = vld [vmem:[%s8629_s8 + $0x98] sm:$0xff]  }
 0x4d1   : > { %5811 = vmatprep.subr.msk.bf16.mxu0 %vm2745_vm3, %v6199_v46  ;;  %v6210_v32 = vld [vmem:[%s8629_s8 + $0xa0] sm:$0xff]  }
 0x4d4   : > { %5708 = vmatpush3.bf16.msra.mxu0 %v3005_v55 }
 0x4d5   : > { %5729 = vmatprep.subr.bf16.mxu0 %v8645_v50 }
 0x557   : > { %v2786_v2 = vpop.f32.mrb[4].mxu1 }
 0x558   : > { %v2885_v30 = vadd.f32 %v2786_v2, %v7732_v28  ;;  %v7735_v3 = vpop.f32.mrb[5].mxu1 }
 0x559   : > { %v2790_v6 = vpop.f32.mrb[6].mxu1 }
 0x55a   : > { %v2886_v9 = vadd.f32 %v2790_v6, %v7732_v28  ;;  %v7738_v37 = vpop.f32.mrb[7].mxu1  ;;  %v2905_v12 = vmax.f32 %v2885_v30, 0.0 }
 0x55c   : > { %v2906_v13 = vmax.f32 %v2886_v9, 0.0  ;;  %v6203_v9 = vld [vmem:[%s8629_s8 + $0x68] sm:$0xff]  }
 0x55e   : > { %v2925_v22 = vpack.c.bf16 %v2906_v13, %v2905_v12 }
 0x55f   : > { %v2796_v7 = vpop.f32.mrb[8].mxu1 }
 0x560   : > { %v2887_v25 = vadd.f32 %v2796_v7, %v7732_v28  ;;  %v7741_v33 = vpop.f32.mrb[9].mxu1  ;;  %5709 = vmatprep.mubr.msk.bf16.mxu0 %vm2714_vm4, %v2925_v22 }
 0x561   : > { %v2800_v34 = vpop.f32.mrb[10].mxu1 }
 0x562   : > { %v2888_v41 = vadd.f32 %v2800_v34, %v7732_v28  ;;  %v7745_v5 = vpop.f32.mrb[11].mxu1  ;;  %v2907_v42 = vmax.f32 %v2887_v25, 0.0  ;;  %v6204_v25 = vld [vmem:[%s8629_s8 + $0x70] sm:$0xff]  }
 0x564   : > { %v2908_v43 = vmax.f32 %v2888_v41, 0.0 }
 0x566   : > { %v2926_v49 = vpack.c.bf16 %v2908_v43, %v2907_v42 }
 0x567   : > { %v2806_v15 = vpop.f32.mrb[12].mxu1 }
 0x568   : > { %v2889_v53 = vadd.f32 %v2806_v15, %v7732_v28  ;;  %v7751_v23 = vpop.f32.mrb[13].mxu1  ;;  %5710 = vmatmul.mubr.msk.bf16.vlgmr.msra.gmra.mrb[96].mxu0 %vm2714_vm4, %v2926_v49  ;;  %v6205_v49 = vld [vmem:[%s8629_s8 + $0x78] sm:$0xff]  }
 0x569   : > { %v2810_v54 = vpop.f32.mrb[14].mxu1  ;;  %5730 = vmatpush3.bf16.msra.mxu0 %v6200_v27 }
 0x56a   : > { %v2890_v57 = vadd.f32 %v2810_v54, %v7732_v28  ;;  %v7758_v47 = vpop.f32.mrb[15].mxu1  ;;  %5731 = vmatprep.subr.bf16.mxu0 %v8645_v50  ;;  %v2909_v45 = vmax.f32 %v2889_v53, 0.0  ;;  %v6206_v54 = vld [vmem:[%s8629_s8 + $0x80] ss:$0 sps:$4 sm:$0x33]  }
 0x56c   : > { %v2910_v39 = vmax.f32 %v2890_v57, 0.0 }
 0x56d   : > { %5732 = vmatpush3.bf16.msra.mxu0 %v6201_v18 }
 0x56e   : > { %v2927_v46 = vpack.c.bf16 %v2910_v39, %v2909_v45  ;;  %5733 = vmatprep.subr.bf16.mxu0 %v8645_v50  ;;  %v3316_v39 = vsel %vm2745_vm3, %v6206_v54, 0 }
 0x56f   : > { %v2816_v55 = vpop.f32.mrb[16].mxu1 }
 0x570   : > { %v2891_v2 = vadd.f32 %v2816_v55, %v7732_v28  ;;  %v7766_v30 = vpop.f32.mrb[17].mxu1  ;;  %5713 = vmatprep.mubr.msk.bf16.mxu0 %vm2714_vm4, %v2927_v46 }
 0x571   : > { %v2820_v6 = vpop.f32.mrb[18].mxu1  ;;  %5734 = vmatpush3.bf16.msra.mxu0 %v6202_v44 }
 0x572   : > { %v2892_v12 = vadd.f32 %v2820_v6, %v7732_v28  ;;  %v7773_v13 = vpop.f32.mrb[19].mxu1  ;;  %5735 = vmatprep.subr.bf16.mxu0 %v8645_v50  ;;  %v2911_v22 = vmax.f32 %v2891_v2, 0.0 }
 0x574   : > { %v2912_v7 = vmax.f32 %v2892_v12, 0.0 }
 0x575   : > { %5736 = vmatpush3.bf16.msra.mxu0 %v6203_v9 }
 0x576   : > { %v2928_v34 = vpack.c.bf16 %v2912_v7, %v2911_v22  ;;  %5737 = vmatprep.subr.bf16.mxu0 %v8645_v50 }
 0x577   : > { %v2826_v41 = vpop.f32.mrb[20].mxu1 }
 0x578   : > { %v2893_v42 = vadd.f32 %v2826_v41, %v7732_v28  ;;  %v7781_v43 = vpop.f32.mrb[21].mxu1  ;;  %5714 = vmatmul.mubr.msk.bf16.gmra.mrb[100].mxu0 %vm2714_vm4, %v2928_v34 }
 0x579   : > { %v2830_v27 = vpop.f32.mrb[22].mxu1  ;;  %5738 = vmatpush3.bf16.msra.mxu0 %v6204_v25 }
 0x57a   : > { %v2894_v15 = vadd.f32 %v2830_v27, %v7732_v28  ;;  %v7788_v53 = vpop.f32.mrb[23].mxu1  ;;  %5739 = vmatprep.subr.bf16.mxu0 %v8645_v50  ;;  %v2913_v18 = vmax.f32 %v2893_v42, 0.0 }
 0x57c   : > { %v2914_v57 = vmax.f32 %v2894_v15, 0.0 }
 0x57d   : > { %5740 = vmatpush3.bf16.msra.mxu0 %v6205_v49 }
 0x57e   : > { %v2929_v45 = vpack.c.bf16 %v2914_v57, %v2913_v18  ;;  %5741 = vmatprep.subr.bf16.mxu0 %v8645_v50 }
 0x57f   : > { %v2836_v44 = vpop.f32.mrb[24].mxu1 }
 0x580   : > { %v2895_v46 = vadd.f32 %v2836_v44, %v7732_v28  ;;  %v7797_v55 = vpop.f32.mrb[25].mxu1  ;;  %5717 = vmatprep.mubr.msk.bf16.mxu0 %vm2714_vm4, %v2929_v45 }
 0x581   : > { %v2840_v2 = vpop.f32.mrb[26].mxu1  ;;  %5742 = vmatpush3.bf16.msra.mxu0 %v3316_v39 }
 0x582   : > { %v2896_v6 = vadd.f32 %v2840_v2, %v7732_v28  ;;  %v7801_v9 = vpop.f32.mrb[27].mxu1  ;;  %v2915_v12 = vmax.f32 %v2895_v46, 0.0 }
 0x584   : > { %v2916_v22 = vmax.f32 %v2896_v6, 0.0 }
 0x586   : > { %v2930_v7 = vpack.c.bf16 %v2916_v22, %v2915_v12 }
 0x587   : > { %v2846_v25 = vpop.f32.mrb[28].mxu1 }
 0x588   : > { %v2897_v34 = vadd.f32 %v2846_v25, %v7732_v28  ;;  %v7804_v41 = vpop.f32.mrb[29].mxu1  ;;  %5718 = vmatmul.mubr.msk.bf16.gmra.mrb[104].mxu0 %vm2714_vm4, %v2930_v7 }
 0x589   : > { %v2850_v42 = vpop.f32.mrb[30].mxu1 }
 0x58a   : > { %v2898_v27 = vadd.f32 %v2850_v42, %v7732_v28  ;;  %v7808_v49 = vpop.f32.mrb[31].mxu1  ;;  %v2917_v15 = vmax.f32 %v2897_v34, 0.0 }
 0x58c   : > { %v2918_v54 = vmax.f32 %v2898_v27, 0.0 }
 0x58e   : > { %v2931_v18 = vpack.c.bf16 %v2918_v54, %v2917_v15 }
 0x58f   : > { %v2856_v57 = vpop.f32.mrb[32].mxu1 }
 0x590   : > { %v2899_v45 = vadd.f32 %v2856_v57, %v7732_v28  ;;  %v7811_v39 = vpop.f32.mrb[33].mxu1  ;;  %5721 = vmatprep.mubr.msk.bf16.mxu0 %vm2714_vm4, %v2931_v18 }
 0x591   : > { %v2860_v44 = vpop.f32.mrb[34].mxu1 }
 0x592   : > { %v2900_v46 = vadd.f32 %v2860_v44, %v7732_v28  ;;  %v7815_v2 = vpop.f32.mrb[35].mxu1  ;;  %v2919_v6 = vmax.f32 %v2899_v45, 0.0 }
 0x594   : > { %v2920_v12 = vmax.f32 %v2900_v46, 0.0 }
 0x596   : > { %v2932_v22 = vpack.c.bf16 %v2920_v12, %v2919_v6 }
 0x597   : > { %v2866_v7 = vpop.f32.mrb[36].mxu1 }
 0x598   : > { %v2901_v25 = vadd.f32 %v2866_v7, %v7732_v28  ;;  %v7818_v34 = vpop.f32.mrb[37].mxu1  ;;  %5722 = vmatmul.mubr.msk.bf16.gmra.mrb[108].mxu0 %vm2714_vm4, %v2932_v22 }
 0x599   : > { %v2870_v42 = vpop.f32.mrb[38].mxu1 }
 0x59a   : > { %v2902_v27 = vadd.f32 %v2870_v42, %v7732_v28  ;;  %v7822_v15 = vpop.f32.mrb[39].mxu1  ;;  %v2921_v54 = vmax.f32 %v2901_v25, 0.0  ;;  %v6212_v25 = vld [vmem:[%s8629_s8 + $0xb0] sm:$0xff]  }
 0x59c   : > { %v2922_v18 = vmax.f32 %v2902_v27, 0.0  ;;  %v6213_v27 = vld [vmem:[%s8629_s8 + $0xb8] ss:$0 sps:$4 sm:$0x33]  }
 0x59e   : > { %v2933_v57 = vpack.c.bf16 %v2922_v18, %v2921_v54  ;;  %v3499_v54 = vsel %vm2745_vm3, %v6213_v27, 0 }
 0x59f   : > { %v2876_v44 = vpop.f32.mrb[40].mxu1 }
 0x5a0   : > { %v2903_v45 = vadd.f32 %v2876_v44, %v7732_v28  ;;  %v7825_v46 = vpop.f32.mrb[41].mxu1  ;;  %5725 = vmatprep.mubr.msk.bf16.mxu0 %vm2714_vm4, %v2933_v57 }
 0x5a1   : > { %v2880_v6 = vpop.f32.mrb[42].mxu1 }
 0x5a2   : > { %v2904_v12 = vadd.f32 %v2880_v6, %v7732_v28  ;;  %v7829_v7 = vpop.f32.mrb[43].mxu1  ;;  %v2923_v22 = vmax.f32 %v2903_v45, 0.0  ;;  %v6207_v28 = vld [vmem:[%s8629_s8 + $0x88] sm:$0xff]  }
 0x5a3   : > { %5747 = vmatprep.subr.bf16.mxu1 %v6207_v28 }
 0x5a4   : > { %v2924_v38 = vmax.f32 %v2904_v12, 0.0  ;;  %5748 = vmatpush3.bf16.msra.mxu1 %v6207_v28 }
 0x5a6   : > { %v2934_v42 = vpack.c.bf16 %v2924_v38, %v2923_v22  ;;  %v6208_v38 = vld [vmem:[%s8629_s8 + $0x90] sm:$0xff]  }
 0x5a7   : > { %5749 = vmatprep.subr.bf16.mxu1 %v6208_v38 }
 0x5a8   : > { %5726 = vmatmul.mubr.msk.bf16.gmra.mrb[112].mxu0 %vm2714_vm4, %v2934_v42  ;;  %5750 = vmatpush3.bf16.msra.mxu1 %v6208_v38 }
 0x5a9   : > { %5743 = vmatprep.mubr.msk.bf16.mxu0 %vm6615_vm2, %v8645_v50  ;;  %5751 = vmatprep.subr.bf16.mxu1 %v6209_v40 }
 0x5ac   : > { %5752 = vmatpush3.bf16.msra.mxu1 %v6209_v40 }
 0x5ad   : > { %5753 = vmatprep.subr.bf16.mxu1 %v6210_v32 }
 0x5b0   : > { %5744 = vmatmul.mubr.msk.bf16.vlgmr.msra.gmra.mrb[116].mxu0 %vm2714_vm4, %v3272_v56  ;;  %5754 = vmatpush3.bf16.msra.mxu1 %v6210_v32  ;;  %v6211_v56 = vld [vmem:[%s8629_s8 + $0xa8] sm:$0xff]  }
 0x5b1   : > { %4146 = vmatprep.mubr.bf16.mxu0 %v8647_v20  ;;  %5755 = vmatprep.subr.bf16.mxu1 %v6211_v56 }
 0x5b4   : > { %5756 = vmatpush3.bf16.msra.mxu1 %v6211_v56 }
 0x5b5   : > { %5757 = vmatprep.subr.bf16.mxu1 %v6212_v25 }
 0x5b8   : > { %5758 = vmatpush3.bf16.msra.mxu1 %v6212_v25 }
 0x5b9   : > { %5812 = vmatprep.subr.msk.bf16.mxu1 %vm2745_vm3, %v6213_v27 }
 0x5bc   : > { %5760 = vmatpush3.bf16.msra.mxu1 %v3499_v54 }
 0x5bd   : > { %4226 = vmatprep.subr.bf16.mxu1 %v8647_v20 }
 0x63b   : > { %v7863_v18 = vpop.f32.mrb[96].mxu0 }
 0x63c   : > { %v7865_v57 = vpop.f32.mrb[97].mxu0 }
 0x63d   : > { %v7867_v44 = vpop.f32.mrb[98].mxu0 }
 0x63e   : > { %8681 = vst [vmem:[#allocation24_spill] sm:$0xff] %v7867_v44  ;;  %v7869_v45 = vpop.f32.mrb[99].mxu0 }
 0x63f   : > { %8682 = vst [vmem:[#allocation25_spill] sm:$0xff] %v7869_v45 }
 0x64b   : > { %v7871_v6 = vpop.f32.mrb[100].mxu0 }
 0x64c   : > { %8683 = vst [vmem:[#allocation26_spill] sm:$0xff] %v7871_v6  ;;  %v7873_v12 = vpop.f32.mrb[101].mxu0 }
 0x64d   : > { %v7875_v22 = vpop.f32.mrb[102].mxu0 }
 0x64e   : > { %8684 = vst [vmem:[#allocation27_spill] sm:$0xff] %v7875_v22  ;;  %v7877_v42 = vpop.f32.mrb[103].mxu0 }
 0x64f   : > { %8685 = vst [vmem:[#allocation28_spill] sm:$0xff] %v7877_v42 }
 0x65b   : > { %v7879_v28 = vpop.f32.mrb[104].mxu0 }
 0x65c   : > { %8686 = vst [vmem:[#allocation29_spill] sm:$0xff] %v7879_v28  ;;  %v7881_v38 = vpop.f32.mrb[105].mxu0 }
 0x65d   : > { %8687 = vst [vmem:[#allocation30_spill] sm:$0xff] %v7881_v38  ;;  %v7883_v40 = vpop.f32.mrb[106].mxu0 }
 0x65e   : > { %8688 = vst [vmem:[#allocation31_spill] sm:$0xff] %v7883_v40  ;;  %v7885_v32 = vpop.f32.mrb[107].mxu0  ;;  %v7905_v40 = vld [vmem:[#allocation6 + $0x7] ss:$0 sm:$0xff] }
 0x65f   : > { %8689 = vst [vmem:[#allocation32_spill] sm:$0xff] %v7885_v32 }
 0x66b   : > { %v7887_v56 = vpop.f32.mrb[108].mxu0 }
 0x66c   : > { %8690 = vst [vmem:[#allocation33_spill] sm:$0xff] %v7887_v56  ;;  %v7889_v25 = vpop.f32.mrb[109].mxu0 }
 0x66d   : > { %8691 = vst [vmem:[#allocation34_spill] sm:$0xff] %v7889_v25  ;;  %v7891_v27 = vpop.f32.mrb[110].mxu0 }
 0x66e   : > { %8692 = vst [vmem:[#allocation35_spill] sm:$0xff] %v7891_v27  ;;  %v7893_v54 = vpop.f32.mrb[111].mxu0 }
 0x66f   : > { %8693 = vst [vmem:[#allocation36_spill] sm:$0xff] %v7893_v54 }
 0x67b   : > { %v7895_v50 = vpop.f32.mrb[112].mxu0 }
 0x67c   : > { %8694 = vst [vmem:[#allocation37_spill] sm:$0xff] %v7895_v50  ;;  %v7897_v20 = vpop.f32.mrb[113].mxu0 }
 0x67d   : > { %8695 = vst [vmem:[#allocation38_spill] sm:$0xff] %v7897_v20  ;;  %v7899_v63 = vpop.f32.mrb[114].mxu0 }
 0x67e   : > { %8696 = vst [vmem:[#allocation39_spill] sm:$0xff] %v7899_v63  ;;  %v7901_v62 = vpop.f32.mrb[115].mxu0 }
 0x67f   : > { %8697 = vst [vmem:[#allocation40_spill] sm:$0xff] %v7901_v62 }
 0x683   : > { %v7903_v61 = vpop.f32.mrb[116].mxu0 }
 0x684   : > { %v5745_v32 = vpop.f32.mrb[117].mxu0  ;;  %v3359_v56 = vadd.f32 %v7903_v61, %v7735_v3  ;;  %v3361_v27 = vadd.f32 %v7903_v61, %v7741_v33  ;;  %v3363_v50 = vadd.f32 %v7903_v61, %v7751_v23  ;;  %v3365_v20 = vadd.f32 %v7903_v61, %v7766_v30 }
 0x685   : > { %v3355_v63 = vpop.f32.mrb[118].mxu0  ;;  %v3367_v62 = vadd.f32 %v7903_v61, %v7781_v43  ;;  %v3369_v54 = vadd.f32 %v7903_v61, %v7797_v55  ;;  %v3371_v32 = vadd.f32 %v7903_v61, %v7804_v41  ;;  %v3373_v3 = vadd.f32 %v7903_v61, %v7811_v39 }
 0x686   : > { %v5746_v33 = vpop.f32.mrb[119].mxu0  ;;  %v3360_v22 = vadd.f32 %v3355_v63, %v7738_v37  ;;  %v3379_v23 = vadd.f32 %v3359_v56, %v7905_v40  ;;  %v3362_v30 = vadd.f32 %v3355_v63, %v7745_v5  ;;  %v3381_v42 = vadd.f32 %v3361_v27, %v7905_v40 }
 0x687   : > { %v3364_v43 = vadd.f32 %v3355_v63, %v7758_v47  ;;  %v3383_v45 = vadd.f32 %v3363_v50, %v7905_v40  ;;  %v3366_v55 = vadd.f32 %v3355_v63, %v7773_v13  ;;  %v3385_v41 = vadd.f32 %v3365_v20, %v7905_v40 }
 0x688   : > { %v3380_v44 = vadd.f32 %v3360_v22, %v7905_v40  ;;  %v3399_v39 = vmax.f32 %v3379_v23, 0.0  ;;  %v3382_v33 = vadd.f32 %v3362_v30, %v7905_v40  ;;  %v3401_v37 = vmax.f32 %v3381_v42, 0.0 }
 0x689   : > { %v3384_v56 = vadd.f32 %v3364_v43, %v7905_v40  ;;  %v3403_v25 = vmax.f32 %v3383_v45, 0.0  ;;  %v3386_v5 = vadd.f32 %v3366_v55, %v7905_v40  ;;  %v3405_v27 = vmax.f32 %v3385_v41, 0.0 }
 0x68a   : > { %v3400_v28 = vmax.f32 %v3380_v44, 0.0  ;;  %v3402_v47 = vmax.f32 %v3382_v33, 0.0  ;;  %v3368_v50 = vadd.f32 %v3355_v63, %v7788_v53  ;;  %v3387_v13 = vadd.f32 %v3367_v62, %v7905_v40 }
 0x68b   : > { %v3404_v38 = vmax.f32 %v3384_v56, 0.0  ;;  %v3406_v20 = vmax.f32 %v3386_v5, 0.0  ;;  %v3370_v22 = vadd.f32 %v3355_v63, %v7801_v9  ;;  %v3389_v23 = vadd.f32 %v3369_v54, %v7905_v40 }
 0x68c   : > { %v3419_v30 = vpack.c.bf16 %v3400_v28, %v3399_v39  ;;  %v3420_v42 = vpack.c.bf16 %v3402_v47, %v3401_v37  ;;  %v3388_v43 = vadd.f32 %v3368_v50, %v7905_v40  ;;  %v3407_v45 = vmax.f32 %v3387_v13, 0.0 }
 0x68d   : > { %v3421_v6 = vpack.c.bf16 %v3404_v38, %v3403_v25  ;;  %v3422_v55 = vpack.c.bf16 %v3406_v20, %v3405_v27  ;;  %v3390_v44 = vadd.f32 %v3370_v22, %v7905_v40  ;;  %v3409_v41 = vmax.f32 %v3389_v23, 0.0 }
 0x68e   : > { %5761 = vmatprep.mubr.msk.bf16.mxu1 %vm2714_vm4, %v3419_v30  ;;  %v3408_v53 = vmax.f32 %v3388_v43, 0.0  ;;  %v3372_v62 = vadd.f32 %v3355_v63, %v7808_v49  ;;  %v3391_v33 = vadd.f32 %v3371_v32, %v7905_v40  ;;  %v3374_v9 = vadd.f32 %v3355_v63, %v7815_v2 }
 0x68f   : > { %5762 = vmatmul.mubr.msk.bf16.vlgmr.msra.gmra.mrb[44].mxu1 %vm2714_vm4, %v3420_v42  ;;  %v3410_v28 = vmax.f32 %v3390_v44, 0.0  ;;  %v3393_v54 = vadd.f32 %v3373_v3, %v7905_v40  ;;  %v3375_v38 = vadd.f32 %v7903_v61, %v7818_v34  ;;  %v3376_v25 = vadd.f32 %v3355_v63, %v7822_v15  ;;  %v7971_v44 = vld [vmem:[#allocation6 + $0x53] ss:$0 sm:$0xff] }
 0x690   : > { %5765 = vmatprep.mubr.msk.bf16.mxu1 %vm2714_vm4, %v3421_v6  ;;  %v3423_v39 = vpack.c.bf16 %v3408_v53, %v3407_v45  ;;  %v3392_v37 = vadd.f32 %v3372_v62, %v7905_v40  ;;  %v3411_v49 = vmax.f32 %v3391_v33, 0.0  ;;  %v3394_v32 = vadd.f32 %v3374_v9, %v7905_v40 }
 0x691   : > { %v3424_v56 = vpack.c.bf16 %v3410_v28, %v3409_v41  ;;  %v3413_v2 = vmax.f32 %v3393_v54, 0.0  ;;  %v3395_v5 = vadd.f32 %v3375_v38, %v7905_v40  ;;  %v3396_v27 = vadd.f32 %v3376_v25, %v7905_v40 }
 0x692   : > { %v3412_v3 = vmax.f32 %v3392_v37, 0.0  ;;  %v3414_v47 = vmax.f32 %v3394_v32, 0.0  ;;  %v3377_v34 = vadd.f32 %v7903_v61, %v7825_v46  ;;  %v3378_v15 = vadd.f32 %v3355_v63, %v7829_v7  ;;  %v7967_v63 = vld [vmem:[#allocation6 + $0x28] ss:$0 sm:$0xff] }
 0x693   : > { %v3415_v6 = vmax.f32 %v3395_v5, 0.0  ;;  %v3416_v50 = vmax.f32 %v3396_v27, 0.0 }
 0x694   : > { %v3425_v13 = vpack.c.bf16 %v3412_v3, %v3411_v49  ;;  %v3426_v20 = vpack.c.bf16 %v3414_v47, %v3413_v2  ;;  %v3397_v22 = vadd.f32 %v3377_v34, %v7905_v40  ;;  %v3398_v23 = vadd.f32 %v3378_v15, %v7905_v40 }
 0x695   : > { %v3427_v30 = vpack.c.bf16 %v3416_v50, %v3415_v6 }
 0x696   : > { %v3417_v42 = vmax.f32 %v3397_v22, 0.0  ;;  %v3418_v43 = vmax.f32 %v3398_v23, 0.0 }
 0x697   : > { %5766 = vmatmul.mubr.msk.bf16.gmra.mrb[48].mxu1 %vm2714_vm4, %v3422_v55 }
 0x698   : > { %5769 = vmatprep.mubr.msk.bf16.mxu1 %vm2714_vm4, %v3423_v39  ;;  %v3428_v45 = vpack.c.bf16 %v3418_v43, %v3417_v42 }
 0x69f   : > { %5770 = vmatmul.mubr.msk.bf16.gmra.mrb[52].mxu1 %vm2714_vm4, %v3424_v56 }
 0x6a0   : > { %5773 = vmatprep.mubr.msk.bf16.mxu1 %vm2714_vm4, %v3425_v13 }
 0x6a7   : > { %5774 = vmatmul.mubr.msk.bf16.gmra.mrb[56].mxu1 %vm2714_vm4, %v3426_v20 }
 0x6a8   : > { %5777 = vmatprep.mubr.msk.bf16.mxu1 %vm2714_vm4, %v3427_v30 }
 0x6af   : > { %5778 = vmatmul.mubr.msk.bf16.gmra.mrb[60].mxu1 %vm2714_vm4, %v3428_v45 }
 0x762   : > { %v5763_v61 = vpop.f32.mrb[44].mxu1 }
 0x763   : > { %v3544_v46 = vadd.f32 %v5763_v61, %v7967_v63  ;;  %v3535_v7 = vpop.f32.mrb[45].mxu1 }
 0x764   : > { %v3536_v40 = vadd.f32 %v3535_v7, %v7967_v63  ;;  %v5764_v55 = vpop.f32.mrb[46].mxu1 }
 0x765   : > { %v3616_v41 = vmax.f32 %v3544_v46, 0.0  ;;  %v3547_v53 = vadd.f32 %v5764_v55, %v7967_v63  ;;  %v3538_v62 = vpop.f32.mrb[47].mxu1 }
 0x766   : > { %v3614_v33 = vmax.f32 %v3536_v40, 0.0  ;;  %v3539_v9 = vadd.f32 %v3538_v62, %v7967_v63 }
 0x767   : > { %v3636_v28 = vmul.f32 %v3616_v41, %v7971_v44  ;;  %v3617_v38 = vmax.f32 %v3547_v53, 0.0 }
 0x768   : > { %v3615_v54 = vmax.f32 %v3539_v9, 0.0  ;;  %v3634_v39 = vmul.f32 %v3614_v33, %v7971_v44 }
 0x769   : > { %v3660_v25 = vsel %vm2714_vm4, %v3636_v28, 0.0  ;;  %v3637_v6 = vmul.f32 %v3617_v38, %v7971_v44 }
 0x76a   : > { %3661 = vadd.xlane.f32.xlu0 %v3660_v25  ;;  %v5767_v37 = vpop.f32.mrb[48].mxu1  ;;  %v3635_v49 = vmul.f32 %v3615_v54, %v7971_v44  ;;  %v3654_v15 = vsel %vm2714_vm4, %v3634_v39, 0.0 }
 0x76b   : > { %v3560_v32 = vadd.f32 %v5767_v37, %v7967_v63  ;;  %v3551_v56 = vpop.f32.mrb[49].mxu1  ;;  %v3663_v43 = vsel %vm2714_vm4, %v3637_v6, 0.0 }
 0x76c   : > { %v3552_v2 = vadd.f32 %v3551_v56, %v7967_v63  ;;  %v5768_v5 = vpop.f32.mrb[50].mxu1  ;;  %v3657_v27 = vsel %vm2714_vm4, %v3635_v49, 0.0 }
 0x76d   : > { %v3620_v3 = vmax.f32 %v3560_v32, 0.0  ;;  %v3563_v47 = vadd.f32 %v5768_v5, %v7967_v63  ;;  %v3554_v34 = vpop.f32.mrb[51].mxu1  ;;  %3658 = vadd.xlane.f32.xlu1 %v3657_v27 }
 0x76e   : > { %v3618_v50 = vmax.f32 %v3552_v2, 0.0  ;;  %v3555_v13 = vadd.f32 %v3554_v34, %v7967_v63  ;;  %3655 = vadd.xlane.f32.xlu0 %v3654_v15 }
 0x76f   : > { %v3621_v20 = vmax.f32 %v3563_v47, 0.0  ;;  %v3640_v22 = vmul.f32 %v3620_v3, %v7971_v44 }
 0x770   : > { %v3638_v23 = vmul.f32 %v3618_v50, %v7971_v44  ;;  %v3619_v30 = vmax.f32 %v3555_v13, 0.0 }
 0x771   : > { %v3672_v42 = vsel %vm2714_vm4, %v3640_v22, 0.0  ;;  %v3641_v45 = vmul.f32 %v3621_v20, %v7971_v44 }
 0x772   : > { %v5771_v61 = vpop.f32.mrb[52].mxu1  ;;  %3673 = vadd.xlane.f32.xlu1 %v3672_v42  ;;  %3664 = vadd.xlane.f32.xlu0 %v3663_v43  ;;  %v3666_v41 = vsel %vm2714_vm4, %v3638_v23, 0.0  ;;  %v3639_v28 = vmul.f32 %v3619_v30, %v7971_v44 }
 0x773   : > { %v3576_v46 = vadd.f32 %v5771_v61, %v7967_v63  ;;  %v3567_v7 = vpop.f32.mrb[53].mxu1  ;;  %v3675_v9 = vsel %vm2714_vm4, %v3641_v45, 0.0 }
 0x774   : > { %v3568_v40 = vadd.f32 %v3567_v7, %v7967_v63  ;;  %v5772_v55 = vpop.f32.mrb[54].mxu1  ;;  %v3669_v32 = vsel %vm2714_vm4, %v3639_v28, 0.0 }
 0x775   : > { %v3624_v53 = vmax.f32 %v3576_v46, 0.0  ;;  %v3579_v62 = vadd.f32 %v5772_v55, %v7967_v63  ;;  %v3570_v33 = vpop.f32.mrb[55].mxu1 }
 0x776   : > { %v3622_v54 = vmax.f32 %v3568_v40, 0.0  ;;  %v3571_v38 = vadd.f32 %v3570_v33, %v7967_v63  ;;  %3667 = vadd.xlane.f32.xlu1 %v3666_v41  ;;  %3676 = vadd.xlane.f32.xlu0 %v3675_v9 }
 0x777   : > { %v3625_v25 = vmax.f32 %v3579_v62, 0.0  ;;  %v3644_v39 = vmul.f32 %v3624_v53, %v7971_v44 }
 0x778   : > { %v3623_v37 = vmax.f32 %v3571_v38, 0.0  ;;  %v3642_v56 = vmul.f32 %v3622_v54, %v7971_v44 }
 0x779   : > { %v3684_v49 = vsel %vm2714_vm4, %v3644_v39, 0.0  ;;  %v3645_v2 = vmul.f32 %v3625_v25, %v7971_v44 }
 0x77a   : > { %v5775_v5 = vpop.f32.mrb[56].mxu1  ;;  %3685 = vadd.xlane.f32.xlu1 %v3684_v49  ;;  %3670 = vadd.xlane.f32.xlu0 %v3669_v32  ;;  %v3643_v15 = vmul.f32 %v3623_v37, %v7971_v44  ;;  %v3678_v20 = vsel %vm2714_vm4, %v3642_v56, 0.0 }
 0x77b   : > { %v3592_v27 = vadd.f32 %v5775_v5, %v7967_v63  ;;  %v3583_v3 = vpop.f32.mrb[57].mxu1  ;;  %v3687_v22 = vsel %vm2714_vm4, %v3645_v2, 0.0 }
 0x77c   : > { %v3584_v47 = vadd.f32 %v3583_v3, %v7967_v63  ;;  %v5776_v34 = vpop.f32.mrb[58].mxu1  ;;  %v3681_v45 = vsel %vm2714_vm4, %v3643_v15, 0.0 }
 0x77d   : > { %v3628_v6 = vmax.f32 %v3592_v27, 0.0  ;;  %v3595_v50 = vadd.f32 %v5776_v34, %v7967_v63  ;;  %v3586_v13 = vpop.f32.mrb[59].mxu1 }
 0x77e   : > { %v3626_v23 = vmax.f32 %v3584_v47, 0.0  ;;  %v3587_v30 = vadd.f32 %v3586_v13, %v7967_v63  ;;  %3679 = vadd.xlane.f32.xlu1 %v3678_v20  ;;  %3688 = vadd.xlane.f32.xlu0 %v3687_v22 }
 0x77f   : > { %v3629_v42 = vmax.f32 %v3595_v50, 0.0  ;;  %v3648_v43 = vmul.f32 %v3628_v6, %v7971_v44 }
 0x780   : > { %v3627_v61 = vmax.f32 %v3587_v30, 0.0  ;;  %v3646_v7 = vmul.f32 %v3626_v23, %v7971_v44  ;;  %v8031_v30 = vld [vmem:[#allocation6 + $0x29] ss:$0 sm:$0xff] }
 0x781   : > { %v3696_v46 = vsel %vm2714_vm4, %v3648_v43, 0.0  ;;  %v3649_v40 = vmul.f32 %v3629_v42, %v7971_v44 }
 0x782   : > { %3697 = vadd.xlane.f32.xlu1 %v3696_v46  ;;  %3682 = vadd.xlane.f32.xlu0 %v3681_v45  ;;  %v5779_v55 = vpop.f32.mrb[60].mxu1  ;;  %v3690_v54 = vsel %vm2714_vm4, %v3646_v7, 0.0  ;;  %v3647_v25 = vmul.f32 %v3627_v61, %v7971_v44 }
 0x783   : > { %v3608_v41 = vadd.f32 %v5779_v55, %v7967_v63  ;;  %v3599_v53 = vpop.f32.mrb[61].mxu1  ;;  %v3699_v38 = vsel %vm2714_vm4, %v3649_v40, 0.0 }
 0x784   : > { %v3600_v62 = vadd.f32 %v3599_v53, %v7967_v63  ;;  %v5780_v33 = vpop.f32.mrb[62].mxu1  ;;  %v3693_v5 = vsel %vm2714_vm4, %v3647_v25, 0.0 }
 0x785   : > { %v3611_v9 = vadd.f32 %v5780_v33, %v7967_v63  ;;  %v3602_v28 = vpop.f32.mrb[63].mxu1  ;;  %v3632_v39 = vmax.f32 %v3608_v41, 0.0 }
 0x786   : > { %v3630_v37 = vmax.f32 %v3600_v62, 0.0  ;;  %v3603_v49 = vadd.f32 %v3602_v28, %v7967_v63  ;;  %3691 = vadd.xlane.f32.xlu1 %v3690_v54  ;;  %3700 = vadd.xlane.f32.xlu0 %v3699_v38 }
 0x787   : > { %v3633_v2 = vmax.f32 %v3611_v9, 0.0  ;;  %v3652_v47 = vmul.f32 %v3632_v39, %v7971_v44 }
 0x788   : > { %v3631_v32 = vmax.f32 %v3603_v49, 0.0  ;;  %v3650_v56 = vmul.f32 %v3630_v37, %v7971_v44 }
 0x789   : > { %v3653_v63 = vmul.f32 %v3633_v2, %v7971_v44  ;;  %v3708_v15 = vsel %vm2714_vm4, %v3652_v47, 0.0 }
 0x78a   : > { %3694 = vadd.xlane.f32.xlu0 %v3693_v5  ;;  %v3702_v27 = vsel %vm2714_vm4, %v3650_v56, 0.0  ;;  %v3651_v3 = vmul.f32 %v3631_v32, %v7971_v44 }
 0x78b   : > { %3703 = vadd.xlane.f32.xlu1 %v3702_v27  ;;  %v3711_v6 = vsel %vm2714_vm4, %v3653_v63, 0.0 }
 0x78c   : > { %v3705_v34 = vsel %vm2714_vm4, %v3651_v3, 0.0 }
 0x78e   : > { %3706 = vadd.xlane.f32.xlu0 %v3705_v34 }
 0x78f   : > { %3709 = vadd.xlane.f32.xlu1 %v3708_v15 }
 0x792   : > { %3712 = vadd.xlane.f32.xlu0 %v3711_v6 }
 0x7f7   : > { %v3662_v50 = vpop.xlane.xlu0 %3661 }
 0x7f8   : > { %v3716_v44 = vadd.f32 %v3662_v50, %v8031_v30 }
 0x7fa   : > { %v3659_v13 = vpop.xlane.xlu1 %3658  ;;  %v8042_v41 = vsel %vm3736_vm6, %v3716_v44, -1e+30  ;;  %vm3744_vm6 = vcmp.gt.f32.partialorder %v7525_v48, 0.0 }
 0x7fb   : > { %v3656_v20 = vpop.xlane.xlu0 %3655  ;;  %v3715_v53 = vadd.f32 %v3659_v13, %v8031_v30 }
 0x7fc   : > { %v3714_v42 = vadd.f32 %v3656_v20, %v8031_v30 }
 0x7fd   : > { %v8057_v37 = vsel %vm3735_vm10, %v3715_v53, -1e+30  ;;  %vm3748_vm10 = vcmp.gt.f32.partialorder %v7566_v58, 0.0 }
 0x7fe   : > { %v8037_v46 = vsel %vm3734_vm0, %v3714_v42, -1e+30  ;;  %vm3743_vm0 = vcmp.gt.f32.partialorder %v7518_v35, 0.0 }
 0x7ff   : > { %v3674_v22 = vpop.xlane.xlu1 %3673  ;;  %v3665_v23 = vpop.xlane.xlu0 %3664  ;;  %v3774_v9 = vmax.f32 %v8037_v46, %v8042_v41 }
 0x800   : > { %v3717_v7 = vadd.f32 %v3665_v23, %v8031_v30  ;;  %v3720_v28 = vadd.f32 %v3674_v22, %v8031_v30 }
 0x802   : > { %v8052_v54 = vsel %vm3737_vm8, %v3717_v7, -1e+30  ;;  %v8066_v2 = vsel %vm3740_vm12, %v3720_v28, -1e+30  ;;  %vm3745_vm8 = vcmp.gt.f32.partialorder %v7528_v51, 0.0  ;;  %vm3750_vm12 = vcmp.gt.f32.partialorder %v7573_v14, 0.0 }
 0x803   : > { %v3668_v43 = vpop.xlane.xlu1 %3667  ;;  %v3677_v45 = vpop.xlane.xlu0 %3676  ;;  %v3775_v56 = vmax.f32 %v8057_v37, %v8052_v54 }
 0x804   : > { %v3718_v61 = vadd.f32 %v3668_v43, %v8031_v30  ;;  %v3721_v5 = vadd.f32 %v3677_v45, %v8031_v30 }
 0x806   : > { %v8045_v62 = vsel %vm3738_vm7, %v3718_v61, -1e+30  ;;  %v8078_v13 = vsel %vm3741_vm1, %v3721_v5, -1e+30  ;;  %vm3746_vm7 = vcmp.gt.f32.partialorder %v7534_v19, 0.0  ;;  %vm3751_vm1 = vcmp.gt.f32.partialorder %v7592_v0, 0.0 }
 0x807   : > { %v3686_v40 = vpop.xlane.xlu1 %3685  ;;  %v3671_v55 = vpop.xlane.xlu0 %3670  ;;  %v3776_v38 = vmax.f32 %v3774_v9, %v8045_v62 }
 0x808   : > { %v3719_v33 = vadd.f32 %v3671_v55, %v8031_v30  ;;  %v3724_v15 = vadd.f32 %v3686_v40, %v8031_v30 }
 0x809   : > { %v3778_v47 = vmax.f32 %v3776_v38, %v8066_v2 }
 0x80a   : > { %v8059_v49 = vsel %vm3739_vm11, %v3719_v33, -1e+30  ;;  %v8084_v43 = vsel %vm3744_vm6, %v3724_v15, -1e+30  ;;  %vm3747_vm11 = vcmp.gt.f32.partialorder %v7537_v52, 0.0  ;;  %vm3753_vm6 = vcmp.gt.f32.partialorder %v7600_v1, 0.0 }
 0x80b   : > { %v3680_v25 = vpop.xlane.xlu1 %3679  ;;  %v3689_v39 = vpop.xlane.xlu0 %3688  ;;  %v3777_v3 = vmax.f32 %v3775_v56, %v8059_v49 }
 0x80c   : > { %v3722_v32 = vadd.f32 %v3680_v25, %v8031_v30  ;;  %v3725_v45 = vadd.f32 %v3689_v39, %v8031_v30 }
 0x80d   : > { %v3779_v22 = vmax.f32 %v3777_v3, %v8078_v13 }
 0x80e   : > { %v8069_v27 = vsel %vm3742_vm15, %v3722_v32, -1e+30  ;;  %v8096_v9 = vsel %vm3745_vm8, %v3725_v45, -1e+30  ;;  %vm3749_vm15 = vcmp.gt.f32.partialorder %v7576_v16, 0.0 }
 0x80f   : > { %v3698_v34 = vpop.xlane.xlu1 %3697  ;;  %v3683_v63 = vpop.xlane.xlu0 %3682  ;;  %v3780_v50 = vmax.f32 %v3778_v47, %v8069_v27 }
 0x810   : > { %v3723_v6 = vadd.f32 %v3683_v63, %v8031_v30  ;;  %v3728_v61 = vadd.f32 %v3698_v34, %v8031_v30 }
 0x811   : > { %v3782_v40 = vmax.f32 %v3780_v50, %v8084_v43 }
 0x812   : > { %v8080_v20 = vsel %vm3743_vm0, %v3723_v6, -1e+30  ;;  %v8101_v39 = vsel %vm3748_vm10, %v3728_v61, -1e+30  ;;  %vm3752_vm0 = vcmp.gt.f32.partialorder %v7586_v21, 0.0  ;;  %vm4356_vm10 = vcmp.lt.f32.partialorder %v7589_v29, 0.5 }
 0x813   : > { %v3692_v23 = vpop.xlane.xlu1 %3691  ;;  %v3701_v42 = vpop.xlane.xlu0 %3700  ;;  %v3781_v7 = vmax.f32 %v3779_v22, %v8080_v20  ;;  %v6219_v29 = vld [vmem:[%s8627_s6 + $0x24] ss:$8 sps:$4 sm:$0xff]  }
 0x814   : > { %v3726_v44 = vadd.f32 %v3692_v23, %v8031_v30  ;;  %v3729_v28 = vadd.f32 %v3701_v42, %v8031_v30 }
 0x815   : > { %v3783_v32 = vmax.f32 %v3781_v7, %v8096_v9 }
 0x816   : > { %v8092_v55 = vsel %vm3746_vm7, %v3726_v44, -1e+30  ;;  %v8114_v15 = vsel %vm3749_vm15, %v3729_v28, -1e+30 }
 0x817   : > { %v3784_v53 = vmax.f32 %v3782_v40, %v8092_v55  ;;  %v3695_v33 = vpop.xlane.xlu0 %3694 }
 0x818   : > { %v3727_v38 = vadd.f32 %v3695_v33, %v8031_v30  ;;  %v3704_v25 = vpop.xlane.xlu1 %3703 }
 0x819   : > { %v3730_v56 = vadd.f32 %v3704_v25, %v8031_v30  ;;  %v3786_v3 = vmax.f32 %v3784_v53, %v8101_v39 }
 0x81a   : > { %v8106_v5 = vsel %vm3747_vm11, %v3727_v38, -1e+30 }
 0x81b   : > { %v3785_v47 = vmax.f32 %v3783_v32, %v8106_v5  ;;  %v8112_v34 = vsel %vm3750_vm12, %v3730_v56, -1e+30  ;;  %v3707_v63 = vpop.xlane.xlu0 %3706  ;;  %vm4056_vm12 = vcmask 441344  }
 0x81c   : > { %v3731_v6 = vadd.f32 %v3707_v63, %v8031_v30  ;;  %v3710_v50 = vpop.xlane.xlu1 %3709  ;;  %v3788_v42 = vmax.f32 %v3786_v3, %v8112_v34 }
 0x81d   : > { %v3787_v22 = vmax.f32 %v3785_v47, %v8114_v15  ;;  %v3732_v23 = vadd.f32 %v3710_v50, %v8031_v30 }
 0x81e   : > { %v8121_v45 = vsel %vm3751_vm1, %v3731_v6, -1e+30 }
 0x81f   : > { %v3772_v44 = vsel %vm3752_vm0, %v3732_v23, -1e+30  ;;  %v3713_v61 = vpop.xlane.xlu0 %3712  ;;  %v3789_v53 = vmax.f32 %v3787_v22, %v8121_v45 }
 0x820   : > { %v3790_v7 = vmax.f32 %v3788_v42, %v3772_v44  ;;  %v3733_v40 = vadd.f32 %v3713_v61, %v8031_v30 }
 0x822   : > { %v8127_v33 = vsel %vm3753_vm6, %v3733_v40, -1e+30  ;;  %v3796_v28 = vsub.f32 %v8045_v62, %v3790_v7  ;;  %v3792_v38 = vsub.f32 %v8037_v46, %v3790_v7  ;;  %v3798_v32 = vsub.f32 %v8066_v2, %v3790_v7 }
 0x823   : > { %v8132_v25 = vmax.f32 %v3789_v53, %v8127_v33  ;;  %v3794_v56 = vsub.f32 %v8042_v41, %v3790_v7  ;;  %v3800_v30 = vsub.f32 %v8069_v27, %v3790_v7  ;;  %v3802_v46 = vsub.f32 %v8084_v43, %v3790_v7 }
 0x824   : > { %v3820_v3 = vmul.f32 1.442695, %v3796_v28  ;;  %v3812_v47 = vmul.f32 1.442695, %v3792_v38  ;;  %v3824_v63 = vmul.f32 1.442695, %v3798_v32  ;;  %v3804_v27 = vsub.f32 %v8092_v55, %v3790_v7 }
 0x825   : > { %v3795_v6 = vsub.f32 %v8052_v54, %v8132_v25  ;;  %v3816_v50 = vmul.f32 1.442695, %v3794_v56  ;;  %v3828_v62 = vmul.f32 1.442695, %v3800_v30  ;;  %v3797_v22 = vsub.f32 %v8059_v49, %v8132_v25 }
 0x826   : > { %6359 = vpow2.f32 %v3820_v3  ;;  %v3793_v41 = vsub.f32 %v8057_v37, %v8132_v25  ;;  %v3832_v23 = vmul.f32 1.442695, %v3802_v46  ;;  %v3799_v54 = vsub.f32 %v8078_v13, %v8132_v25 }
 0x827   : > { %6361 = vpow2.f32 %v3812_v47  ;;  %v3818_v2 = vmul.f32 1.442695, %v3795_v6  ;;  %v3822_v42 = vmul.f32 1.442695, %v3797_v22  ;;  %v3806_v43 = vsub.f32 %v8101_v39, %v3790_v7 }
 0x828   : > { %6363 = vpow2.f32 %v3824_v63  ;;  %v3814_v61 = vmul.f32 1.442695, %v3793_v41  ;;  %v3801_v49 = vsub.f32 %v8080_v20, %v8132_v25  ;;  %v3836_v40 = vmul.f32 1.442695, %v3804_v27 }
 0x829   : > { %6365 = vpow2.f32 %v3816_v50  ;;  %v3808_v53 = vsub.f32 %v8112_v34, %v3790_v7  ;;  %v3826_v37 = vmul.f32 1.442695, %v3799_v54  ;;  %v3803_v55 = vsub.f32 %v8096_v9, %v8132_v25 }
 0x82a   : > { %6367 = vpow2.f32 %v3828_v62  ;;  %v3810_v38 = vsub.f32 %v3772_v44, %v3790_v7  ;;  %v3840_v13 = vmul.f32 1.442695, %v3806_v43  ;;  %v3805_v39 = vsub.f32 %v8106_v5, %v8132_v25 }
 0x82b   : > { %6369 = vpow2.f32 %v3818_v2  ;;  %v3830_v20 = vmul.f32 1.442695, %v3801_v49  ;;  %v3844_v34 = vmul.f32 1.442695, %v3808_v53  ;;  %v3834_v9 = vmul.f32 1.442695, %v3803_v55 }
 0x82c   : > { %6371 = vpow2.f32 %v3832_v23  ;;  %v3807_v44 = vsub.f32 %v8114_v15, %v8132_v25  ;;  %v3848_v30 = vmul.f32 1.442695, %v3810_v38  ;;  %v3838_v5 = vmul.f32 1.442695, %v3805_v39 }
 0x82d   : > { %6373 = vpow2.f32 %v3822_v42  ;;  %v3811_v62 = vsub.f32 %v8127_v33, %v8132_v25 }
 0x82e   : > { %6375 = vpow2.f32 %v3814_v61  ;;  %v3842_v15 = vmul.f32 1.442695, %v3807_v44 }
 0x82f   : > { %6377 = vpow2.f32 %v3836_v40  ;;  %v3850_v33 = vmul.f32 1.442695, %v3811_v62 }
 0x830   : > { %v6360_v28 = vpop.eup %6359  ;;  %6379 = vpow2.f32 %v3826_v37 }
 0x831   : > { %v6362_v32 = vpop.eup %6361  ;;  %v3856_v56 = vmul.f32 %v6360_v28, %v7493_v11  ;;  %6381 = vpow2.f32 %v3840_v13 }
 0x832   : > { %v3852_v3 = vmul.f32 %v6362_v32, %v7465_v36  ;;  %v6364_v47 = vpop.eup %6363  ;;  %6383 = vpow2.f32 %v3830_v20  ;;  %v3809_v36 = vsub.f32 %v8121_v45, %v8132_v25 }
 0x833   : > { %3912 = vperm.xlu0 %5957, %v3856_v56   ;;  %v6366_v7 = vpop.eup %6365  ;;  %v3858_v11 = vmul.f32 %v6364_v47, %v7507_v8  ;;  %6385 = vpow2.f32 %v3844_v34 }
 0x834   : > { %3892 = vperm.xlu1 %5951, %v3852_v3   ;;  %v3854_v63 = vmul.f32 %v6366_v7, %v7479_v4  ;;  %v6368_v6 = vpop.eup %6367  ;;  %6387 = vpow2.f32 %v3834_v9  ;;  %v3846_v2 = vmul.f32 1.442695, %v3809_v36 }
 0x835   : > { %v6370_v50 = vpop.eup %6369  ;;  %6389 = vpow2.f32 %v3848_v30  ;;  %v3860_v4 = vmul.f32 %v6368_v6, %v7515_v31 }
 0x836   : > { %v3872_v46 = vadd.f32 %v3854_v63, %v3852_v3  ;;  %v6372_v22 = vpop.eup %6371  ;;  %6391 = vpow2.f32 %v3838_v5  ;;  %v3855_v45 = vmul.f32 %v6370_v50, %v7485_v10  ;;  %v6214_v50 = vld [vmem:[%s8627_s6 + $0x10] ss:$8 sps:$4 sm:$0xff]  }
 0x837   : > { %3922 = vperm.xlu0 %5957, %v3858_v11   ;;  %v6374_v41 = vpop.eup %6373  ;;  %6393 = vpow2.f32 %v3842_v15  ;;  %v3862_v61 = vmul.f32 %v6372_v22, %v7525_v48  ;;  %v6217_v15 = vld [vmem:[%s8627_s6 + $0x20] ss:$8 sps:$4 sm:$0xff]   ;;  %v8205_v22 = vld [vmem:[#allocation6 + $0x3] ss:$0 sm:$0xff] }
 0x838   : > { %3902 = vperm.xlu1 %5951, %v3854_v63   ;;  %v3874_v8 = vadd.f32 %v3872_v46, %v3856_v56  ;;  %v6376_v27 = vpop.eup %6375  ;;  %6395 = vpow2.f32 %v3846_v2  ;;  %v3857_v49 = vmul.f32 %v6374_v41, %v7499_v17  ;;  %v6216_v46 = vld [vmem:[%s8627_s6 + $0x14] ss:$8 sps:$4 sm:$0xff]   ;;  %v3042_v2 = vadd.f32 %v7865_v57, %v8205_v22  ;;  %v8702_v57 = vld [vmem:[#allocation29_spill] sm:$0xff] }
 0x839   : > { %v6378_v54 = vpop.eup %6377  ;;  %v3853_v42 = vmul.f32 %v6376_v27, %v7462_v60  ;;  %6397 = vpow2.f32 %v3850_v33  ;;  %4114 = vmatprep.subr.bf16.mxu0 %v6216_v46  ;;  %v3058_v27 = vadd.f32 %v7873_v12, %v8205_v22  ;;  %v8710_v46 = vld [vmem:[#allocation31_spill] sm:$0xff] }
 0x83a   : > { %v3876_v23 = vadd.f32 %v3874_v8, %v3858_v11  ;;  %v6380_v43 = vpop.eup %6379  ;;  %v3864_v37 = vmul.f32 %v6378_v54, %v7534_v19  ;;  %4115 = vmatpush1.bf16.msra.mxu0 %v6214_v50 }
 0x83b   : > { %3932 = vperm.xlu0 %5957, %v3860_v4   ;;  %v6382_v31 = vpop.eup %6381  ;;  %v3873_v40 = vadd.f32 %v3855_v45, %v3853_v42  ;;  %v3859_v28 = vmul.f32 %v6380_v43, %v7510_v26  ;;  %4116 = vmatprep.subr.bf16.mxu0 %v6219_v29  ;;  %v3085_v29 = vadd.f32 %v8710_v46, %v8205_v22  ;;  %v8295_v46 = vld [vmem:[%s7332_s22] sm:$0xff] }
 0x83c   : > { %3907 = vperm.xlu1 %5951, %v3855_v45   ;;  %v3878_v25 = vadd.f32 %v3876_v23, %v3860_v4  ;;  %v6384_v53 = vpop.eup %6383  ;;  %v3866_v48 = vmul.f32 %v6382_v31, %v7566_v58  ;;  %v3050_v4 = vadd.f32 %v7863_v18, %v8205_v22 }
 0x83d   : > { %v6386_v55 = vpop.eup %6385  ;;  %v3875_v60 = vadd.f32 %v3873_v40, %v3857_v49  ;;  %v3861_v32 = vmul.f32 %v6384_v53, %v7518_v35 }
 0x83e   : > { %v3880_v10 = vadd.f32 %v3878_v25, %v3862_v61  ;;  %v6388_v38 = vpop.eup %6387  ;;  %v3868_v3 = vmul.f32 %v6386_v55, %v7573_v14  ;;  %4117 = vmatpush1.bf16.msra.mxu0 %v6217_v15 }
 0x83f   : > { %3942 = vperm.xlu0 %5957, %v3862_v61   ;;  %v6390_v39 = vpop.eup %6389  ;;  %v3877_v17 = vadd.f32 %v3875_v60, %v3859_v28  ;;  %v3863_v34 = vmul.f32 %v6388_v38, %v7528_v51 }
 0x840   : > { %3917 = vperm.xlu1 %5951, %v3857_v49   ;;  %v3882_v13 = vadd.f32 %v3880_v10, %v3864_v37  ;;  %v6392_v56 = vpop.eup %6391  ;;  %v3870_v47 = vmul.f32 %v6390_v39, %v7586_v21  ;;  %v8701_v49 = vld [vmem:[#allocation30_spill] sm:$0xff]  ;;  %v3082_v10 = vadd.f32 %v8702_v57, %v8205_v22 }
 0x841   : > { %v3879_v19 = vadd.f32 %v3877_v17, %v3861_v32  ;;  %v6394_v26 = vpop.eup %6393  ;;  %v3865_v58 = vmul.f32 %v6392_v56, %v7537_v52  ;;  %v3074_v18 = vadd.f32 %v8701_v49, %v8205_v22 }
 0x842   : > { %v3884_v20 = vadd.f32 %v3882_v13, %v3866_v48  ;;  %v6396_v7 = vpop.eup %6395  ;;  %v3867_v5 = vmul.f32 %v6394_v26, %v7576_v16  ;;  %v8698_v16 = vmov 0   ;;  %v8703_v13 = vld [vmem:[#allocation34_spill] sm:$0xff] }
 0x843   : > { %3952 = vperm.xlu0 %5957, %v3864_v37   ;;  %v3881_v44 = vadd.f32 %v3879_v19, %v3863_v34  ;;  %v3869_v14 = vmul.f32 %v6396_v7, %v7592_v0  ;;  %v6398_v63 = vpop.eup %6397  ;;  %v4359_v0 = vsel %vm4356_vm10, 1, %v8698_v16  ;;  %v8705_v19 = vld [vmem:[#allocation25_spill] sm:$0xff] }
 0x844   : > { %3927 = vperm.xlu1 %5951, %v3859_v28   ;;  %v3886_v9 = vadd.f32 %v3884_v20, %v3868_v3  ;;  %v3871_v36 = vmul.f32 %v6398_v63, %v7600_v1  ;;  %v8699_v1 = vpack.i.bf16 %v7556_v24, %v7554_v59  ;;  %v6222_v59 = vld [vmem:[%s8627_s6 + $0x34] ss:$8 sps:$4 sm:$0xff]   ;;  %v6220_v24 = vld [vmem:[%s8627_s6 + $0x30] ss:$8 sps:$4 sm:$0xff]   ;;  %v8704_v20 = vld [vmem:[#allocation24_spill] sm:$0xff] }
 0x845   : > { %v3883_v30 = vadd.f32 %v3881_v44, %v3865_v58  ;;  %4118 = vmatprep.subr.bf16.mxu0 %v6222_v59 }
 0x846   : > { %v3888_v35 = vadd.f32 %v3886_v9, %v3870_v47  ;;  %4119 = vmatpush1.bf16.msra.mxu0 %v6220_v24  ;;  %v8706_v9 = vld [vmem:[#allocation28_spill] sm:$0xff] }
 0x847   : > { %3897 = vperm.xlu0 %5957, %v3853_v42   ;;  %v3885_v11 = vadd.f32 %v3883_v30, %v3867_v5  ;;  %v8700_v42 = vld [vmem:[#allocation26_spill] sm:$0xff]  ;;  %v3061_v44 = vadd.f32 %v8706_v9, %v8205_v22  ;;  %v8707_v30 = vld [vmem:[#allocation27_spill] sm:$0xff]  ;;  %v8717_v9 = vmov 0.0  }
 0x848   : > { %3937 = vperm.xlu1 %5951, %v3861_v32   ;;  %vm4028_vm7 = vcmp.gt.f32.partialorder %v3888_v35, 0.0  ;;  %v3066_v43 = vadd.f32 %v8700_v42, %v8205_v22 }
 0x849   : > { %v3887_v51 = vadd.f32 %v3885_v11, %v3869_v14  ;;  %v4030_v21 = vsel %vm4028_vm7, %v3888_v35, 1.0  ;;  %v8708_v11 = vld [vmem:[#allocation33_spill] sm:$0xff] }
 0x84b   : > { %3962 = vperm.xlu0 %5957, %v3866_v48   ;;  %v3889_v52 = vadd.f32 %v3887_v51, %v3871_v36  ;;  %v3090_v48 = vadd.f32 %v8703_v13, %v8205_v22 }
 0x84c   : > { %3947 = vperm.xlu1 %5951, %v3863_v34   ;;  %v3045_v34 = vadd.f32 %v8705_v19, %v8205_v22 }
 0x84d   : > { %vm4029_vm8 = vcmp.gt.f32.partialorder %v3889_v52, 0.0 }
 0x84e   : > { %v4031_v6 = vsel %vm4029_vm8, %v3889_v52, 1.0 }
 0x84f   : > { %4034 = vperm.xlu0 %5957, %v4030_v21  }
 0x850   : > { %3957 = vperm.xlu1 %5951, %v3865_v58  }
 0x853   : > { %3972 = vperm.xlu0 %5957, %v3868_v3   ;;  %v3053_v3 = vadd.f32 %v8704_v20, %v8205_v22  ;;  %v6223_v20 = vld [vmem:[%s8627_s6 + $0x40] ss:$8 sps:$4 sm:$0xff]  }
 0x854   : > { %3967 = vperm.xlu1 %5951, %v3867_v5   ;;  %v3069_v5 = vadd.f32 %v8707_v30, %v8205_v22  ;;  %v6226_v30 = vld [vmem:[%s8629_s8 + $0xc0] sm:$0xff]  }
 0x855   : > { %4227 = vmatpush1.bf16.msra.mxu1 %v6226_v30  ;;  %v6254_v30 = vld [vmem:[%s8626_s5 + $0x274] ss:$8 sps:$4 sm:$0xff]  }
 0x856   : > { %4228 = vmatprep.subr.bf16.mxu1 %v8698_v16 }
 0x857   : > { %3982 = vperm.xlu0 %5957, %v3870_v47  }
 0x858   : > { %4039 = vperm.xlu1 %5951, %v4031_v6  }
 0x85c   : > { %3977 = vperm.xlu1 %5951, %v3869_v14   ;;  %v3098_v14 = vadd.f32 %v8708_v11, %v8205_v22  ;;  %v6228_v11 = vld [vmem:[%s8629_s8 + $0xd0] sm:$0xff]  }
 0x860   : > { %3987 = vperm.xlu1 %5951, %v3871_v36   ;;  %v8709_v36 = vld [vmem:[#allocation32_spill] sm:$0xff] }
 0x861   : > { %v3077_v52 = vadd.f32 %v8709_v36, %v8205_v22  ;;  %v6233_v36 = vld [vmem:[%s8629_s8 + $0xf8] sm:$0xff]  }
 0x864   : > { %4362 = vperm.xlu1 %5951, %v4359_v0  }
 0x868   : > { %6009 = vrot.lane.b32.xlu1 %v8699_v1, %s6616_s25 }
 0x8b2   : > { %v3913_v62 = vpop.permute.xlu0 %3912 }
 0x8b3   : > { %v3893_v8 = vpop.permute.xlu1 %3892  ;;  %v3994_v33 = vmul.f32 %v3913_v62, %v3058_v27  ;;  %v8712_v27 = vld [vmem:[#allocation38_spill] sm:$0xff] }
 0x8b4   : > { %v3990_v23 = vmul.f32 %v3893_v8, %v3042_v2  ;;  %v8711_v8 = vld [vmem:[#allocation36_spill] sm:$0xff] }
 0x8b6   : > { %v3923_v41 = vpop.permute.xlu0 %3922 }
 0x8b7   : > { %v3903_v45 = vpop.permute.xlu1 %3902  ;;  %v3996_v40 = vmul.f32 %v3923_v41, %v3066_v43  ;;  %v8713_v43 = vld [vmem:[#allocation35_spill] sm:$0xff] }
 0x8b8   : > { %v3992_v54 = vmul.f32 %v3903_v45, %v3050_v4  ;;  %v3093_v4 = vadd.f32 %v8711_v8, %v8205_v22  ;;  %v6235_v8 = vld [vmem:[%s8629_s8 + $0x108] ss:$0 sps:$4 sm:$0x77]  }
 0x8ba   : > { %v4010_v25 = vadd.f32 %v3992_v54, %v3990_v23  ;;  %v3933_v61 = vpop.permute.xlu0 %3932  ;;  %v3106_v23 = vadd.f32 %v8712_v27, %v8205_v22  ;;  %v6240_v27 = vld [vmem:[%s8629_s8 + $0x130] sm:$0xff]  }
 0x8bb   : > { %v3908_v31 = vpop.permute.xlu1 %3907  ;;  %v3998_v37 = vmul.f32 %v3933_v61, %v3074_v18 }
 0x8bc   : > { %v4012_v53 = vadd.f32 %v4010_v25, %v3994_v33  ;;  %v3993_v58 = vmul.f32 %v3908_v31, %v3053_v3  ;;  %v3101_v33 = vadd.f32 %v8713_v43, %v8205_v22  ;;  %v6225_v3 = vld [vmem:[%s8627_s6 + $0x44] ss:$8 sps:$4 sm:$0xff]   ;;  %v8720_v43 = vld [vmem:[#allocation22_spill] sm:$0xff] }
 0x8bd   : > { %4120 = vmatprep.subr.bf16.mxu0 %v6225_v3 }
 0x8be   : > { %v4014_v55 = vadd.f32 %v4012_v53, %v3996_v40  ;;  %v3943_v12 = vpop.permute.xlu0 %3942  ;;  %v8714_v40 = vld [vmem:[#allocation37_spill] sm:$0xff]  ;;  %4121 = vmatpush1.bf16.msra.mxu0 %v6223_v20 }
 0x8bf   : > { %v4000_v28 = vmul.f32 %v3943_v12, %v3082_v10  ;;  %v3918_v60 = vpop.permute.xlu1 %3917  ;;  %v3114_v53 = vadd.f32 %v8714_v40, %v8205_v22  ;;  %5781 = vmatprep.subr.bf16.mxu0 %v8717_v9 }
 0x8c0   : > { %v4016_v38 = vadd.f32 %v4014_v55, %v3998_v37  ;;  %v3995_v63 = vmul.f32 %v3918_v60, %v3061_v44  ;;  %v8715_v60 = vld [vmem:[#allocation40_spill] sm:$0xff] }
 0x8c2   : > { %v4018_v39 = vadd.f32 %v4016_v38, %v4000_v28  ;;  %v3953_v32 = vpop.permute.xlu0 %3952  ;;  %v3109_v38 = vadd.f32 %v8715_v60, %v8205_v22 }
 0x8c3   : > { %v4002_v17 = vmul.f32 %v3953_v32, %v3090_v48  ;;  %v3928_v56 = vpop.permute.xlu1 %3927 }
 0x8c4   : > { %v3997_v6 = vmul.f32 %v3928_v56, %v3069_v5  ;;  %v6227_v5 = vld [vmem:[%s8629_s8 + $0xc8] sm:$0xff]  }
 0x8c5   : > { %v4020_v26 = vadd.f32 %v4018_v39, %v4002_v17  ;;  %v8716_v39 = vld [vmem:[#allocation39_spill] sm:$0xff]  ;;  %4229 = vmatpush1.bf16.msra.mxu1 %v6227_v5 }
 0x8c6   : > { %v3898_v47 = vpop.permute.xlu0 %3897  ;;  %v3117_v32 = vadd.f32 %v8716_v39, %v8205_v22  ;;  %4230 = vmatprep.subr.bf16.mxu1 %v8698_v16  ;;  %v912_v39 = vld [vmem:[#allocation6 + $0x5] ss:$0 sm:$0xff]  ;;  %v6252_v5 = vld [vmem:[%s8626_s5 + $0x270] ss:$8 sps:$4 sm:$0xff]  }
 0x8c7   : > { %v3991_v7 = vmul.f32 %v3898_v47, %v3045_v34  ;;  %v3938_v35 = vpop.permute.xlu1 %3937 }
 0x8c8   : > { %v3999_v59 = vmul.f32 %v3938_v35, %v3077_v52 }
 0x8c9   : > { %v4011_v51 = vadd.f32 %v3993_v58, %v3991_v7  ;;  %v8718_v7 = vld [vmem:[#allocation23_spill] sm:$0xff]  ;;  %4231 = vmatpush1.bf16.msra.mxu1 %v6228_v11  ;;  %v6257_v11 = vld [vmem:[%s8626_s5 + $0x284] ss:$8 sps:$4 sm:$0xff]  }
 0x8ca   : > { %v3963_v21 = vpop.permute.xlu0 %3962  ;;  %vm4357_vm11 = vcmp.lt.f32.partialorder %v8718_v7, 0.5  ;;  %4232 = vmatprep.subr.bf16.mxu1 %v8698_v16  ;;  %v6251_v7 = vld [vmem:[%s8626_s5 + $0x264] ss:$8 sps:$4 sm:$0xff]  }
 0x8cb   : > { %v4013_v0 = vadd.f32 %v4011_v51, %v3995_v63  ;;  %v4004_v1 = vmul.f32 %v3963_v21, %v3098_v14  ;;  %v3948_v50 = vpop.permute.xlu1 %3947  ;;  %v4360_v35 = vsel %vm4357_vm11, 1, %v8698_v16  ;;  %v6229_v14 = vld [vmem:[%s8629_s8 + $0xd8] sm:$0xff]   ;;  %v6230_v63 = vld [vmem:[%s8629_s8 + $0xe0] sm:$0xff]   ;;  %v6231_v51 = vld [vmem:[%s8629_s8 + $0xe8] sm:$0xff]  }
 0x8cc   : > { %v4001_v41 = vmul.f32 %v3948_v50, %v3085_v29  ;;  %v6232_v21 = vld [vmem:[%s8629_s8 + $0xf0] sm:$0xff]  }
 0x8cd   : > { %v4015_v15 = vadd.f32 %v4013_v0, %v3997_v6  ;;  %v4022_v24 = vadd.f32 %v4020_v26, %v4004_v1  ;;  %4233 = vmatpush1.bf16.msra.mxu1 %v6229_v14  ;;  %v8290_v1 = vld [vmem:[%s7332_s22 + $0x8] sm:$0xff] }
 0x8ce   : > { %v4035_v62 = vpop.permute.xlu0 %4034  ;;  %4234 = vmatprep.subr.bf16.mxu1 %v8698_v16  ;;  %v6255_v14 = vld [vmem:[%s8626_s5 + $0x280] ss:$8 sps:$4 sm:$0xff]  }
 0x8cf   : > { %v4017_v2 = vadd.f32 %v4015_v15, %v3999_v59  ;;  %v3958_v45 = vpop.permute.xlu1 %3957  ;;  %6399 = vrcp.f32 %v4035_v62  ;;  %v6234_v62 = vld [vmem:[%s8629_s8 + $0x100] sm:$0xff]  }
 0x8d0   : > { %v4003_v42 = vmul.f32 %v3958_v45, %v3093_v4  ;;  %v4224_v4 = vsel %vm2502_vm5, %v6235_v8, 0  ;;  %v6238_v45 = vld [vmem:[%s8629_s8 + $0x120] sm:$0xff]   ;;  %v6276_v8 = vld [vmem:[%s8626_s5 + $0x2f0] ss:$8 sps:$4 sm:$0xff]   ;;  %vm4391_vm5 = vcmask 850944  }
 0x8d1   : > { %v4019_v54 = vadd.f32 %v4017_v2, %v4001_v41  ;;  %4235 = vmatpush1.bf16.msra.mxu1 %v6230_v63  ;;  %v6236_v2 = vld [vmem:[%s8629_s8 + $0x110] sm:$0xff]   ;;  %v6237_v41 = vld [vmem:[%s8629_s8 + $0x118] sm:$0xff]  }
 0x8d2   : > { %v3973_v25 = vpop.permute.xlu0 %3972  ;;  %4236 = vmatprep.subr.bf16.mxu1 %v8698_v16  ;;  %v6260_v63 = vld [vmem:[%s8626_s5 + $0x294] ss:$8 sps:$4 sm:$0xff]  }
 0x8d3   : > { %v4021_v61 = vadd.f32 %v4019_v54, %v4003_v42  ;;  %v3968_v31 = vpop.permute.xlu1 %3967  ;;  %v4006_v49 = vmul.f32 %v3973_v25, %v3106_v23  ;;  %v911_v23 = vld [vmem:[#allocation6 + $0x4] ss:$8 sm:$0x3]  ;;  %v8719_v54 = vld [vmem:[#allocation21_spill] sm:$0xff] }
 0x8d4   : > { %v4005_v18 = vmul.f32 %v3968_v31, %v3101_v33  ;;  %v4064_v42 = vrot.slane %v911_v23, %v8719_v54  ;;  %v4068_v33 = vrot.slane %v911_v23, %v8720_v43  ;;  %v913_v23 = vld [vmem:[#allocation6 + $0x6] ss:$0 sm:$0xff] }
 0x8d5   : > { %v4024_v57 = vadd.f32 %v4022_v24, %v4006_v49  ;;  %4237 = vmatpush1.bf16.msra.mxu1 %v6231_v51  ;;  %v6258_v51 = vld [vmem:[%s8626_s5 + $0x290] ss:$8 sps:$4 sm:$0xff]  }
 0x8d6   : > { %v4023_v10 = vadd.f32 %v4021_v61, %v4005_v18  ;;  %v3983_v37 = vpop.permute.xlu0 %3982  ;;  %4238 = vmatprep.subr.bf16.mxu1 %v8698_v16 }
 0x8d7   : > { %v4040_v55 = vpop.permute.xlu1 %4039  ;;  %v4008_v12 = vmul.f32 %v3983_v37, %v3114_v53 }
 0x8d8   : > { %6401 = vrcp.f32 %v4040_v55 }
 0x8d9   : > { %v4026_v28 = vadd.f32 %v4024_v57, %v4008_v12  ;;  %v6400_v34 = vpop.eup %6399  ;;  %4239 = vmatpush1.bf16.msra.mxu1 %v6232_v21  ;;  %v6263_v21 = vld [vmem:[%s8626_s5 + $0x2a4] ss:$8 sps:$4 sm:$0xff]  }
 0x8da   : > { %4240 = vmatprep.subr.bf16.mxu1 %v8698_v16 }
 0x8db   : > { %v3978_v13 = vpop.permute.xlu1 %3977  ;;  %v4043_v44 = vmul.f32 %v6400_v34, %v4026_v28 }
 0x8dc   : > { %v4007_v48 = vmul.f32 %v3978_v13, %v3109_v38  ;;  %v6241_v38 = vld [vmem:[%s8629_s8 + $0x138] sm:$0xff]   ;;  %v6242_v13 = vld [vmem:[%s8629_s8 + $0x140] ss:$0 sps:$4 sm:$0x33]  }
 0x8dd   : > { %4241 = vmatpush1.bf16.msra.mxu1 %v6233_v36  ;;  %v6261_v36 = vld [vmem:[%s8626_s5 + $0x2a0] ss:$8 sps:$4 sm:$0xff]  }
 0x8de   : > { %v4025_v17 = vadd.f32 %v4023_v10, %v4007_v48  ;;  %4242 = vmatprep.subr.bf16.mxu1 %v8698_v16  ;;  %v4313_v48 = vsel %vm2745_vm3, %v6242_v13, 0 }
 0x8df   : > { %v3988_v56 = vpop.permute.xlu1 %3987 }
 0x8e0   : > { %v4009_v19 = vmul.f32 %v3988_v56, %v3117_v32 }
 0x8e1   : > { %4243 = vmatpush1.bf16.msra.mxu1 %v6234_v62  ;;  %v6278_v62 = vld [vmem:[%s8626_s5 + $0x2f4] ss:$8 sps:$4 sm:$0xff]  }
 0x8e2   : > { %v6402_v26 = vpop.eup %6401  ;;  %v4027_v47 = vadd.f32 %v4025_v17, %v4009_v19  ;;  %4244 = vmatprep.subr.bf16.mxu1 %v8698_v16  ;;  %v6239_v16 = vld [vmem:[%s8629_s8 + $0x128] sm:$0xff]  }
 0x8e4   : > { %v4045_v22 = vmul.f32 %v6402_v26, %v4027_v47 }
 0x8e5   : > { %4245 = vmatpush1.bf16.msra.mxu1 %v4224_v4  ;;  %v6281_v4 = vld [vmem:[%s8626_s5 + $0x304] ss:$8 sps:$4 sm:$0xff]  }
 0x8e6   : > { %v6003_v58 = vpack.i.bf16 %v4045_v22, %v4043_v44  ;;  %v6243_v44 = vld [vmem:[%s8626_s5 + $0x240] ss:$8 sps:$4 sm:$0xff]   ;;  %v6248_v22 = vld [vmem:[%s8626_s5 + $0x254] ss:$8 sps:$4 sm:$0xff]  }
 0x8e8   : > { %6004 = vrot.lane.b32.xlu0 %v6003_v58, %s6616_s25  ;;  %v6246_v58 = vld [vmem:[%s8626_s5 + $0x250] ss:$8 sps:$4 sm:$0xff]  }
 0x8ec   : > { %4365 = vperm.xlu0 %5957, %v4360_v35   ;;  %v6249_v35 = vld [vmem:[%s8626_s5 + $0x260] ss:$8 sps:$4 sm:$0xff]  }
 0x95a   : > { %v6005_v52 = vpop.permute.xlu0 %6004 }
 0x95b   : > { %v6007_v6 = vunpack.i.h.bf16 %v6005_v52  ;;  %v6006_v0 = vunpack.i.l.bf16 %v6005_v52  ;;  %v6266_v52 = vld [vmem:[%s8626_s5 + $0x2b4] ss:$8 sps:$4 sm:$0xff]  }
 0x95d   : > { %v4055_v50 = vsel %vm1878_vm14, %v8290_v1, %v6007_v6  ;;  %v4054_v29 = vsel %vm1878_vm14, %v8295_v46, %v6006_v0  ;;  %v6264_v6 = vld [vmem:[%s8626_s5 + $0x2b0] ss:$8 sps:$4 sm:$0xff]   ;;  %v6269_v0 = vld [vmem:[%s8626_s5 + $0x2c4] ss:$8 sps:$4 sm:$0xff]  }
 0x95e   : > { %v4058_v15 = vsel %vm4056_vm12, %v4055_v50, 0.0  ;;  %v4057_v59 = vsel %vm4056_vm12, %v4054_v29, 0.0  ;;  %v6267_v50 = vld [vmem:[%s8626_s5 + $0x2c0] ss:$8 sps:$4 sm:$0xff]   ;;  %v6272_v29 = vld [vmem:[%s8626_s5 + $0x2d4] ss:$8 sps:$4 sm:$0xff]  }
 0x95f   : > { %v4059_v24 = vpack.c.bf16 %v4058_v15, %v4057_v59  ;;  %v6270_v15 = vld [vmem:[%s8626_s5 + $0x2d0] ss:$8 sps:$4 sm:$0xff]   ;;  %v6275_v59 = vld [vmem:[%s8626_s5 + $0x2e4] ss:$8 sps:$4 sm:$0xff]  }
 0x961   : > { %5476 = vmatmul.mubr.msk.bf16.vlgmr.msra.gmra.mrb[120].mxu0 %vm1584_vm13, %v4059_v24  ;;  %v6273_v24 = vld [vmem:[%s8626_s5 + $0x2e0] ss:$8 sps:$4 sm:$0xff]  }
 0x962   : > { %5795 = vmatprep.mubr.msk.bf16.mxu0 %vm6615_vm2, %v8717_v9  ;;  %5782 = vmatpush3.bf16.msra.mxu0 %v6236_v2  ;;  %v6279_v2 = vld [vmem:[%s8626_s5 + $0x300] ss:$8 sps:$4 sm:$0xff]  }
 0x963   : > { %5783 = vmatprep.subr.bf16.mxu0 %v8717_v9 }
 0x966   : > { %5784 = vmatpush3.bf16.msra.mxu0 %v6237_v41  ;;  %v6284_v41 = vld [vmem:[%s8626_s5 + $0x314] ss:$8 sps:$4 sm:$0xff]  }
 0x967   : > { %5785 = vmatprep.subr.bf16.mxu0 %v8717_v9 }
 0x96a   : > { %5786 = vmatpush3.bf16.msra.mxu0 %v6238_v45  ;;  %v6282_v45 = vld [vmem:[%s8626_s5 + $0x310] ss:$8 sps:$4 sm:$0xff]  }
 0x96b   : > { %5787 = vmatprep.subr.bf16.mxu0 %v8717_v9 }
 0x96e   : > { %5788 = vmatpush3.bf16.msra.mxu0 %v6239_v16  ;;  %v6287_v16 = vld [vmem:[%s8626_s5 + $0x324] ss:$8 sps:$4 sm:$0xff]  }
 0x96f   : > { %5789 = vmatprep.subr.bf16.mxu0 %v8717_v9 }
 0x972   : > { %5790 = vmatpush3.bf16.msra.mxu0 %v6240_v27  ;;  %v6285_v27 = vld [vmem:[%s8626_s5 + $0x320] ss:$8 sps:$4 sm:$0xff]  }
 0x973   : > { %5791 = vmatprep.subr.bf16.mxu0 %v8717_v9 }
 0x976   : > { %5792 = vmatpush3.bf16.msra.mxu0 %v6241_v38 }
 0x977   : > { %5793 = vmatprep.subr.bf16.mxu0 %v8717_v9  ;;  %v6245_v9 = vld [vmem:[%s8626_s5 + $0x244] ss:$8 sps:$4 sm:$0xff]  }
 0x978   : > { %4567 = vmatprep.subr.bf16.mxu1 %v6245_v9 }
 0x97a   : > { %5794 = vmatpush3.bf16.msra.mxu0 %v4313_v48 }
 0xa34   : > { %v4148_v25 = vpop.f32.mrb[120].mxu0 }
 0xa35   : > { %v4149_v61 = vadd.f32 %v4148_v25, %v4064_v42  ;;  %v4150_v31 = vpop.f32.mrb[121].mxu0  ;;  %v4363_v25 = vpop.permute.xlu1 %4362 }
 0xa36   : > { %v4151_v49 = vadd.f32 %v4150_v31, %v4068_v33  ;;  %v4152_v18 = vpop.f32.mrb[122].mxu0  ;;  %v4366_v31 = vpop.permute.xlu0 %4365  ;;  %vm4367_vm2 = vcmp.eq.s32.totalorder %v4363_v25, 1 }
 0xa37   : > { %v4153_v40 = vadd.f32 %v4152_v18, %v4064_v42  ;;  %v4154_v53 = vpop.f32.mrb[123].mxu0  ;;  %v4157_v10 = vmax.f32 %v4149_v61, 0.0  ;;  %v6288_v42 = vld [vmem:[%s8626_s5 + $0x330] ss:$8 sps:$4 sm:$0xff]   ;;  %vm4368_vm13 = vcmp.eq.s32.totalorder %v4366_v31, 1 }
 0xa38   : > { %v4155_v57 = vadd.f32 %v4154_v53, %v4068_v33  ;;  %v4158_v55 = vmax.f32 %v4151_v49, 0.0  ;;  %v6290_v33 = vld [vmem:[%s8626_s5 + $0x334] ss:$8 sps:$4 sm:$0xff]   ;;  %v929_v53 = vld [vmem:[#allocation6 + $0x50] ss:$0 sm:$0xff] }
 0xa39   : > { %v4159_v37 = vmax.f32 %v4153_v40, 0.0 }
 0xa3a   : > { %v4160_v12 = vmax.f32 %v4155_v57, 0.0 }
 0xa3b   : > { %v4161_v28 = vpack.c.bf16 %v4159_v37, %v4157_v10 }
 0xa3c   : > { %v4162_v60 = vpack.c.bf16 %v4160_v12, %v4158_v55 }
 0xa3e   : > { %5487 = vmatprep.mubr.msk.bf16.mxu1 %vm2471_vm9, %v4162_v60  ;;  %vm5528_vm9 = vmpackc.low %vm4391_vm5, %vm4391_vm5 }
 0xa3f   : > { %4259 = vmatmul.mubr.bf16.vlgmr.msra.gmra.mrb[64].mxu1 %v4161_v28  ;;  %v6010_v28 = vpop.permute.xlu1 %6009 }
 0xa40   : > { %4568 = vmatpush1.bf16.msra.mxu1 %v6243_v44  ;;  %v6012_v60 = vunpack.i.h.bf16 %v6010_v28  ;;  %v6011_v38 = vunpack.i.l.bf16 %v6010_v28  ;;  %v6324_v28 = vld [vmem:[%s8626_s5 + $0x3f0] ss:$8 sps:$4 sm:$0xff]  }
 0xa41   : > { %4569 = vmatprep.subr.bf16.mxu1 %v6248_v22 }
 0xa44   : > { %4570 = vmatpush1.bf16.msra.mxu1 %v6246_v58 }
 0xa45   : > { %4571 = vmatprep.subr.bf16.mxu1 %v6251_v7 }
 0xa48   : > { %4572 = vmatpush1.bf16.msra.mxu1 %v6249_v35 }
 0xa49   : > { %4573 = vmatprep.subr.bf16.mxu1 %v6254_v30 }
 0xa4c   : > { %4574 = vmatpush1.bf16.msra.mxu1 %v6252_v5 }
 0xa4d   : > { %4575 = vmatprep.subr.bf16.mxu1 %v6257_v11  ;;  %v6291_v11 = vld [vmem:[%s8626_s5 + $0x340] ss:$8 sps:$4 sm:$0xff]  }
 0xa50   : > { %4576 = vmatpush1.bf16.msra.mxu1 %v6255_v14  ;;  %v6293_v14 = vld [vmem:[%s8626_s5 + $0x344] ss:$8 sps:$4 sm:$0xff]  }
 0xa51   : > { %4577 = vmatprep.subr.bf16.mxu1 %v6260_v63  ;;  %v6296_v63 = vld [vmem:[%s8626_s5 + $0x354] ss:$8 sps:$4 sm:$0xff]   ;;  %4858 = vmatprep.subr.bf16.mxu0 %v6293_v14  ;;  %v931_v14 = vld [vmem:[#allocation6 + $0x51] ss:$8 sm:$0x3] }
 0xa54   : > { %4578 = vmatpush1.bf16.msra.mxu1 %v6258_v51  ;;  %v6294_v51 = vld [vmem:[%s8626_s5 + $0x350] ss:$8 sps:$4 sm:$0xff]  }
 0xa55   : > { %4579 = vmatprep.subr.bf16.mxu1 %v6263_v21  ;;  %v6299_v21 = vld [vmem:[%s8626_s5 + $0x364] ss:$8 sps:$4 sm:$0xff]  }
 0xa58   : > { %4580 = vmatpush1.bf16.msra.mxu1 %v6261_v36  ;;  %v6297_v36 = vld [vmem:[%s8626_s5 + $0x360] ss:$8 sps:$4 sm:$0xff]  }
 0xa59   : > { %4581 = vmatprep.subr.bf16.mxu1 %v6266_v52  ;;  %v6302_v52 = vld [vmem:[%s8626_s5 + $0x374] ss:$8 sps:$4 sm:$0xff]  }
 0xa5c   : > { %4582 = vmatpush1.bf16.msra.mxu1 %v6264_v6  ;;  %v6300_v6 = vld [vmem:[%s8626_s5 + $0x370] ss:$8 sps:$4 sm:$0xff]  }
 0xa5d   : > { %4583 = vmatprep.subr.bf16.mxu1 %v6269_v0  ;;  %v6305_v0 = vld [vmem:[%s8626_s5 + $0x384] ss:$8 sps:$4 sm:$0xff]  }
 0xa60   : > { %4584 = vmatpush1.bf16.msra.mxu1 %v6267_v50  ;;  %v6303_v50 = vld [vmem:[%s8626_s5 + $0x380] ss:$8 sps:$4 sm:$0xff]  }
 0xa61   : > { %4585 = vmatprep.subr.bf16.mxu1 %v6272_v29  ;;  %v6308_v29 = vld [vmem:[%s8626_s5 + $0x394] ss:$8 sps:$4 sm:$0xff]  }
 0xa64   : > { %4586 = vmatpush1.bf16.msra.mxu1 %v6270_v15  ;;  %v6306_v15 = vld [vmem:[%s8626_s5 + $0x390] ss:$8 sps:$4 sm:$0xff]  }
 0xa65   : > { %4587 = vmatprep.subr.bf16.mxu1 %v6275_v59  ;;  %v6311_v59 = vld [vmem:[%s8626_s5 + $0x3a4] ss:$8 sps:$4 sm:$0xff]  }
 0xa68   : > { %4588 = vmatpush1.bf16.msra.mxu1 %v6273_v24  ;;  %v6309_v24 = vld [vmem:[%s8626_s5 + $0x3a0] ss:$8 sps:$4 sm:$0xff]  }
 0xa69   : > { %4589 = vmatprep.subr.bf16.mxu1 %v6278_v62  ;;  %v6314_v62 = vld [vmem:[%s8626_s5 + $0x3b4] ss:$8 sps:$4 sm:$0xff]  }
 0xa6c   : > { %4590 = vmatpush1.bf16.msra.mxu1 %v6276_v8  ;;  %v6312_v8 = vld [vmem:[%s8626_s5 + $0x3b0] ss:$8 sps:$4 sm:$0xff]  }
 0xa6d   : > { %4591 = vmatprep.subr.bf16.mxu1 %v6281_v4  ;;  %v6317_v4 = vld [vmem:[%s8626_s5 + $0x3c4] ss:$8 sps:$4 sm:$0xff]  }
 0xa70   : > { %4592 = vmatpush1.bf16.msra.mxu1 %v6279_v2  ;;  %v6315_v2 = vld [vmem:[%s8626_s5 + $0x3c0] ss:$8 sps:$4 sm:$0xff]  }
 0xa71   : > { %4593 = vmatprep.subr.bf16.mxu1 %v6284_v41 }
 0xa74   : > { %4594 = vmatpush1.bf16.msra.mxu1 %v6282_v45 }
 0xa75   : > { %4595 = vmatprep.subr.bf16.mxu1 %v6287_v16 }
 0xa78   : > { %4596 = vmatpush1.bf16.msra.mxu1 %v6285_v27 }
 0xa79   : > { %4597 = vmatprep.subr.bf16.mxu1 %v6290_v33 }
 0xa7c   : > { %4598 = vmatpush1.bf16.msra.mxu1 %v6288_v42 }
 0xb12   : > { %v4260_v32 = vpop.f32.mrb[64].mxu1 }
 0xb13   : > { %v4261_v17 = vadd.f32 %v4260_v32, %v912_v39  ;;  %v4262_v56 = vpop.f32.mrb[65].mxu1  ;;  %v4388_v32 = vsel %vm1878_vm14, %v8290_v1, %v6012_v60 }
 0xb14   : > { %v4263_v20 = vpop.f32.mrb[66].mxu1 }
 0xb15   : > { %v4264_v3 = vadd.f32 %v4263_v20, %v912_v39  ;;  %v4265_v19 = vpop.f32.mrb[67].mxu1  ;;  %v4267_v34 = vmax.f32 %v4261_v17, 0.0  ;;  %v4387_v17 = vsel %vm1878_vm14, %v8295_v46, %v6011_v38 }
 0xb16   : > { %v4394_v19 = vpack.c.bf16 %v4388_v32, %v4387_v17  ;;  %v6340_v32 = vld [vmem:[#allocation9 + $0x80] sm:$0xff]   ;;  %v6341_v17 = vld [vmem:[#allocation9 + $0xc8] sm:$0xff]  }
 0xb17   : > { %v4268_v26 = vmax.f32 %v4264_v3, 0.0 }
 0xb19   : > { %v4269_v47 = vpack.c.bf16 %v4268_v26, %v4267_v34  ;;  %v925_v34 = vld [vmem:[#allocation6 + $0x2d] ss:$8 sm:$0x3] }
 0xb1a   : > { %v4400_v26 = vrot.slane %v925_v34, %v8719_v54 }
 0xb1b   : > { %5796 = vmatmul.mubr.msk.bf16.vlgmr.msra.gmra.mrb[124].mxu0 %vm2714_vm4, %v4269_v47  ;;  %v4404_v47 = vrot.slane %v925_v34, %v8720_v43  ;;  %v6338_v34 = vld [vmem:[%s8626_s5 + $0x434] ss:$8 sps:$4 sm:$0xff]  }
 0xb1c   : > { %4859 = vmatpush1.bf16.msra.mxu0 %v6291_v11  ;;  %v933_v11 = vld [vmem:[#allocation6 + $0x52] ss:$8 sm:$0x3] }
 0xb1d   : > { %4860 = vmatprep.subr.bf16.mxu0 %v6296_v63  ;;  %v4647_v63 = vrot.slane %v933_v11, %v8719_v54 }
 0xb20   : > { %4861 = vmatpush1.bf16.msra.mxu0 %v6294_v51  ;;  %v4651_v51 = vrot.slane %v933_v11, %v8720_v43 }
 0xb21   : > { %4862 = vmatprep.subr.bf16.mxu0 %v6299_v21 }
 0xb24   : > { %4863 = vmatpush1.bf16.msra.mxu0 %v6297_v36 }
 0xb25   : > { %4864 = vmatprep.subr.bf16.mxu0 %v6302_v52 }
 0xb28   : > { %4865 = vmatpush1.bf16.msra.mxu0 %v6300_v6  ;;  %v4662_v6 = vrot.slane %v931_v14, %v8719_v54 }
 0xb29   : > { %4866 = vmatprep.subr.bf16.mxu0 %v6305_v0  ;;  %v4666_v0 = vrot.slane %v931_v14, %v8720_v43 }
 0xb2c   : > { %4867 = vmatpush1.bf16.msra.mxu0 %v6303_v50 }
 0xb2d   : > { %4868 = vmatprep.subr.bf16.mxu0 %v6308_v29 }
 0xb30   : > { %4869 = vmatpush1.bf16.msra.mxu0 %v6306_v15 }
 0xb31   : > { %4870 = vmatprep.subr.bf16.mxu0 %v6311_v59 }
 0xb34   : > { %4871 = vmatpush1.bf16.msra.mxu0 %v6309_v24 }
 0xb35   : > { %4872 = vmatprep.subr.bf16.mxu0 %v6314_v62 }
 0xb38   : > { %4873 = vmatpush1.bf16.msra.mxu0 %v6312_v8 }
 0xb39   : > { %4874 = vmatprep.subr.bf16.mxu0 %v6317_v4 }
 0xb3c   : > { %4875 = vmatpush1.bf16.msra.mxu0 %v6315_v2 }
 0xbee   : > { %v4349_v61 = vpop.f32.mrb[124].mxu0 }
 0xbef   : > { %v4350_v49 = vadd.f32 %v4349_v61, %v913_v23  ;;  %v5797_v18 = vpop.f32.mrb[125].mxu0 }
 0xbf0   : > { %v4352_v40 = vpop.f32.mrb[126].mxu0 }
 0xbf1   : > { %v4353_v57 = vadd.f32 %v4352_v40, %v913_v23  ;;  %v5798_v10 = vpop.f32.mrb[127].mxu0  ;;  %v4369_v37 = vsel %vm4367_vm2, %v929_v53, %v4350_v49 }
 0xbf2   : > { %v6318_v10 = vld [vmem:[%s8626_s5 + $0x3d0] ss:$8 sps:$4 sm:$0xff]  }
 0xbf3   : > { %v4370_v55 = vsel %vm4368_vm13, %v929_v53, %v4353_v57  ;;  %v6320_v57 = vld [vmem:[%s8626_s5 + $0x3d4] ss:$8 sps:$4 sm:$0xff]  }
 0xbf4   : > { %v6013_v12 = vpack.i.bf16 %v4370_v55, %v4369_v37  ;;  %4876 = vmatprep.subr.bf16.mxu0 %v6320_v57  ;;  %v6323_v37 = vld [vmem:[%s8626_s5 + $0x3e4] ss:$8 sps:$4 sm:$0xff]   ;;  %v6321_v55 = vld [vmem:[%s8626_s5 + $0x3e0] ss:$8 sps:$4 sm:$0xff]   ;;  %v6351_v57 = vld [vmem:[#allocation9 + $0xf0] sm:$0xff]  }
 0xbf5   : > { %4877 = vmatpush1.bf16.msra.mxu0 %v6318_v10  ;;  %v6352_v10 = vld [vmem:[#allocation9 + $0xb0] sm:$0xff]  }
 0xbf6   : > { %6014 = vrot.lane.b32.xlu0 %v6013_v12, %s6616_s25  ;;  %v6326_v12 = vld [vmem:[%s8626_s5 + $0x3f4] ss:$8 sps:$4 sm:$0xff]   ;;  %4878 = vmatprep.subr.bf16.mxu0 %v6323_v37  ;;  %v6353_v37 = vld [vmem:[#allocation9 + $0xf8] sm:$0xff]   ;;  %s8721_s25 = sld [smem:[#allocation19_spill]] }
 0xbf9   : > { %4879 = vmatpush1.bf16.msra.mxu0 %v6321_v55  ;;  %v6354_v55 = vld [vmem:[#allocation9 + $0xb8] sm:$0xff]  }
 0xbfa   : > { %4880 = vmatprep.subr.bf16.mxu0 %v6326_v12  ;;  %v927_v12 = vld [vmem:[#allocation6 + $0x2e] ss:$8 sm:$0x3] }
 0xbfc   : > { %p8723_p1 = scmp.ne.s32.totalorder %s8721_s25, 0 }
 0xbfd   : > { %4881 = vmatpush1.bf16.msra.mxu0 %v6324_v28  ;;  %v4691_v28 = vrot.slane %v927_v12, %v8719_v54 }
 0xbfe   : > { %p6527_p2 = pnand %p6526_p10, %p8723_p1 }
 0xc00   : > { %p6528_p6 = pneg %p6527_p2 }
 0xc02   : > { %p6535_p5 = pnand %p6534_p3, %p6528_p6 }
 0xc68   : > { %v6015_v13 = vpop.permute.xlu0 %6014 }
 0xc69   : > { %v6017_v48 = vunpack.i.h.bf16 %v6015_v13  ;;  %v6016_v39 = vunpack.i.l.bf16 %v6015_v13  ;;  %v6332_v13 = vld [vmem:[%s8626_s5 + $0x414] ss:$8 sps:$4 sm:$0xff]  }
 0xc6b   : > { %v4389_v56 = vsel %vm1878_vm14, %v6011_v38, %v6016_v39  ;;  %v4390_v20 = vsel %vm1878_vm14, %v6012_v60, %v6017_v48  ;;  %v6329_v60 = vld [vmem:[%s8626_s5 + $0x404] ss:$8 sps:$4 sm:$0xff]   ;;  %v6327_v38 = vld [vmem:[%s8626_s5 + $0x400] ss:$8 sps:$4 sm:$0xff]   ;;  %v6330_v48 = vld [vmem:[%s8626_s5 + $0x410] ss:$8 sps:$4 sm:$0xff]  }
 0xc6c   : > { %v5529_v3 = vpack.c.bf16 %v4390_v20, %v4389_v56  ;;  %4882 = vmatprep.subr.bf16.mxu0 %v6329_v60  ;;  %v6339_v39 = vld [vmem:[#allocation9 + $0xc0] sm:$0xff]   ;;  %v6342_v20 = vld [vmem:[#allocation9 + $0x88] sm:$0xff]   ;;  %v4695_v60 = vrot.slane %v927_v12, %v8720_v43 }
 0xc6d   : > { %4883 = vmatpush1.bf16.msra.mxu0 %v6327_v38  ;;  %v6335_v56 = vld [vmem:[%s8626_s5 + $0x424] ss:$8 sps:$4 sm:$0xff]   ;;  %5663 = vmatprep.subr.bf16.mxu1 %v6339_v39 }
 0xc6e   : > { %5530 = vmatprep.mubr.msk.bf16.mxu1 %vm5528_vm9, %v5529_v3  ;;  %4884 = vmatprep.subr.bf16.mxu0 %v6332_v13  ;;  %v6333_v3 = vld [vmem:[%s8626_s5 + $0x420] ss:$8 sps:$4 sm:$0xff]  }
 0xc6f   : > { %4600 = vmatmul.mubr.bf16.vlgmr.msra.gmra.mrb[68].mxu1 %v4394_v19  ;;  %v6343_v19 = vld [vmem:[#allocation9 + $0xd0] sm:$0xff]  }
 0xc70   : > { %5664 = vmatpush3.bf16.msra.mxu1 %v6340_v32 }
 0xc71   : > { %4885 = vmatpush1.bf16.msra.mxu0 %v6330_v48  ;;  %5665 = vmatprep.subr.bf16.mxu1 %v6341_v17 }
 0xc72   : > { %4886 = vmatprep.subr.bf16.mxu0 %v6335_v56 }
 0xc74   : > { %5666 = vmatpush3.bf16.msra.mxu1 %v6342_v20 }
 0xc75   : > { %4887 = vmatpush1.bf16.msra.mxu0 %v6333_v3  ;;  %5667 = vmatprep.subr.bf16.mxu1 %v6343_v19 }
 0xc76   : > { %4888 = vmatprep.subr.bf16.mxu0 %v6338_v34 }
 0xd42   : > { %v4601_v44 = vpop.f32.mrb[68].mxu1 }
 0xd43   : > { %v4602_v9 = vadd.f32 %v4601_v44, %v4400_v26  ;;  %v4603_v1 = vpop.f32.mrb[69].mxu1  ;;  %v6345_v44 = vld [vmem:[#allocation9 + $0xd8] sm:$0xff]  }
 0xd44   : > { %v4604_v22 = vadd.f32 %v4603_v1, %v4404_v47  ;;  %v4605_v58 = vpop.f32.mrb[70].mxu1  ;;  %v6347_v1 = vld [vmem:[#allocation9 + $0xe0] sm:$0xff]  }
 0xd45   : > { %v4606_v46 = vadd.f32 %v4605_v58, %v4400_v26  ;;  %v4607_v7 = vpop.f32.mrb[71].mxu1  ;;  %v6344_v26 = vld [vmem:[#allocation9 + $0x90] sm:$0xff]  }
 0xd46   : > { %v4608_v35 = vadd.f32 %v4607_v7, %v4404_v47  ;;  %v4610_v30 = vadd.f32 %v4604_v22, %v4602_v9  ;;  %v6336_v47 = vld [vmem:[%s8626_s5 + $0x430] ss:$8 sps:$4 sm:$0xff]   ;;  %5668 = vmatpush3.bf16.msra.mxu1 %v6344_v26 }
 0xd47   : > { %4889 = vmatpush1.bf16.msra.mxu0 %v6336_v47  ;;  %5669 = vmatprep.subr.bf16.mxu1 %v6345_v44 }
 0xd48   : > { %4611 = vadd.xlane.f32.xlu1 %v4610_v30  ;;  %v4613_v5 = vadd.f32 %v4608_v35, %v4606_v46 }
 0xd4a   : > { %4614 = vadd.xlane.f32.xlu0 %v4613_v5 }
 0xdd5   : > { %v4612_v41 = vpop.xlane.xlu1 %4611 }
 0xdd6   : > { %v4617_v45 = vmul.f32 0.00390625, %v4612_v41 }
 0xdd7   : > { %v4615_v16 = vpop.xlane.xlu0 %4614 }
 0xdd8   : > { %v8501_v27 = vsub.f32 %v4602_v9, %v4617_v45  ;;  %v8503_v23 = vsub.f32 %v4604_v22, %v4617_v45  ;;  %v4618_v42 = vmul.f32 0.00390625, %v4615_v16  ;;  %v6346_v9 = vld [vmem:[#allocation9 + $0x98] sm:$0xff]   ;;  %v6348_v22 = vld [vmem:[#allocation9 + $0xa0] sm:$0xff]  }
 0xdd9   : > { %5670 = vmatpush3.bf16.msra.mxu1 %v6346_v9 }
 0xdda   : > { %v8505_v33 = vsub.f32 %v4606_v46, %v4618_v42  ;;  %v8507_v25 = vsub.f32 %v4608_v35, %v4618_v42  ;;  %v4623_v61 = vmul.f32 %v8501_v27, %v8501_v27  ;;  %v4624_v31 = vmul.f32 %v8503_v23, %v8503_v23  ;;  %5671 = vmatprep.subr.bf16.mxu1 %v6347_v1 }
 0xddc   : > { %v4627_v49 = vadd.f32 %v4624_v31, %v4623_v61  ;;  %v4625_v18 = vmul.f32 %v8505_v33, %v8505_v33  ;;  %v4626_v40 = vmul.f32 %v8507_v25, %v8507_v25 }
 0xddd   : > { %5672 = vmatpush3.bf16.msra.mxu1 %v6348_v22 }
 0xdde   : > { %4628 = vadd.xlane.f32.xlu0 %v4627_v49  ;;  %v4630_v53 = vadd.f32 %v4626_v40, %v4625_v18  ;;  %v6349_v40 = vld [vmem:[#allocation9 + $0xe8] sm:$0xff]  }
 0xddf   : > { %5673 = vmatprep.subr.bf16.mxu1 %v6349_v40 }
 0xde0   : > { %4631 = vadd.xlane.f32.xlu1 %v4630_v53  ;;  %v6350_v53 = vld [vmem:[#allocation9 + $0xa8] sm:$0xff]  }
 0xde1   : > { %5674 = vmatpush3.bf16.msra.mxu1 %v6350_v53 }
 0xde2   : > { %5675 = vmatprep.subr.bf16.mxu1 %v6351_v57 }
 0xde5   : > { %5676 = vmatpush3.bf16.msra.mxu1 %v6352_v10 }
 0xde6   : > { %5677 = vmatprep.subr.bf16.mxu1 %v6353_v37 }
 0xde9   : > { %5678 = vmatpush3.bf16.msra.mxu1 %v6354_v55 }
 0xe6b   : > { %v4629_v58 = vpop.xlane.xlu0 %4628 }
 0xe6c   : > { %v4633_v46 = vmul.f32 0.00390625, %v4629_v58  ;;  %v928_v58 = vld [vmem:[#allocation6 + $0x2f] ss:$0 sm:$0xff] }
 0xe6d   : > { %v4632_v7 = vpop.xlane.xlu1 %4631 }
 0xe6e   : > { %v4635_v35 = vadd.f32 1e-05, %v4633_v46  ;;  %v4634_v30 = vmul.f32 0.00390625, %v4632_v7 }
 0xe70   : > { %6403 = vrsqrt.f32 %v4635_v35  ;;  %v4636_v5 = vadd.f32 1e-05, %v4634_v30 }
 0xe72   : > { %6405 = vrsqrt.f32 %v4636_v5 }
 0xe7a   : > { %v6404_v21 = vpop.eup %6403 }
 0xe7b   : > { %v4639_v36 = vmul.f32 %v6404_v21, %v8501_v27  ;;  %v4640_v52 = vmul.f32 %v6404_v21, %v8503_v23 }
 0xe7c   : > { %v6406_v50 = vpop.eup %6405 }
 0xe7d   : > { %v4654_v29 = vmul.f32 %v4647_v63, %v4639_v36  ;;  %v4641_v15 = vmul.f32 %v6406_v50, %v8505_v33  ;;  %v4642_v59 = vmul.f32 %v6406_v50, %v8507_v25  ;;  %v4655_v24 = vmul.f32 %v4651_v51, %v4640_v52 }
 0xe7f   : > { %v4656_v62 = vmul.f32 %v4647_v63, %v4641_v15  ;;  %v4657_v8 = vmul.f32 %v4651_v51, %v4642_v59  ;;  %v4670_v4 = vadd.f32 %v4666_v0, %v4655_v24  ;;  %v4669_v2 = vadd.f32 %v4662_v6, %v4654_v29 }
 0xe81   : > { %v4672_v41 = vadd.f32 %v4666_v0, %v4657_v8  ;;  %v4678_v45 = vmul.f32 0.01, %v4670_v4  ;;  %v4671_v16 = vadd.f32 %v4662_v6, %v4656_v62  ;;  %vm4674_vm14 = vcmp.ge.f32.partialorder %v4670_v4, 0.0 }
 0xe82   : > { %v4677_v27 = vmul.f32 0.01, %v4669_v2  ;;  %vm4673_vm4 = vcmp.ge.f32.partialorder %v4669_v2, 0.0 }
 0xe83   : > { %vm4676_vm3 = vcmp.ge.f32.partialorder %v4672_v41, 0.0  ;;  %v4680_v23 = vmul.f32 0.01, %v4672_v41  ;;  %vm4675_vm15 = vcmp.ge.f32.partialorder %v4671_v16, 0.0  ;;  %v4679_v42 = vmul.f32 0.01, %v4671_v16 }
 0xe84   : > { %v4682_v61 = vsel %vm4674_vm14, %v4670_v4, %v4678_v45  ;;  %v4681_v49 = vsel %vm4673_vm4, %v4669_v2, %v4677_v27 }
 0xe85   : > { %v4684_v31 = vsel %vm4676_vm3, %v4672_v41, %v4680_v23  ;;  %v4683_v25 = vsel %vm4675_vm15, %v4671_v16, %v4679_v42 }
 0xe86   : > { %v4686_v33 = vpack.c.bf16 %v4684_v31, %v4682_v61  ;;  %v4685_v18 = vpack.c.bf16 %v4683_v25, %v4681_v49 }
 0xe88   : > { %4890 = vmatprep.mubr.bf16.mxu0 %v4686_v33 }
 0xe89   : > { %4891 = vmatmul.mubr.bf16.vlgmr.msra.gmra.mrb[128].mxu0 %v4685_v18 }
 0xf5c   : > { %v4892_v38 = vpop.f32.mrb[128].mxu0 }
 0xf5d   : > { %v4893_v13 = vadd.f32 %v4892_v38, %v4691_v28  ;;  %v4894_v48 = vpop.f32.mrb[129].mxu0 }
 0xf5e   : > { %v4895_v39 = vadd.f32 %v4894_v48, %v4695_v60  ;;  %v4896_v32 = vpop.f32.mrb[130].mxu0 }
 0xf5f   : > { %v4905_v17 = vmul.f32 0.01, %v4893_v13  ;;  %v4897_v56 = vadd.f32 %v4896_v32, %v4691_v28  ;;  %v4898_v20 = vpop.f32.mrb[131].mxu0  ;;  %vm4901_vm1 = vcmp.ge.f32.partialorder %v4893_v13, 0.0 }
 0xf60   : > { %v4906_v3 = vmul.f32 0.01, %v4895_v39  ;;  %v4899_v19 = vadd.f32 %v4898_v20, %v4695_v60  ;;  %vm4902_vm0 = vcmp.ge.f32.partialorder %v4895_v39, 0.0 }
 0xf61   : > { %vm4903_vm6 = vcmp.ge.f32.partialorder %v4897_v56, 0.0  ;;  %v4907_v34 = vmul.f32 0.01, %v4897_v56  ;;  %v4909_v47 = vsel %vm4901_vm1, %v4893_v13, %v4905_v17 }
 0xf62   : > { %vm4904_vm7 = vcmp.ge.f32.partialorder %v4899_v19, 0.0  ;;  %v4908_v26 = vmul.f32 0.01, %v4899_v19  ;;  %v4910_v43 = vsel %vm4902_vm0, %v4895_v39, %v4906_v3 }
 0xf63   : > { %v4911_v54 = vsel %vm4903_vm6, %v4897_v56, %v4907_v34 }
 0xf64   : > { %v4913_v44 = vpack.c.bf16 %v4911_v54, %v4909_v47  ;;  %v4912_v9 = vsel %vm4904_vm7, %v4899_v19, %v4908_v26 }
 0xf65   : > { %v4914_v1 = vpack.c.bf16 %v4912_v9, %v4910_v43 }
 0xf67   : > { %5043 = vmatprep.mubr.bf16.mxu1 %v4914_v1 }
 0xf68   : > { %5044 = vmatmul.mubr.bf16.vlgmr.msra.gmra.mrb[72].mxu1 %v4913_v44 }
0x103b   : > { %v5679_v22 = vpop.f32.mrb[72].mxu1 }
0x103c   : > { %v5680_v46 = vpop.f32.mrb[73].mxu1 }
0x103d   : > { %v5681_v7 = vadd.f32 %v5680_v46, %v5679_v22  ;;  %v5682_v35 = vpop.f32.mrb[74].mxu1 }
0x103e   : > { %v5683_v30 = vpop.f32.mrb[75].mxu1 }
0x103f   : > { %v5046_v5 = vadd.f32 %v5681_v7, %v928_v58  ;;  %v5684_v11 = vadd.f32 %v5683_v30, %v5682_v35 }
0x1041   : > { %6407 = vtanh.f32 %v5046_v5  ;;  %v5049_v14 = vadd.f32 %v5684_v11, %v928_v58 }
0x1043   : > { %6409 = vtanh.f32 %v5049_v14 }
0x104b   : > { %v6408_v63 = vpop.eup %6407 }
0x104c   : > { %5054 = vst [vmem:[%s568_s26] sm:$0xff] %v6408_v63 }
0x104d   : > { %v6410_v51 = vpop.eup %6409 }
0x104e   : > { %5055 = vst [vmem:[%s568_s26 + $0x8] sm:$0xff] %v6410_v51 }
0x104f   : > { %6538 = shalt.err (!%p6535_p5)
}
0x1050   : > { %s6539_s27 = scalar_lea.hbm %s8575_s9, 256  ;;  %s6543_s3 = scalar_lea.hbm %s8722_s12, 512 }
0x1051   : > { %p6540_p13 = scmp.ne.s32.totalorder %s8575_s9, %s6539_s27  ;;  %p6544_p8 = scmp.lt.u32.totalorder %s8575_s9, %s8722_s12 }
0x1052   : > { %p6545_p9 = scmp.lt.u32.totalorder %s6543_s3, %s6539_s27  ;;  %p6547_p2 = scmp.lt.u32.totalorder %s6539_s27, %s8575_s9 }
0x1053   : > { %p6541_p0 = pnand %p6540_p13, %p8723_p1 }
0x1054   : > { %p6546_p10 = por %p6545_p9, %p6544_p8 }
0x1055   : > { %p6542_p7 = pneg %p6541_p0 }
0x1056   : > { %p6548_p6 = por %p6547_p2, %p6546_p10 }
0x1058   : > { %p6549_p11 = pnand %p6548_p6, %p6542_p7 }
0x105a   : > { %6552 = shalt.err (!%p6549_p11)
}
0x105b   : > { %s6618_s26 = smov 128   ;;  %s6619_s18 = smov 8  }
0x105c   : > { %5829 = dma.vmem_to_hbm [thread:$0]  (%p8723_p1), %s8577_s30, 256, %s8575_s9, %s5057_s23, %s6618_s26, %s6618_s26, %s6619_s18  }
0x105d PF: > { %s8724_s29 = sld [smem:[#allocation16_spill]]  ;;  %s8725_s21 = sld [smem:[#allocation20_spill]] }
0x1063   : > { %s5085_s17 = sand.u32 1, %s8724_s29   ;;  %p8726_p12 = scmp.ne.s32.totalorder %s8725_s21, 0 }
0x1064   : > { %s5086_s20 = scalar_lea.sflag [#allocation4], %s5085_s17 }
0x1065   : > { %p5842_p3 = pnand %p5207_p4, %p8726_p12 }
0x1067   : > { %6582 = dma.done.wait (!%p5842_p3), %s5086_s20, 256  }
0x1068   : > { %6584 = vsyncadd (!%p5842_p3), %s5086_s20, 4294967040  ;;  %s8727_s16 = sld [smem:[#allocation17_spill]]  ;;  %s8728_s11 = sld [smem:[#allocation18_spill]] }
0x1069   : > { %s8729_s13 = smov %s6591_s14  ;;  %s8730_s14 = smov %s6595_s15 }
0x106e   : > { %p25_p5 = scmp.ge.s32.totalorder %s8727_s16, 4   ;;  %s8731_s15 = smov %s8728_s11 }
0x1070   :  { %27 = sbr.rel (!%p25_p5) target bundleno = 11 (0xb), region = 182 }
0x1077   :  { %5091 = vsyncpa [#allocation3], 1 }
0x1078   :  { %5093 = vsyncpa [#allocation3 + $0x1], 1 }
0x1079   :  { %5094 = vsyncpa [#allocation7], 1 }
0x107a   :  { %5095 = vsyncpa [#allocation10], 1 }
0x107b   :  { %5096 = vsyncpa [#allocation4], 1 }
0x107c   :  { %5098 = vsyncpa [#allocation4 + $0x1], 1 }

</bundles_post_ra>
